<compile_context>
chip_gen: v7x
topology: tpu7x:2x2x1
jax: 0.10.0
libtpu: 0.0.40
codegen_flags: <defaults>
</compile_context>

<pallas_src>
import functools
import math

import jax
import jax.numpy as jnp
from jax import lax
from jax.experimental import pallas as pl
from jax.experimental.pallas import tpu as pltpu

# ----------------------------------------------------------------------------
# Constants
# ----------------------------------------------------------------------------
LANES = 128                 # lane width / padded channel & feature dims
TM = 128                    # conv1 M tile (>=2 tiles -> v7x megacore can split)
NUM_CLASSES = 3
CONV1_OC = 6
CONV2_OC = 16
FC1_OUT, FC2_OUT = 120, 84
POOL2_HW = 5                # pooled spatial after conv2 (5x5) -> 16*5*5 flatten
P_REAL = POOL2_HW * POOL2_HW          # 25 real pooled pixels
P_PAD = 32                  # pooled pixels padded to a multiple of 8
N_PAD = 8                   # batch rows padded inside the fused tail kernel
TAIL_ROWS = 4 * P_PAD * N_PAD         # conv2 im2col rows: (corner q, pixel p, batch n)


def _round_up(x, m):
    return (x + m - 1) // m * m


# ----------------------------------------------------------------------------
# Pallas kernels
# ----------------------------------------------------------------------------
def _conv_matmul_relu_kernel(a_ref, w_ref, b_ref, o_ref):
    """o = relu(a @ w + b), one full-K dot per M tile (no K grid axis)."""
    acc = jnp.dot(a_ref[...], w_ref[...], preferred_element_type=jnp.float32)
    o_ref[...] = jnp.maximum(acc + b_ref[...], 0.0).astype(o_ref.dtype)


def _tail_kernel(a2_ref, w2_ref, b2_ref, w1_ref, b1_ref, wf2_ref, bf2_ref,
                 wf3_ref, bf3_ref, o_ref):
    """Fused: conv2 matmul + bias + ReLU, 2x2 max-pool, channel-major flatten
    (folded into the packed fc1 weight), fc1/fc2/fc3, masked softmax.

    a2 rows are ordered (q=pool corner, p=pooled pixel, n=batch-padded-to-8),
    so the 2x2 pool is a max over 4 contiguous 256-row blocks, and the flatten
    + fc1 is a sum over p of aligned (8,128)@(128,128) dots.
    """
    blk = P_PAD * N_PAD                                     # 256 rows per corner
    s = jnp.dot(a2_ref[...], w2_ref[...], preferred_element_type=jnp.float32)
    m = jnp.maximum(jnp.maximum(s[0 * blk:1 * blk], s[1 * blk:2 * blk]),
                    jnp.maximum(s[2 * blk:3 * blk], s[3 * blk:4 * blk]))
    pooled = jnp.maximum(m + b2_ref[...], 0.0).astype(jnp.bfloat16)  # (256,128)

    # fc1 with the torch view(-1, 16*5*5) flatten folded into w1's row order.
    h1 = jnp.dot(pooled[0:N_PAD, :], w1_ref[0:LANES, :],
                 preferred_element_type=jnp.float32)
    for p in range(1, P_REAL):
        h1 = h1 + jnp.dot(pooled[p * N_PAD:(p + 1) * N_PAD, :],
                          w1_ref[p * LANES:(p + 1) * LANES, :],
                          preferred_element_type=jnp.float32)
    h1 = jnp.maximum(h1 + b1_ref[...], 0.0).astype(jnp.bfloat16)

    h2 = jnp.dot(h1, wf2_ref[...], preferred_element_type=jnp.float32)
    h2 = jnp.maximum(h2 + bf2_ref[...], 0.0).astype(jnp.bfloat16)

    logits = jnp.dot(h2, wf3_ref[...],
                     preferred_element_type=jnp.float32) + bf3_ref[...]
    lane = lax.broadcasted_iota(jnp.int32, logits.shape, 1)
    logits = jnp.where(lane < NUM_CLASSES, logits, -jnp.inf)
    e = jnp.exp(logits - jnp.max(logits, axis=-1, keepdims=True))
    denom = jnp.sum(e, axis=-1, keepdims=True)
    o_ref[...] = e * pl.reciprocal(denom, approx=True)


# ----------------------------------------------------------------------------
# Pallas wrappers
# ----------------------------------------------------------------------------
def conv_matmul_relu(a, w, b):
    """a:(M_pad,K_pad) bf16, w:(K_pad,128) bf16, b:(1,128) f32 -> (M_pad,128) bf16."""
    M, Kp = a.shape
    _, NP = w.shape
    return pl.pallas_call(
        _conv_matmul_relu_kernel,
        out_shape=jax.ShapeDtypeStruct((M, NP), jnp.bfloat16),
        grid=(M // TM,),
        in_specs=[
            pl.BlockSpec((TM, Kp), lambda i: (i, 0)),
            pl.BlockSpec((Kp, NP), lambda i: (0, 0)),   # grid-constant -> DMA'd once
            pl.BlockSpec((1, NP), lambda i: (0, 0)),
        ],
        out_specs=pl.BlockSpec((TM, NP), lambda i: (i, 0)),
        compiler_params=pltpu.CompilerParams(
            dimension_semantics=("parallel",)),
    )(a, w, b)


def tail_fused(a2, p):
    """Single pallas_call for everything after pool1."""
    args = (a2, p["conv2_w"], p["conv2_b"], p["fc1_w"], p["fc1_b"],
            p["fc2_w"], p["fc2_b"], p["fc3_w"], p["fc3_b"])

    def full(arr):
        return pl.BlockSpec(arr.shape, lambda i: (0,) * arr.ndim)

    return pl.pallas_call(
        _tail_kernel,
        out_shape=jax.ShapeDtypeStruct((N_PAD, LANES), jnp.float32),
        grid=(1,),
        in_specs=[full(a) for a in args],
        out_specs=pl.BlockSpec((N_PAD, LANES), lambda i: (0, 0)),
    )(*args)


# ----------------------------------------------------------------------------
# Glue (inside the jitted forward; fuses in XLA)
# ----------------------------------------------------------------------------
def _im2col_nhwc(x, kh, kw):
    """Two-stage unfold (kh + kw slices).  Feature order f = j*(kh*C) + i*C + c."""
    N, H, W, C = x.shape
    oh, ow = H - kh + 1, W - kw + 1
    rows = jnp.concatenate([x[:, i:i + oh, :, :] for i in range(kh)], axis=-1)
    cols = jnp.concatenate([rows[:, :, j:j + ow, :] for j in range(kw)], axis=-1)
    return cols, oh, ow


def _conv_w_to_mat(w):
    """(OC, C, kh, kw) torch conv weight -> (kw*kh*C, OC), matching _im2col_nhwc."""
    return jnp.transpose(w, (3, 2, 1, 0)).reshape(-1, w.shape[0])


# ----------------------------------------------------------------------------
# Forward pass (jitted)
# ----------------------------------------------------------------------------
@functools.partial(jax.jit, static_argnums=(2, 3))
def classifier_forward(params, x, k1, k2):
    """Mirrors Classifier.forward: returns ((index, img), probs).

    index is a device int32 scalar; -1 encodes the module's `None`.
    """
    img = x
    N = x.shape[0]
    xb = jnp.transpose(x, (0, 2, 3, 1)).astype(jnp.bfloat16)      # NHWC, bf16 once

    # ---- conv1 (+bias+ReLU): tiled Pallas matmul, full-K dot per tile ----
    a1, oh1, ow1 = _im2col_nhwc(xb, k1, k1)
    K1 = k1 * k1 * 3
    M1 = N * oh1 * ow1
    K1p = params["conv1_w"].shape[0]
    M1p = _round_up(M1, TM)
    a1 = jnp.pad(a1.reshape(M1, K1), ((0, M1p - M1), (0, K1p - K1)))
    c1 = conv_matmul_relu(a1, params["conv1_w"], params["conv1_b"])  # bf16
    c1 = c1[:M1].reshape(N, oh1, ow1, LANES)[..., :CONV1_OC]         # real channels

    # ---- pool1 (2x2, floor) in XLA, channel-last, bf16 ----
    hp, wp = oh1 // 2, ow1 // 2
    p1 = c1[:, :2 * hp, :2 * wp, :].reshape(N, hp, 2, wp, 2, CONV1_OC).max(axis=(2, 4))

    # ---- fused tail: conv2 + pool2 + flatten + fc1/fc2/fc3 + softmax ----
    a2, oh2, ow2 = _im2col_nhwc(p1, k2, k2)                 # (N, 10, 10, 24)
    K2 = k2 * k2 * CONV1_OC
    a2 = a2.reshape(N, oh2 // 2, 2, ow2 // 2, 2, K2)        # (n, ph, dy, pw, dx, f)
    a2 = jnp.transpose(a2, (2, 4, 1, 3, 0, 5)).reshape(4, P_REAL, N, K2)
    a2 = jnp.pad(a2, ((0, 0), (0, P_PAD - P_REAL), (0, N_PAD - N), (0, LANES - K2)))
    a2 = a2.reshape(TAIL_ROWS, LANES)                       # (1024, 128) bf16
    probs = tail_fused(a2, params)[:N, :NUM_CLASSES]

    # torch: index = last i in 0..2 with probs[0, i] == max(probs); None -> -1.
    gmax = jnp.max(probs)
    index = jnp.max(jnp.where(probs[0] == gmax,
                              jnp.arange(NUM_CLASSES, dtype=jnp.int32), -1))
    # TODO(synk): the module's debug print() side effects are not reproduced.
    return (index, img), probs


# ----------------------------------------------------------------------------
# Parameter init (PyTorch layouts) + one-time TPU repack
# ----------------------------------------------------------------------------
def init_params(key, k1, k2, scale=3.0):
    def u(k, shape, fan_in):
        b = scale / math.sqrt(fan_in)
        return jax.random.uniform(k, shape, jnp.float32, -b, b)

    ks = jax.random.split(key, 10)
    feat = CONV2_OC * P_REAL
    return {
        "conv1_w": u(ks[0], (CONV1_OC, 3, k1, k1), 3 * k1 * k1),
        "conv1_b": u(ks[1], (CONV1_OC,), 3 * k1 * k1),
        "conv2_w": u(ks[2], (CONV2_OC, CONV1_OC, k2, k2), CONV1_OC * k2 * k2),
        "conv2_b": u(ks[3], (CONV2_OC,), CONV1_OC * k2 * k2),
        "fc1_w": u(ks[4], (FC1_OUT, feat), feat),            # torch (out, in)
        "fc1_b": u(ks[5], (FC1_OUT,), feat),
        "fc2_w": u(ks[6], (FC2_OUT, FC1_OUT), FC1_OUT),
        "fc2_b": u(ks[7], (FC2_OUT,), FC1_OUT),
        "fc3_w": u(ks[8], (NUM_CLASSES, FC2_OUT), FC2_OUT),
        "fc3_b": u(ks[9], (NUM_CLASSES,), FC2_OUT),
    }


def prepare_params(raw):
    bf = jnp.bfloat16

    def pad2(a, rows, cols):
        return jnp.pad(a, ((0, rows - a.shape[0]), (0, cols - a.shape[1])))

    def bias_row(b):
        return jnp.pad(b, (0, LANES - b.shape[0])).reshape(1, LANES).astype(jnp.float32)

    w1 = _conv_w_to_mat(raw["conv1_w"])                         # (k1*k1*3, 6)
    w1 = pad2(w1, _round_up(w1.shape[0], LANES), LANES).astype(bf)

    w2 = _conv_w_to_mat(raw["conv2_w"])                         # (24, 16)
    w2 = pad2(w2, LANES, LANES).astype(bf)

    # fc1: fold torch's channel-major flatten (c*25 + h*5 + w) into a packed
    # weight indexed by [p*128 + c, j] where p = h*5 + w.
    fw = raw["fc1_w"].reshape(FC1_OUT, CONV2_OC, POOL2_HW, POOL2_HW)
    fw = jnp.transpose(fw, (2, 3, 1, 0)).reshape(P_REAL, CONV2_OC, FC1_OUT)
    fw = jnp.pad(fw, ((0, 0), (0, LANES - CONV2_OC), (0, LANES - FC1_OUT)))
    fc1 = fw.reshape(P_REAL * LANES, LANES).astype(bf)

    fc2 = pad2(raw["fc2_w"].T, LANES, LANES).astype(bf)
    fc3 = pad2(raw["fc3_w"].T, LANES, LANES).astype(bf)

    return {
        "conv1_w": w1, "conv1_b": bias_row(raw["conv1_b"]),
        "conv2_w": w2, "conv2_b": bias_row(raw["conv2_b"]),
        "fc1_w": fc1, "fc1_b": bias_row(raw["fc1_b"]),
        "fc2_w": fc2, "fc2_b": bias_row(raw["fc2_b"]),
        "fc3_w": fc3, "fc3_b": bias_row(raw["fc3_b"]),
    }


# ----------------------------------------------------------------------------
# Pure-XLA f32 reference (for a numerical sanity check)
# ----------------------------------------------------------------------------
def _pool2x2_nchw(x):
    n, c, h, w = x.shape
    return x[:, :, :h // 2 * 2, :w // 2 * 2].reshape(
        n, c, h // 2, 2, w // 2, 2).max(axis=(3, 5))


def reference_forward(raw, x):
    dn = ("NCHW", "OIHW", "NCHW")
    h = lax.conv_general_dilated(x, raw["conv1_w"], (1, 1), "VALID",
                                 dimension_numbers=dn)
    h = jax.nn.relu(h + raw["conv1_b"][None, :, None, None])
    h = _pool2x2_nchw(h)
    h = lax.conv_general_dilated(h, raw["conv2_w"], (1, 1), "VALID",
                                 dimension_numbers=dn)
    h = jax.nn.relu(h + raw["conv2_b"][None, :, None, None])
    h = _pool2x2_nchw(h)
    h = h.reshape(x.shape[0], -1)
    h = jax.nn.relu(h @ raw["fc1_w"].T + raw["fc1_b"])
    h = jax.nn.relu(h @ raw["fc2_w"].T + raw["fc2_b"])
    logits = h @ raw["fc3_w"].T + raw["fc3_b"]
    return jax.nn.softmax(logits, axis=-1)


if __name__ == "__main__":
    # Scaled-down stand-in for img_size=416 / conv kernels 208 & 94:
    # 36 -conv(14)-> 23 -pool-> 11 -conv(2)-> 10 -pool-> 5 -> 16*5*5 flatten.
    IMG, K1, K2, BATCH = 36, 14, 2, 2

    root = jax.random.PRNGKey(0)
    pkey, xkey = jax.random.split(root)
    raw_params = init_params(pkey, K1, K2)
    params = prepare_params(raw_params)
    x = jax.random.normal(xkey, (BATCH, 3, IMG, IMG), jnp.float32)

    (index, img), probs = classifier_forward(params, x, K1, K2)
    jax.block_until_ready((index, img, probs))

    assert probs.shape == (BATCH, NUM_CLASSES)
    assert img.shape == x.shape
    assert bool(jnp.all(jnp.isfinite(probs)))
    assert int(index) in (-1, 0, 1, 2)          # -1 encodes torch's `None`

    # bf16 MXU inputs (f32 accumulate) vs f32 XLA reference: expect ~1e-2 agreement.
    ref = reference_forward(raw_params, x)
    err = float(jnp.max(jnp.abs(probs - ref)))
    assert err < 5e-2, f"max |probs - ref| = {err}"

    print("KERNEL_OK")
</pallas_src>

<mosaic_0001>
module attributes {stable_mosaic.version = 11 : i64} {
  func.func @_conv_matmul_relu_kernel(%arg0: i32, %arg1: memref<128x640xbf16, #tpu.memory_space<vmem>>, %arg2: memref<640x128xbf16, #tpu.memory_space<vmem>>, %arg3: memref<1x128xf32, #tpu.memory_space<vmem>>, %arg4: memref<128x128xbf16, #tpu.memory_space<vmem>>) attributes {dimension_semantics = [#tpu.dimension_semantics<parallel>], iteration_bounds = array<i64: 9>, scalar_prefetch = 0 : i64, scratch_operands = 0 : i64, tpu.core_type = #tpu.core_type<tc>, window_params = [{transform_indices = @transform_0, window_bounds = array<i64: 128, 640>}, {pipeline_mode = #tpu.pipeline_mode<synchronous>, transform_indices = @transform_1, window_bounds = array<i64: 640, 128>}, {pipeline_mode = #tpu.pipeline_mode<synchronous>, transform_indices = @transform_2, window_bounds = array<i64: 1, 128>}, {transform_indices = @transform_3, window_bounds = array<i64: 128, 128>}]} {
    %c0 = arith.constant 0 : index
    %c0_0 = arith.constant 0 : index
    %0 = vector.load %arg1[%c0, %c0_0] : memref<128x640xbf16, #tpu.memory_space<vmem>>, vector<128x640xbf16>
    %c0_1 = arith.constant 0 : index
    %c0_2 = arith.constant 0 : index
    %1 = vector.load %arg2[%c0_1, %c0_2] : memref<640x128xbf16, #tpu.memory_space<vmem>>, vector<640x128xbf16>
    %cst = arith.constant dense<0.000000e+00> : vector<128x128xf32>
    %2 = tpu.matmul %0, %1, %cst {dimension_numbers = #tpu.dot_dimension_numbers<[1], [0], [0], [1], [0, 0, 1, 1], [], []>} : vector<128x640xbf16>, vector<640x128xbf16>, vector<128x128xf32> -> vector<128x128xf32>
    %c0_3 = arith.constant 0 : index
    %c0_4 = arith.constant 0 : index
    %3 = vector.load %arg3[%c0_3, %c0_4] : memref<1x128xf32, #tpu.memory_space<vmem>>, vector<1x128xf32>
    %4 = vector.broadcast %3 : vector<1x128xf32> to vector<128x128xf32>
    %5 = arith.addf %2, %4 : vector<128x128xf32>
    %cst_5 = arith.constant 0.000000e+00 : f32
    %6 = vector.broadcast %cst_5 : f32 to vector<128x128xf32>
    %7 = arith.maximumf %5, %6 : vector<128x128xf32>
    %8 = arith.truncf %7 : vector<128x128xf32> to vector<128x128xbf16>
    %c0_6 = arith.constant 0 : index
    %c0_7 = arith.constant 0 : index
    %9 = vector.load %arg4[%c0_6, %c0_7] : memref<128x128xbf16, #tpu.memory_space<vmem>>, vector<128x128xbf16>
    tpu.vector_store %arg4[%c0_6, %c0_7], %8 {strides = array<i32>} : memref<128x128xbf16, #tpu.memory_space<vmem>>, vector<128x128xbf16>,
    return
  }
  func.func @transform_0(%arg0: i32) -> (i32, i32) {
    %c0_i32 = arith.constant 0 : i32
    %c0_i32_0 = arith.constant 0 : i32
    return %arg0, %c0_i32 : i32, i32
  }
  func.func @transform_1(%arg0: i32) -> (i32, i32) {
    %c0_i32 = arith.constant 0 : i32
    %c0_i32_0 = arith.constant 0 : i32
    %c0_i32_1 = arith.constant 0 : i32
    return %c0_i32, %c0_i32_0 : i32, i32
  }
  func.func @transform_2(%arg0: i32) -> (i32, i32) {
    %c0_i32 = arith.constant 0 : i32
    %c0_i32_0 = arith.constant 0 : i32
    %c0_i32_1 = arith.constant 0 : i32
    return %c0_i32, %c0_i32_0 : i32, i32
  }
  func.func @transform_3(%arg0: i32) -> (i32, i32) {
    %c0_i32 = arith.constant 0 : i32
    %c0_i32_0 = arith.constant 0 : i32
    return %arg0, %c0_i32 : i32, i32
  }
}

module attributes {stable_mosaic.version = 11 : i64} {
  func.func @_tail_kernel(%arg0: i32, %arg1: memref<1024x128xbf16, #tpu.memory_space<vmem>>, %arg2: memref<128x128xbf16, #tpu.memory_space<vmem>>, %arg3: memref<1x128xf32, #tpu.memory_space<vmem>>, %arg4: memref<3200x128xbf16, #tpu.memory_space<vmem>>, %arg5: memref<1x128xf32, #tpu.memory_space<vmem>>, %arg6: memref<128x128xbf16, #tpu.memory_space<vmem>>, %arg7: memref<1x128xf32, #tpu.memory_space<vmem>>, %arg8: memref<128x128xbf16, #tpu.memory_space<vmem>>, %arg9: memref<1x128xf32, #tpu.memory_space<vmem>>, %arg10: memref<8x128xf32, #tpu.memory_space<vmem>>) attributes {dimension_semantics = [#tpu.dimension_semantics<arbitrary>], iteration_bounds = array<i64: 1>, scalar_prefetch = 0 : i64, scratch_operands = 0 : i64, tpu.core_type = #tpu.core_type<tc>, window_params = [{pipeline_mode = #tpu.pipeline_mode<synchronous>, transform_indices = @transform_0, window_bounds = array<i64: 1024, 128>}, {pipeline_mode = #tpu.pipeline_mode<synchronous>, transform_indices = @transform_1, window_bounds = array<i64: 128, 128>}, {pipeline_mode = #tpu.pipeline_mode<synchronous>, transform_indices = @transform_2, window_bounds = array<i64: 1, 128>}, {pipeline_mode = #tpu.pipeline_mode<synchronous>, transform_indices = @transform_3, window_bounds = array<i64: 3200, 128>}, {pipeline_mode = #tpu.pipeline_mode<synchronous>, transform_indices = @transform_4, window_bounds = array<i64: 1, 128>}, {pipeline_mode = #tpu.pipeline_mode<synchronous>, transform_indices = @transform_5, window_bounds = array<i64: 128, 128>}, {pipeline_mode = #tpu.pipeline_mode<synchronous>, transform_indices = @transform_6, window_bounds = array<i64: 1, 128>}, {pipeline_mode = #tpu.pipeline_mode<synchronous>, transform_indices = @transform_7, window_bounds = array<i64: 128, 128>}, {pipeline_mode = #tpu.pipeline_mode<synchronous>, transform_indices = @transform_8, window_bounds = array<i64: 1, 128>}, {pipeline_mode = #tpu.pipeline_mode<synchronous>, transform_indices = @transform_9, window_bounds = array<i64: 8, 128>}]} {
    %c0 = arith.constant 0 : index
    %c0_0 = arith.constant 0 : index
    %0 = vector.load %arg1[%c0, %c0_0] : memref<1024x128xbf16, #tpu.memory_space<vmem>>, vector<1024x128xbf16>
    %c0_1 = arith.constant 0 : index
    %c0_2 = arith.constant 0 : index
    %1 = vector.load %arg2[%c0_1, %c0_2] : memref<128x128xbf16, #tpu.memory_space<vmem>>, vector<128x128xbf16>
    %cst = arith.constant dense<0.000000e+00> : vector<1024x128xf32>
    %2 = tpu.matmul %0, %1, %cst {dimension_numbers = #tpu.dot_dimension_numbers<[1], [0], [0], [1], [0, 0, 1, 1], [], []>} : vector<1024x128xbf16>, vector<128x128xbf16>, vector<1024x128xf32> -> vector<1024x128xf32>
    %3 = vector.extract_strided_slice %2 {offsets = [0, 0], sizes = [256, 128], strides = [1, 1]} : vector<1024x128xf32> to vector<256x128xf32>
    %4 = vector.extract_strided_slice %2 {offsets = [256, 0], sizes = [256, 128], strides = [1, 1]} : vector<1024x128xf32> to vector<256x128xf32>
    %5 = arith.maximumf %3, %4 : vector<256x128xf32>
    %6 = vector.extract_strided_slice %2 {offsets = [512, 0], sizes = [256, 128], strides = [1, 1]} : vector<1024x128xf32> to vector<256x128xf32>
    %7 = vector.extract_strided_slice %2 {offsets = [768, 0], sizes = [256, 128], strides = [1, 1]} : vector<1024x128xf32> to vector<256x128xf32>
    %8 = arith.maximumf %6, %7 : vector<256x128xf32>
    %9 = arith.maximumf %5, %8 : vector<256x128xf32>
    %c0_3 = arith.constant 0 : index
    %c0_4 = arith.constant 0 : index
    %10 = vector.load %arg3[%c0_3, %c0_4] : memref<1x128xf32, #tpu.memory_space<vmem>>, vector<1x128xf32>
    %11 = vector.broadcast %10 : vector<1x128xf32> to vector<256x128xf32>
    %12 = arith.addf %9, %11 : vector<256x128xf32>
    %cst_5 = arith.constant 0.000000e+00 : f32
    %13 = vector.broadcast %cst_5 : f32 to vector<256x128xf32>
    %14 = arith.maximumf %12, %13 : vector<256x128xf32>
    %15 = arith.truncf %14 : vector<256x128xf32> to vector<256x128xbf16>
    %16 = vector.extract_strided_slice %15 {offsets = [0, 0], sizes = [8, 128], strides = [1, 1]} : vector<256x128xbf16> to vector<8x128xbf16>
    %c0_6 = arith.constant 0 : index
    %c0_7 = arith.constant 0 : index
    %17 = vector.load %arg4[%c0_6, %c0_7] : memref<3200x128xbf16, #tpu.memory_space<vmem>>, vector<128x128xbf16>
    %cst_8 = arith.constant dense<0.000000e+00> : vector<8x128xf32>
    %18 = tpu.matmul %16, %17, %cst_8 {dimension_numbers = #tpu.dot_dimension_numbers<[1], [0], [0], [1], [0, 0, 1, 1], [], []>} : vector<8x128xbf16>, vector<128x128xbf16>, vector<8x128xf32> -> vector<8x128xf32>
    %19 = vector.extract_strided_slice %15 {offsets = [8, 0], sizes = [8, 128], strides = [1, 1]} : vector<256x128xbf16> to vector<8x128xbf16>
    %c128 = arith.constant 128 : index
    %c0_9 = arith.constant 0 : index
    %20 = vector.load %arg4[%c128, %c0_9] : memref<3200x128xbf16, #tpu.memory_space<vmem>>, vector<128x128xbf16>
    %cst_10 = arith.constant dense<0.000000e+00> : vector<8x128xf32>
    %21 = tpu.matmul %19, %20, %cst_10 {dimension_numbers = #tpu.dot_dimension_numbers<[1], [0], [0], [1], [0, 0, 1, 1], [], []>} : vector<8x128xbf16>, vector<128x128xbf16>, vector<8x128xf32> -> vector<8x128xf32>
    %22 = arith.addf %18, %21 : vector<8x128xf32>
    %23 = vector.extract_strided_slice %15 {offsets = [16, 0], sizes = [8, 128], strides = [1, 1]} : vector<256x128xbf16> to vector<8x128xbf16>
    %c256 = arith.constant 256 : index
    %c0_11 = arith.constant 0 : index
    %24 = vector.load %arg4[%c256, %c0_11] : memref<3200x128xbf16, #tpu.memory_space<vmem>>, vector<128x128xbf16>
    %cst_12 = arith.constant dense<0.000000e+00> : vector<8x128xf32>
    %25 = tpu.matmul %23, %24, %cst_12 {dimension_numbers = #tpu.dot_dimension_numbers<[1], [0], [0], [1], [0, 0, 1, 1], [], []>} : vector<8x128xbf16>, vector<128x128xbf16>, vector<8x128xf32> -> vector<8x128xf32>
    %26 = arith.addf %22, %25 : vector<8x128xf32>
    %27 = vector.extract_strided_slice %15 {offsets = [24, 0], sizes = [8, 128], strides = [1, 1]} : vector<256x128xbf16> to vector<8x128xbf16>
    %c384 = arith.constant 384 : index
    %c0_13 = arith.constant 0 : index
    %28 = vector.load %arg4[%c384, %c0_13] : memref<3200x128xbf16, #tpu.memory_space<vmem>>, vector<128x128xbf16>
    %cst_14 = arith.constant dense<0.000000e+00> : vector<8x128xf32>
    %29 = tpu.matmul %27, %28, %cst_14 {dimension_numbers = #tpu.dot_dimension_numbers<[1], [0], [0], [1], [0, 0, 1, 1], [], []>} : vector<8x128xbf16>, vector<128x128xbf16>, vector<8x128xf32> -> vector<8x128xf32>
    %30 = arith.addf %26, %29 : vector<8x128xf32>
    %31 = vector.extract_strided_slice %15 {offsets = [32, 0], sizes = [8, 128], strides = [1, 1]} : vector<256x128xbf16> to vector<8x128xbf16>
    %c512 = arith.constant 512 : index
    %c0_15 = arith.constant 0 : index
    %32 = vector.load %arg4[%c512, %c0_15] : memref<3200x128xbf16, #tpu.memory_space<vmem>>, vector<128x128xbf16>
    %cst_16 = arith.constant dense<0.000000e+00> : vector<8x128xf32>
    %33 = tpu.matmul %31, %32, %cst_16 {dimension_numbers = #tpu.dot_dimension_numbers<[1], [0], [0], [1], [0, 0, 1, 1], [], []>} : vector<8x128xbf16>, vector<128x128xbf16>, vector<8x128xf32> -> vector<8x128xf32>
    %34 = arith.addf %30, %33 : vector<8x128xf32>
    %35 = vector.extract_strided_slice %15 {offsets = [40, 0], sizes = [8, 128], strides = [1, 1]} : vector<256x128xbf16> to vector<8x128xbf16>
    %c640 = arith.constant 640 : index
    %c0_17 = arith.constant 0 : index
    %36 = vector.load %arg4[%c640, %c0_17] : memref<3200x128xbf16, #tpu.memory_space<vmem>>, vector<128x128xbf16>
    %cst_18 = arith.constant dense<0.000000e+00> : vector<8x128xf32>
    %37 = tpu.matmul %35, %36, %cst_18 {dimension_numbers = #tpu.dot_dimension_numbers<[1], [0], [0], [1], [0, 0, 1, 1], [], []>} : vector<8x128xbf16>, vector<128x128xbf16>, vector<8x128xf32> -> vector<8x128xf32>
    %38 = arith.addf %34, %37 : vector<8x128xf32>
    %39 = vector.extract_strided_slice %15 {offsets = [48, 0], sizes = [8, 128], strides = [1, 1]} : vector<256x128xbf16> to vector<8x128xbf16>
    %c768 = arith.constant 768 : index
    %c0_19 = arith.constant 0 : index
    %40 = vector.load %arg4[%c768, %c0_19] : memref<3200x128xbf16, #tpu.memory_space<vmem>>, vector<128x128xbf16>
    %cst_20 = arith.constant dense<0.000000e+00> : vector<8x128xf32>
    %41 = tpu.matmul %39, %40, %cst_20 {dimension_numbers = #tpu.dot_dimension_numbers<[1], [0], [0], [1], [0, 0, 1, 1], [], []>} : vector<8x128xbf16>, vector<128x128xbf16>, vector<8x128xf32> -> vector<8x128xf32>
    %42 = arith.addf %38, %41 : vector<8x128xf32>
    %43 = vector.extract_strided_slice %15 {offsets = [56, 0], sizes = [8, 128], strides = [1, 1]} : vector<256x128xbf16> to vector<8x128xbf16>
    %c896 = arith.constant 896 : index
    %c0_21 = arith.constant 0 : index
    %44 = vector.load %arg4[%c896, %c0_21] : memref<3200x128xbf16, #tpu.memory_space<vmem>>, vector<128x128xbf16>
    %cst_22 = arith.constant dense<0.000000e+00> : vector<8x128xf32>
    %45 = tpu.matmul %43, %44, %cst_22 {dimension_numbers = #tpu.dot_dimension_numbers<[1], [0], [0], [1], [0, 0, 1, 1], [], []>} : vector<8x128xbf16>, vector<128x128xbf16>, vector<8x128xf32> -> vector<8x128xf32>
    %46 = arith.addf %42, %45 : vector<8x128xf32>
    %47 = vector.extract_strided_slice %15 {offsets = [64, 0], sizes = [8, 128], strides = [1, 1]} : vector<256x128xbf16> to vector<8x128xbf16>
    %c1024 = arith.constant 1024 : index
    %c0_23 = arith.constant 0 : index
    %48 = vector.load %arg4[%c1024, %c0_23] : memref<3200x128xbf16, #tpu.memory_space<vmem>>, vector<128x128xbf16>
    %cst_24 = arith.constant dense<0.000000e+00> : vector<8x128xf32>
    %49 = tpu.matmul %47, %48, %cst_24 {dimension_numbers = #tpu.dot_dimension_numbers<[1], [0], [0], [1], [0, 0, 1, 1], [], []>} : vector<8x128xbf16>, vector<128x128xbf16>, vector<8x128xf32> -> vector<8x128xf32>
    %50 = arith.addf %46, %49 : vector<8x128xf32>
    %51 = vector.extract_strided_slice %15 {offsets = [72, 0], sizes = [8, 128], strides = [1, 1]} : vector<256x128xbf16> to vector<8x128xbf16>
    %c1152 = arith.constant 1152 : index
    %c0_25 = arith.constant 0 : index
    %52 = vector.load %arg4[%c1152, %c0_25] : memref<3200x128xbf16, #tpu.memory_space<vmem>>, vector<128x128xbf16>
    %cst_26 = arith.constant dense<0.000000e+00> : vector<8x128xf32>
    %53 = tpu.matmul %51, %52, %cst_26 {dimension_numbers = #tpu.dot_dimension_numbers<[1], [0], [0], [1], [0, 0, 1, 1], [], []>} : vector<8x128xbf16>, vector<128x128xbf16>, vector<8x128xf32> -> vector<8x128xf32>
    %54 = arith.addf %50, %53 : vector<8x128xf32>
    %55 = vector.extract_strided_slice %15 {offsets = [80, 0], sizes = [8, 128], strides = [1, 1]} : vector<256x128xbf16> to vector<8x128xbf16>
    %c1280 = arith.constant 1280 : index
    %c0_27 = arith.constant 0 : index
    %56 = vector.load %arg4[%c1280, %c0_27] : memref<3200x128xbf16, #tpu.memory_space<vmem>>, vector<128x128xbf16>
    %cst_28 = arith.constant dense<0.000000e+00> : vector<8x128xf32>
    %57 = tpu.matmul %55, %56, %cst_28 {dimension_numbers = #tpu.dot_dimension_numbers<[1], [0], [0], [1], [0, 0, 1, 1], [], []>} : vector<8x128xbf16>, vector<128x128xbf16>, vector<8x128xf32> -> vector<8x128xf32>
    %58 = arith.addf %54, %57 : vector<8x128xf32>
    %59 = vector.extract_strided_slice %15 {offsets = [88, 0], sizes = [8, 128], strides = [1, 1]} : vector<256x128xbf16> to vector<8x128xbf16>
    %c1408 = arith.constant 1408 : index
    %c0_29 = arith.constant 0 : index
    %60 = vector.load %arg4[%c1408, %c0_29] : memref<3200x128xbf16, #tpu.memory_space<vmem>>, vector<128x128xbf16>
    %cst_30 = arith.constant dense<0.000000e+00> : vector<8x128xf32>
    %61 = tpu.matmul %59, %60, %cst_30 {dimension_numbers = #tpu.dot_dimension_numbers<[1], [0], [0], [1], [0, 0, 1, 1], [], []>} : vector<8x128xbf16>, vector<128x128xbf16>, vector<8x128xf32> -> vector<8x128xf32>
    %62 = arith.addf %58, %61 : vector<8x128xf32>
    %63 = vector.extract_strided_slice %15 {offsets = [96, 0], sizes = [8, 128], strides = [1, 1]} : vector<256x128xbf16> to vector<8x128xbf16>
    %c1536 = arith.constant 1536 : index
    %c0_31 = arith.constant 0 : index
    %64 = vector.load %arg4[%c1536, %c0_31] : memref<3200x128xbf16, #tpu.memory_space<vmem>>, vector<128x128xbf16>
    %cst_32 = arith.constant dense<0.000000e+00> : vector<8x128xf32>
    %65 = tpu.matmul %63, %64, %cst_32 {dimension_numbers = #tpu.dot_dimension_numbers<[1], [0], [0], [1], [0, 0, 1, 1], [], []>} : vector<8x128xbf16>, vector<128x128xbf16>, vector<8x128xf32> -> vector<8x128xf32>
    %66 = arith.addf %62, %65 : vector<8x128xf32>
    %67 = vector.extract_strided_slice %15 {offsets = [104, 0], sizes = [8, 128], strides = [1, 1]} : vector<256x128xbf16> to vector<8x128xbf16>
    %c1664 = arith.constant 1664 : index
    %c0_33 = arith.constant 0 : index
    %68 = vector.load %arg4[%c1664, %c0_33] : memref<3200x128xbf16, #tpu.memory_space<vmem>>, vector<128x128xbf16>
    %cst_34 = arith.constant dense<0.000000e+00> : vector<8x128xf32>
    %69 = tpu.matmul %67, %68, %cst_34 {dimension_numbers = #tpu.dot_dimension_numbers<[1], [0], [0], [1], [0, 0, 1, 1], [], []>} : vector<8x128xbf16>, vector<128x128xbf16>, vector<8x128xf32> -> vector<8x128xf32>
    %70 = arith.addf %66, %69 : vector<8x128xf32>
    %71 = vector.extract_strided_slice %15 {offsets = [112, 0], sizes = [8, 128], strides = [1, 1]} : vector<256x128xbf16> to vector<8x128xbf16>
    %c1792 = arith.constant 1792 : index
    %c0_35 = arith.constant 0 : index
    %72 = vector.load %arg4[%c1792, %c0_35] : memref<3200x128xbf16, #tpu.memory_space<vmem>>, vector<128x128xbf16>
    %cst_36 = arith.constant dense<0.000000e+00> : vector<8x128xf32>
    %73 = tpu.matmul %71, %72, %cst_36 {dimension_numbers = #tpu.dot_dimension_numbers<[1], [0], [0], [1], [0, 0, 1, 1], [], []>} : vector<8x128xbf16>, vector<128x128xbf16>, vector<8x128xf32> -> vector<8x128xf32>
    %74 = arith.addf %70, %73 : vector<8x128xf32>
    %75 = vector.extract_strided_slice %15 {offsets = [120, 0], sizes = [8, 128], strides = [1, 1]} : vector<256x128xbf16> to vector<8x128xbf16>
    %c1920 = arith.constant 1920 : index
    %c0_37 = arith.constant 0 : index
    %76 = vector.load %arg4[%c1920, %c0_37] : memref<3200x128xbf16, #tpu.memory_space<vmem>>, vector<128x128xbf16>
    %cst_38 = arith.constant dense<0.000000e+00> : vector<8x128xf32>
    %77 = tpu.matmul %75, %76, %cst_38 {dimension_numbers = #tpu.dot_dimension_numbers<[1], [0], [0], [1], [0, 0, 1, 1], [], []>} : vector<8x128xbf16>, vector<128x128xbf16>, vector<8x128xf32> -> vector<8x128xf32>
    %78 = arith.addf %74, %77 : vector<8x128xf32>
    %79 = vector.extract_strided_slice %15 {offsets = [128, 0], sizes = [8, 128], strides = [1, 1]} : vector<256x128xbf16> to vector<8x128xbf16>
    %c2048 = arith.constant 2048 : index
    %c0_39 = arith.constant 0 : index
    %80 = vector.load %arg4[%c2048, %c0_39] : memref<3200x128xbf16, #tpu.memory_space<vmem>>, vector<128x128xbf16>
    %cst_40 = arith.constant dense<0.000000e+00> : vector<8x128xf32>
    %81 = tpu.matmul %79, %80, %cst_40 {dimension_numbers = #tpu.dot_dimension_numbers<[1], [0], [0], [1], [0, 0, 1, 1], [], []>} : vector<8x128xbf16>, vector<128x128xbf16>, vector<8x128xf32> -> vector<8x128xf32>
    %82 = arith.addf %78, %81 : vector<8x128xf32>
    %83 = vector.extract_strided_slice %15 {offsets = [136, 0], sizes = [8, 128], strides = [1, 1]} : vector<256x128xbf16> to vector<8x128xbf16>
    %c2176 = arith.constant 2176 : index
    %c0_41 = arith.constant 0 : index
    %84 = vector.load %arg4[%c2176, %c0_41] : memref<3200x128xbf16, #tpu.memory_space<vmem>>, vector<128x128xbf16>
    %cst_42 = arith.constant dense<0.000000e+00> : vector<8x128xf32>
    %85 = tpu.matmul %83, %84, %cst_42 {dimension_numbers = #tpu.dot_dimension_numbers<[1], [0], [0], [1], [0, 0, 1, 1], [], []>} : vector<8x128xbf16>, vector<128x128xbf16>, vector<8x128xf32> -> vector<8x128xf32>
    %86 = arith.addf %82, %85 : vector<8x128xf32>
    %87 = vector.extract_strided_slice %15 {offsets = [144, 0], sizes = [8, 128], strides = [1, 1]} : vector<256x128xbf16> to vector<8x128xbf16>
    %c2304 = arith.constant 2304 : index
    %c0_43 = arith.constant 0 : index
    %88 = vector.load %arg4[%c2304, %c0_43] : memref<3200x128xbf16, #tpu.memory_space<vmem>>, vector<128x128xbf16>
    %cst_44 = arith.constant dense<0.000000e+00> : vector<8x128xf32>
    %89 = tpu.matmul %87, %88, %cst_44 {dimension_numbers = #tpu.dot_dimension_numbers<[1], [0], [0], [1], [0, 0, 1, 1], [], []>} : vector<8x128xbf16>, vector<128x128xbf16>, vector<8x128xf32> -> vector<8x128xf32>
    %90 = arith.addf %86, %89 : vector<8x128xf32>
    %91 = vector.extract_strided_slice %15 {offsets = [152, 0], sizes = [8, 128], strides = [1, 1]} : vector<256x128xbf16> to vector<8x128xbf16>
    %c2432 = arith.constant 2432 : index
    %c0_45 = arith.constant 0 : index
    %92 = vector.load %arg4[%c2432, %c0_45] : memref<3200x128xbf16, #tpu.memory_space<vmem>>, vector<128x128xbf16>
    %cst_46 = arith.constant dense<0.000000e+00> : vector<8x128xf32>
    %93 = tpu.matmul %91, %92, %cst_46 {dimension_numbers = #tpu.dot_dimension_numbers<[1], [0], [0], [1], [0, 0, 1, 1], [], []>} : vector<8x128xbf16>, vector<128x128xbf16>, vector<8x128xf32> -> vector<8x128xf32>
    %94 = arith.addf %90, %93 : vector<8x128xf32>
    %95 = vector.extract_strided_slice %15 {offsets = [160, 0], sizes = [8, 128], strides = [1, 1]} : vector<256x128xbf16> to vector<8x128xbf16>
    %c2560 = arith.constant 2560 : index
    %c0_47 = arith.constant 0 : index
    %96 = vector.load %arg4[%c2560, %c0_47] : memref<3200x128xbf16, #tpu.memory_space<vmem>>, vector<128x128xbf16>
    %cst_48 = arith.constant dense<0.000000e+00> : vector<8x128xf32>
    %97 = tpu.matmul %95, %96, %cst_48 {dimension_numbers = #tpu.dot_dimension_numbers<[1], [0], [0], [1], [0, 0, 1, 1], [], []>} : vector<8x128xbf16>, vector<128x128xbf16>, vector<8x128xf32> -> vector<8x128xf32>
    %98 = arith.addf %94, %97 : vector<8x128xf32>
    %99 = vector.extract_strided_slice %15 {offsets = [168, 0], sizes = [8, 128], strides = [1, 1]} : vector<256x128xbf16> to vector<8x128xbf16>
    %c2688 = arith.constant 2688 : index
    %c0_49 = arith.constant 0 : index
    %100 = vector.load %arg4[%c2688, %c0_49] : memref<3200x128xbf16, #tpu.memory_space<vmem>>, vector<128x128xbf16>
    %cst_50 = arith.constant dense<0.000000e+00> : vector<8x128xf32>
    %101 = tpu.matmul %99, %100, %cst_50 {dimension_numbers = #tpu.dot_dimension_numbers<[1], [0], [0], [1], [0, 0, 1, 1], [], []>} : vector<8x128xbf16>, vector<128x128xbf16>, vector<8x128xf32> -> vector<8x128xf32>
    %102 = arith.addf %98, %101 : vector<8x128xf32>
    %103 = vector.extract_strided_slice %15 {offsets = [176, 0], sizes = [8, 128], strides = [1, 1]} : vector<256x128xbf16> to vector<8x128xbf16>
    %c2816 = arith.constant 2816 : index
    %c0_51 = arith.constant 0 : index
    %104 = vector.load %arg4[%c2816, %c0_51] : memref<3200x128xbf16, #tpu.memory_space<vmem>>, vector<128x128xbf16>
    %cst_52 = arith.constant dense<0.000000e+00> : vector<8x128xf32>
    %105 = tpu.matmul %103, %104, %cst_52 {dimension_numbers = #tpu.dot_dimension_numbers<[1], [0], [0], [1], [0, 0, 1, 1], [], []>} : vector<8x128xbf16>, vector<128x128xbf16>, vector<8x128xf32> -> vector<8x128xf32>
    %106 = arith.addf %102, %105 : vector<8x128xf32>
    %107 = vector.extract_strided_slice %15 {offsets = [184, 0], sizes = [8, 128], strides = [1, 1]} : vector<256x128xbf16> to vector<8x128xbf16>
    %c2944 = arith.constant 2944 : index
    %c0_53 = arith.constant 0 : index
    %108 = vector.load %arg4[%c2944, %c0_53] : memref<3200x128xbf16, #tpu.memory_space<vmem>>, vector<128x128xbf16>
    %cst_54 = arith.constant dense<0.000000e+00> : vector<8x128xf32>
    %109 = tpu.matmul %107, %108, %cst_54 {dimension_numbers = #tpu.dot_dimension_numbers<[1], [0], [0], [1], [0, 0, 1, 1], [], []>} : vector<8x128xbf16>, vector<128x128xbf16>, vector<8x128xf32> -> vector<8x128xf32>
    %110 = arith.addf %106, %109 : vector<8x128xf32>
    %111 = vector.extract_strided_slice %15 {offsets = [192, 0], sizes = [8, 128], strides = [1, 1]} : vector<256x128xbf16> to vector<8x128xbf16>
    %c3072 = arith.constant 3072 : index
    %c0_55 = arith.constant 0 : index
    %112 = vector.load %arg4[%c3072, %c0_55] : memref<3200x128xbf16, #tpu.memory_space<vmem>>, vector<128x128xbf16>
    %cst_56 = arith.constant dense<0.000000e+00> : vector<8x128xf32>
    %113 = tpu.matmul %111, %112, %cst_56 {dimension_numbers = #tpu.dot_dimension_numbers<[1], [0], [0], [1], [0, 0, 1, 1], [], []>} : vector<8x128xbf16>, vector<128x128xbf16>, vector<8x128xf32> -> vector<8x128xf32>
    %114 = arith.addf %110, %113 : vector<8x128xf32>
    %c0_57 = arith.constant 0 : index
    %c0_58 = arith.constant 0 : index
    %115 = vector.load %arg5[%c0_57, %c0_58] : memref<1x128xf32, #tpu.memory_space<vmem>>, vector<1x128xf32>
    %116 = vector.broadcast %115 : vector<1x128xf32> to vector<8x128xf32>
    %117 = arith.addf %114, %116 : vector<8x128xf32>
    %cst_59 = arith.constant 0.000000e+00 : f32
    %118 = vector.broadcast %cst_59 : f32 to vector<8x128xf32>
    %119 = arith.maximumf %117, %118 : vector<8x128xf32>
    %120 = arith.truncf %119 : vector<8x128xf32> to vector<8x128xbf16>
    %c0_60 = arith.constant 0 : index
    %c0_61 = arith.constant 0 : index
    %121 = vector.load %arg6[%c0_60, %c0_61] : memref<128x128xbf16, #tpu.memory_space<vmem>>, vector<128x128xbf16>
    %cst_62 = arith.constant dense<0.000000e+00> : vector<8x128xf32>
    %122 = tpu.matmul %120, %121, %cst_62 {dimension_numbers = #tpu.dot_dimension_numbers<[1], [0], [0], [1], [0, 0, 1, 1], [], []>} : vector<8x128xbf16>, vector<128x128xbf16>, vector<8x128xf32> -> vector<8x128xf32>
    %c0_63 = arith.constant 0 : index
    %c0_64 = arith.constant 0 : index
    %123 = vector.load %arg7[%c0_63, %c0_64] : memref<1x128xf32, #tpu.memory_space<vmem>>, vector<1x128xf32>
    %124 = vector.broadcast %123 : vector<1x128xf32> to vector<8x128xf32>
    %125 = arith.addf %122, %124 : vector<8x128xf32>
    %cst_65 = arith.constant 0.000000e+00 : f32
    %126 = vector.broadcast %cst_65 : f32 to vector<8x128xf32>
    %127 = arith.maximumf %125, %126 : vector<8x128xf32>
    %128 = arith.truncf %127 : vector<8x128xf32> to vector<8x128xbf16>
    %c0_66 = arith.constant 0 : index
    %c0_67 = arith.constant 0 : index
    %129 = vector.load %arg8[%c0_66, %c0_67] : memref<128x128xbf16, #tpu.memory_space<vmem>>, vector<128x128xbf16>
    %cst_68 = arith.constant dense<0.000000e+00> : vector<8x128xf32>
    %130 = tpu.matmul %128, %129, %cst_68 {dimension_numbers = #tpu.dot_dimension_numbers<[1], [0], [0], [1], [0, 0, 1, 1], [], []>} : vector<8x128xbf16>, vector<128x128xbf16>, vector<8x128xf32> -> vector<8x128xf32>
    %c0_69 = arith.constant 0 : index
    %c0_70 = arith.constant 0 : index
    %131 = vector.load %arg9[%c0_69, %c0_70] : memref<1x128xf32, #tpu.memory_space<vmem>>, vector<1x128xf32>
    %132 = vector.broadcast %131 : vector<1x128xf32> to vector<8x128xf32>
    %133 = arith.addf %130, %132 : vector<8x128xf32>
    %134 = tpu.iota {dimensions = array<i32: 1>} : vector<8x128xi32>
    %c3_i32 = arith.constant 3 : i32
    %135 = vector.broadcast %c3_i32 : i32 to vector<8x128xi32>
    %136 = arith.cmpi slt, %134, %135 : vector<8x128xi32>
    %cst_71 = arith.constant 0xFF800000 : f32
    %137 = vector.broadcast %cst_71 : f32 to vector<8x128xf32>
    %138 = arith.select %136, %133, %137 : vector<8x128xi1>, vector<8x128xf32>
    %cst_72 = arith.constant dense<0xFF800000> : vector<8xf32>
    %139 = vector.multi_reduction <maximumf>, %138, %cst_72 [1] : vector<8x128xf32> to vector<8xf32>
    %140 = vector.shape_cast %139 : vector<8xf32> to vector<8x1xf32>
    %141 = vector.broadcast %140 : vector<8x1xf32> to vector<8x128xf32>
    %142 = arith.subf %138, %141 : vector<8x128xf32>
    %143 = math.exp %142 : vector<8x128xf32>
    %cst_73 = arith.constant dense<0.000000e+00> : vector<8xf32>
    %144 = vector.multi_reduction <add>, %143, %cst_73 [1] : vector<8x128xf32> to vector<8xf32>
    %145 = vector.shape_cast %144 : vector<8xf32> to vector<8x1xf32>
    %146 = tpu.reciprocal %145 {approx = true} : vector<8x1xf32> -> vector<8x1xf32>
    %147 = vector.broadcast %146 : vector<8x1xf32> to vector<8x128xf32>
    %148 = arith.mulf %143, %147 : vector<8x128xf32>
    %c0_74 = arith.constant 0 : index
    %c0_75 = arith.constant 0 : index
    %149 = vector.load %arg10[%c0_74, %c0_75] : memref<8x128xf32, #tpu.memory_space<vmem>>, vector<8x128xf32>
    tpu.vector_store %arg10[%c0_74, %c0_75], %148 {strides = array<i32>} : memref<8x128xf32, #tpu.memory_space<vmem>>, vector<8x128xf32>,
    return
  }
  func.func @transform_0(%arg0: i32) -> (i32, i32) {
    %c0_i32 = arith.constant 0 : i32
    %c0_i32_0 = arith.constant 0 : i32
    %c0_i32_1 = arith.constant 0 : i32
    return %c0_i32, %c0_i32_0 : i32, i32
  }
  func.func @transform_1(%arg0: i32) -> (i32, i32) {
    %c0_i32 = arith.constant 0 : i32
    %c0_i32_0 = arith.constant 0 : i32
    %c0_i32_1 = arith.constant 0 : i32
    return %c0_i32, %c0_i32_0 : i32, i32
  }
  func.func @transform_2(%arg0: i32) -> (i32, i32) {
    %c0_i32 = arith.constant 0 : i32
    %c0_i32_0 = arith.constant 0 : i32
    %c0_i32_1 = arith.constant 0 : i32
    return %c0_i32, %c0_i32_0 : i32, i32
  }
  func.func @transform_3(%arg0: i32) -> (i32, i32) {
    %c0_i32 = arith.constant 0 : i32
    %c0_i32_0 = arith.constant 0 : i32
    %c0_i32_1 = arith.constant 0 : i32
    return %c0_i32, %c0_i32_0 : i32, i32
  }
  func.func @transform_4(%arg0: i32) -> (i32, i32) {
    %c0_i32 = arith.constant 0 : i32
    %c0_i32_0 = arith.constant 0 : i32
    %c0_i32_1 = arith.constant 0 : i32
    return %c0_i32, %c0_i32_0 : i32, i32
  }
  func.func @transform_5(%arg0: i32) -> (i32, i32) {
    %c0_i32 = arith.constant 0 : i32
    %c0_i32_0 = arith.constant 0 : i32
    %c0_i32_1 = arith.constant 0 : i32
    return %c0_i32, %c0_i32_0 : i32, i32
  }
  func.func @transform_6(%arg0: i32) -> (i32, i32) {
    %c0_i32 = arith.constant 0 : i32
    %c0_i32_0 = arith.constant 0 : i32
    %c0_i32_1 = arith.constant 0 : i32
    return %c0_i32, %c0_i32_0 : i32, i32
  }
  func.func @transform_7(%arg0: i32) -> (i32, i32) {
    %c0_i32 = arith.constant 0 : i32
    %c0_i32_0 = arith.constant 0 : i32
    %c0_i32_1 = arith.constant 0 : i32
    return %c0_i32, %c0_i32_0 : i32, i32
  }
  func.func @transform_8(%arg0: i32) -> (i32, i32) {
    %c0_i32 = arith.constant 0 : i32
    %c0_i32_0 = arith.constant 0 : i32
    %c0_i32_1 = arith.constant 0 : i32
    return %c0_i32, %c0_i32_0 : i32, i32
  }
  func.func @transform_9(%arg0: i32) -> (i32, i32) {
    %c0_i32 = arith.constant 0 : i32
    %c0_i32_0 = arith.constant 0 : i32
    %c0_i32_1 = arith.constant 0 : i32
    return %c0_i32, %c0_i32_0 : i32, i32
  }
}

</mosaic_0001>

<bundles_post_ra>
// kernel: classifier_forward.2
= control target key start
LH: loop header
LB: loop body
LE: loop exit
PB: predicated region body
PF: predicated region fallthrough
CT: control target
= control target key end

     0   :  { %s1700_s12 = smov 0   ;;  %s1946_s0 = inlined_call_operand.vmem [shape: bf16[1152,640], index: 0, kind: input, shape index: {}]   ;;  %s1947_s1 = inlined_call_operand.vmem [shape: bf16[640,128], index: 1, kind: input, shape index: {}]   ;;  %s1948_s2 = inlined_call_operand.vmem [shape: f32[1,128], index: 2, kind: input, shape index: {}]   ;;  %s1949_s3 = inlined_call_operand.vmem [shape: bf16[1152,128], index: 3, kind: output, shape index: {}]  }
   0x1 LB: > { %s1204_s13 = sadd.s32 4294967295, %s1678_s12   ;;  %p1208_p0 = scmp.ge.s32.totalorder %s1678_s12, 1  ;;  %s1678_s12 = sphi %s1700_s12, %s13_s12  }
   0x2   : > { %p139_p1 = scmp.lt.s32.totalorder %s1678_s12, 10 }
   0x4   : > { %p140_p2 = pnand %p1208_p0, %p139_p1 }
   0x5   : > { %v1576_v0 = vld [vmem:[%s1947_s1 + $0x40] sm:$0xff] (!%p140_p2)   ;;  %v1580_v4 = vld [vmem:[%s1947_s1 + $0x48] sm:$0xff] (!%p140_p2)   ;;  %v1584_v8 = vld [vmem:[%s1947_s1 + $0x50] sm:$0xff] (!%p140_p2)   ;;  %s1209_s19 = sshll.u32 (!%p140_p2), %s1204_s13, 4 }
   0x6   : > { %143 = sbr.rel (%p140_p2) target bundleno = 334 (0x14e), region = 32  ;;  %v1577_v1 = vld [vmem:[%s1947_s1 + $0xc0] sm:$0xff] (!%p140_p2)   ;;  %1375 = vmatprep.subr.bf16.mxu0 (!%p140_p2), %v1576_v0  ;;  %v1581_v5 = vld [vmem:[%s1947_s1 + $0xc8] sm:$0xff] (!%p140_p2)   ;;  %v1585_v9 = vld [vmem:[%s1947_s1 + $0xd0] sm:$0xff] (!%p140_p2)   ;;  %p165_p3 = scmp.lt.s32.totalorder (!%p140_p2), %s1209_s19, 143 }
   0x7   : > { %v1578_v2 = vld [vmem:[%s1947_s1] sm:$0xff] (!%p140_p2)   ;;  %1439 = vmatprep.subr.bf16.mxu1 (!%p140_p2), %v1577_v1  ;;  %v1582_v6 = vld [vmem:[%s1947_s1 + $0x8] sm:$0xff] (!%p140_p2)   ;;  %v1586_v10 = vld [vmem:[%s1947_s1 + $0x10] sm:$0xff] (!%p140_p2)  }
   0x8   : > { %v1579_v3 = vld [vmem:[%s1947_s1 + $0x80] sm:$0xff] (!%p140_p2)   ;;  %1376 = vmatpush3.bf16.msra.mxu0 (!%p140_p2), %v1578_v2  ;;  %v1583_v7 = vld [vmem:[%s1947_s1 + $0x88] sm:$0xff] (!%p140_p2)   ;;  %v1587_v11 = vld [vmem:[%s1947_s1 + $0x90] sm:$0xff] (!%p140_p2)  }
   0x9   : > { %1440 = vmatpush3.bf16.msra.mxu1 (!%p140_p2), %v1579_v3  ;;  %1377 = vmatprep.subr.bf16.mxu0 (!%p140_p2), %v1580_v4  ;;  %v1588_v12 = vld [vmem:[%s1947_s1 + $0x58] sm:$0xff] (!%p140_p2)   ;;  %v1592_v16 = vld [vmem:[%s1947_s1 + $0x60] sm:$0xff] (!%p140_p2)   ;;  %v1596_v20 = vld [vmem:[%s1947_s1 + $0x68] sm:$0xff] (!%p140_p2)  }
   0xa   : > { %1441 = vmatprep.subr.bf16.mxu1 (!%p140_p2), %v1581_v5  ;;  %v1589_v13 = vld [vmem:[%s1947_s1 + $0xd8] sm:$0xff] (!%p140_p2)   ;;  %v1593_v17 = vld [vmem:[%s1947_s1 + $0xe0] sm:$0xff] (!%p140_p2)   ;;  %v1597_v21 = vld [vmem:[%s1947_s1 + $0xe8] sm:$0xff] (!%p140_p2)  }
   0xb   : > { %v1590_v14 = vld [vmem:[%s1947_s1 + $0x18] sm:$0xff] (!%p140_p2)   ;;  %v1594_v18 = vld [vmem:[%s1947_s1 + $0x20] sm:$0xff] (!%p140_p2)   ;;  %v1598_v22 = vld [vmem:[%s1947_s1 + $0x28] sm:$0xff] (!%p140_p2)  }
   0xc   : > { %1378 = vmatpush3.bf16.msra.mxu0 (!%p140_p2), %v1582_v6  ;;  %v1591_v15 = vld [vmem:[%s1947_s1 + $0x98] sm:$0xff] (!%p140_p2)   ;;  %v1595_v19 = vld [vmem:[%s1947_s1 + $0xa0] sm:$0xff] (!%p140_p2)   ;;  %v1599_v23 = vld [vmem:[%s1947_s1 + $0xa8] sm:$0xff] (!%p140_p2)  }
   0xd   : > { %1442 = vmatpush3.bf16.msra.mxu1 %v1583_v7  ;;  %1379 = vmatprep.subr.bf16.mxu0 %v1584_v8  ;;  %s1951_s19 = smov (!%p165_p3, %s1209_s19), 143  ;;  %v1600_v24 = vld [vmem:[%s1947_s1 + $0x70] sm:$0xff]   ;;  %v1604_v28 = vld [vmem:[%s1947_s1 + $0x78] sm:$0xff]   ;;  %v1614_v36 = vld [vmem:[%s1947_s1 + $0x100] sm:$0xff]  }
   0xe   : > { %1443 = vmatprep.subr.bf16.mxu1 %v1585_v9  ;;  %v1601_v25 = vld [vmem:[%s1947_s1 + $0xf0] sm:$0xff]   ;;  %s1567_s16 = smul.u32 20, %s1951_s19  ;;  %v1605_v29 = vld [vmem:[%s1947_s1 + $0xf8] sm:$0xff]   ;;  %v1621_v39 = vld [vmem:[%s1947_s1 + $0x108] sm:$0xff]   ;;  %s1212_s26 = sshll.u32 %s1951_s19, 2 }
   0xf   : > { %v1602_v26 = vld [vmem:[%s1947_s1 + $0x30] sm:$0xff]   ;;  %v1606_v30 = vld [vmem:[%s1947_s1 + $0x38] sm:$0xff]   ;;  %v1642_v50 = vld [vmem:[%s1947_s1 + $0x120] sm:$0xff]   ;;  %s1928_s28 = scalar_lea.vmem %s1949_s3, %s1212_s26 }
  0x10   : > { %1380 = vmatpush3.bf16.msra.mxu0 %v1586_v10  ;;  %v1603_v27 = vld [vmem:[%s1947_s1 + $0xb0] sm:$0xff]   ;;  %s1806_s13 = scalar_lea.vmem %s1946_s0, %s1567_s16  ;;  %v1607_v31 = vld [vmem:[%s1947_s1 + $0xb8] sm:$0xff]   ;;  %v1649_v51 = vld [vmem:[%s1947_s1 + $0x128] sm:$0xff]  }
  0x11   : > { %1444 = vmatpush3.bf16.msra.mxu1 %v1587_v11  ;;  %1381 = vmatprep.subr.bf16.mxu0 %v1588_v12  ;;  %v1608_v32 = vld [vmem:[%s1806_s13] ss:$20 sps:$4 sm:$0xff]   ;;  %v1610_v33 = vld [vmem:[%s1806_s13 + $0x4] ss:$20 sps:$4 sm:$0xff]   ;;  %v1611_v34 = vld [vmem:[%s1806_s13 + $0x8] ss:$20 sps:$4 sm:$0xff]  }
  0x12   : > { %1445 = vmatprep.subr.bf16.mxu1 %v1589_v13  ;;  %v1613_v35 = vld [vmem:[%s1806_s13 + $0xc] ss:$20 sps:$4 sm:$0xff]   ;;  %793 = vmatprep.mubr.bf16.mxu0 %v1610_v33  ;;  %v1617_v38 = vld [vmem:[%s1806_s13 + $0x34] ss:$20 sps:$4 sm:$0xff]   ;;  %v1620_v41 = vld [vmem:[%s1806_s13 + $0x30] ss:$20 sps:$4 sm:$0xff]  }
  0x13   : > { %890 = vmatprep.mubr.bf16.mxu1 %v1613_v35  ;;  %v1615_v37 = vld [vmem:[%s1806_s13 + $0x2c] ss:$20 sps:$4 sm:$0xff]   ;;  %v1619_v40 = vld [vmem:[%s1806_s13 + $0x28] ss:$20 sps:$4 sm:$0xff]   ;;  %v1628_v44 = vld [vmem:[%s1947_s1 + $0x110] sm:$0xff]  }
  0x14   : > { %1382 = vmatpush3.bf16.msra.mxu0 %v1590_v14  ;;  %v1622_v42 = vld [vmem:[%s1806_s13 + $0x54] ss:$20 sps:$4 sm:$0xff]   ;;  %v1624_v43 = vld [vmem:[%s1806_s13 + $0x5c] ss:$20 sps:$4 sm:$0xff]   ;;  %v1627_v47 = vld [vmem:[%s1806_s13 + $0x58] ss:$20 sps:$4 sm:$0xff]  }
  0x15   : > { %1446 = vmatpush3.bf16.msra.mxu1 %v1591_v15  ;;  %1383 = vmatprep.subr.bf16.mxu0 %v1592_v16  ;;  %v1635_v45 = vld [vmem:[%s1947_s1 + $0x118] sm:$0xff]   ;;  %v1626_v46 = vld [vmem:[%s1806_s13 + $0x50] ss:$20 sps:$4 sm:$0xff]   ;;  %v1634_v53 = vld [vmem:[%s1806_s13 + $0x80] ss:$20 sps:$4 sm:$0xff]  }
  0x16   : > { %1447 = vmatprep.subr.bf16.mxu1 %v1593_v17  ;;  %v1629_v48 = vld [vmem:[%s1806_s13 + $0x7c] ss:$20 sps:$4 sm:$0xff]   ;;  %v1631_v49 = vld [vmem:[%s1806_s13 + $0x84] ss:$20 sps:$4 sm:$0xff]   ;;  %v1638_v56 = vld [vmem:[%s1806_s13 + $0xac] ss:$20 sps:$4 sm:$0xff]  }
  0x17   : > { %v1633_v52 = vld [vmem:[%s1806_s13 + $0x78] ss:$20 sps:$4 sm:$0xff]   ;;  %v1656_v55 = vld [vmem:[%s1947_s1 + $0x130] sm:$0xff]   ;;  %v1641_v59 = vld [vmem:[%s1806_s13 + $0xa8] ss:$20 sps:$4 sm:$0xff]  }
  0x18   : > { %1384 = vmatpush3.bf16.msra.mxu0 %v1594_v18  ;;  %v1636_v54 = vld [vmem:[%s1806_s13 + $0xa4] ss:$20 sps:$4 sm:$0xff]   ;;  %v1640_v58 = vld [vmem:[%s1806_s13 + $0xa0] ss:$20 sps:$4 sm:$0xff]   ;;  %v1647_v62 = vld [vmem:[%s1806_s13 + $0xc8] ss:$20 sps:$4 sm:$0xff]  }
  0x19   : > { %1448 = vmatpush3.bf16.msra.mxu1 %v1595_v19  ;;  %1385 = vmatprep.subr.bf16.mxu0 %v1596_v20  ;;  %v1663_v57 = vld [vmem:[%s1947_s1 + $0x138] sm:$0xff]   ;;  %v1643_v60 = vld [vmem:[%s1806_s13 + $0xcc] ss:$20 sps:$4 sm:$0xff]   ;;  %v1645_v61 = vld [vmem:[%s1806_s13 + $0xd4] ss:$20 sps:$4 sm:$0xff]  }
  0x1a   : > { %1449 = vmatprep.subr.bf16.mxu1 %v1597_v21  ;;  %v1648_v63 = vld [vmem:[%s1806_s13 + $0xd0] ss:$20 sps:$4 sm:$0xff]   ;;  %v1650_v0 = vld [vmem:[%s1806_s13 + $0xf4] ss:$20 sps:$4 sm:$0xff]   ;;  %v1655_v3 = vld [vmem:[%s1806_s13 + $0xf8] ss:$20 sps:$4 sm:$0xff]  }
  0x1b   : > { %v1652_v1 = vld [vmem:[%s1806_s13 + $0xfc] ss:$20 sps:$4 sm:$0xff]   ;;  %v1659_v5 = vld [vmem:[%s1806_s13 + $0x124] ss:$20 sps:$4 sm:$0xff]   ;;  %v1662_v7 = vld [vmem:[%s1806_s13 + $0x120] ss:$20 sps:$4 sm:$0xff]  }
  0x1c   : > { %1386 = vmatpush3.bf16.msra.mxu0 %v1598_v22  ;;  %v1654_v2 = vld [vmem:[%s1806_s13 + $0xf0] ss:$20 sps:$4 sm:$0xff]   ;;  %v1661_v6 = vld [vmem:[%s1806_s13 + $0x118] ss:$20 sps:$4 sm:$0xff]   ;;  %v1668_v12 = vld [vmem:[%s1806_s13 + $0x60] ss:$20 sps:$4 sm:$0xff]  }
  0x1d   : > { %1450 = vmatpush3.bf16.msra.mxu1 %v1599_v23  ;;  %1387 = vmatprep.subr.bf16.mxu0 %v1600_v24  ;;  %v1657_v4 = vld [vmem:[%s1806_s13 + $0x11c] ss:$20 sps:$4 sm:$0xff]   ;;  %v1666_v10 = vld [vmem:[%s1806_s13 + $0x38] ss:$20 sps:$4 sm:$0xff]   ;;  %v1669_v13 = vld [vmem:[%s1806_s13 + $0x100] ss:$20 sps:$4 sm:$0xff]  }
  0x1e   : > { %1451 = vmatprep.subr.bf16.mxu1 %v1601_v25  ;;  %v1664_v8 = vld [vmem:[%s1806_s13 + $0x10] ss:$20 sps:$4 sm:$0xff]   ;;  %v1667_v11 = vld [vmem:[%s1806_s13 + $0xd8] ss:$20 sps:$4 sm:$0xff]   ;;  %v1670_v14 = vld [vmem:[%s1806_s13 + $0x88] ss:$20 sps:$4 sm:$0xff]  }
  0x1f   : > { %v1665_v9 = vld [vmem:[%s1806_s13 + $0xb0] ss:$20 sps:$4 sm:$0xff]   ;;  %v1671_v15 = vld [vmem:[%s1806_s13 + $0x128] ss:$20 sps:$4 sm:$0xff]   ;;  %v1881_v18 = vld [vmem:[%s1948_s2] ss:$0 sm:$0xff] }
  0x20   : > { %1388 = vmatpush3.bf16.msra.mxu0 %v1602_v26 }
  0x21   : > { %1452 = vmatpush3.bf16.msra.mxu1 %v1603_v27  ;;  %1389 = vmatprep.subr.bf16.mxu0 %v1604_v28 }
  0x22   : > { %1453 = vmatprep.subr.bf16.mxu1 %v1605_v29 }
  0x24   : > { %1390 = vmatpush3.bf16.msra.mxu0 %v1606_v30 }
  0x25   : > { %1454 = vmatpush3.bf16.msra.mxu1 %v1607_v31  ;;  %1519 = vmatprep.subr.bf16.mxu0 %v1614_v36 }
  0x26   : > { %1551 = vmatprep.subr.bf16.mxu1 %v1614_v36 }
  0x27   : > { %794 = vmatmul.mubr.bf16.vlgmr.msra.gmra.mrb[0].mxu0 %v1608_v32 }
  0x28   : > { %891 = vmatmul.mubr.bf16.vlgmr.msra.gmra.mrb[0].mxu1 %v1611_v34  ;;  %1520 = vmatpush3.bf16.msra.mxu0 %v1614_v36 }
  0x29   : > { %1559 = vmatpush3.bf16.msra.mxu1 %v1614_v36  ;;  %801 = vmatprep.mubr.bf16.mxu0 %v1615_v37 }
  0x2a   : > { %898 = vmatprep.mubr.bf16.mxu1 %v1617_v38  ;;  %1521 = vmatprep.subr.bf16.mxu0 %v1621_v39 }
  0x2b   : > { %1552 = vmatprep.subr.bf16.mxu1 %v1621_v39 }
  0x2c   : > { %1522 = vmatpush3.bf16.msra.mxu0 %v1621_v39 }
  0x2d   : > { %1560 = vmatpush3.bf16.msra.mxu1 %v1621_v39  ;;  %1523 = vmatprep.subr.bf16.mxu0 %v1628_v44 }
  0x2e   : > { %1553 = vmatprep.subr.bf16.mxu1 %v1628_v44 }
  0x2f   : > { %802 = vmatmul.mubr.bf16.gmra.mrb[4].mxu0 %v1619_v40 }
  0x30   : > { %899 = vmatmul.mubr.bf16.gmra.mrb[4].mxu1 %v1620_v41  ;;  %809 = vmatprep.mubr.bf16.mxu0 %v1622_v42 }
  0x31   : > { %906 = vmatprep.mubr.bf16.mxu1 %v1624_v43  ;;  %1524 = vmatpush3.bf16.msra.mxu0 %v1628_v44 }
  0x32   : > { %1561 = vmatpush3.bf16.msra.mxu1 %v1628_v44  ;;  %1525 = vmatprep.subr.bf16.mxu0 %v1635_v45 }
  0x33   : > { %1554 = vmatprep.subr.bf16.mxu1 %v1635_v45 }
  0x35   : > { %1526 = vmatpush3.bf16.msra.mxu0 %v1635_v45 }
  0x36   : > { %1562 = vmatpush3.bf16.msra.mxu1 %v1635_v45  ;;  %1527 = vmatprep.subr.bf16.mxu0 %v1642_v50 }
  0x37   : > { %810 = vmatmul.mubr.bf16.gmra.mrb[8].mxu0 %v1626_v46  ;;  %1555 = vmatprep.subr.bf16.mxu1 %v1642_v50 }
  0x38   : > { %907 = vmatmul.mubr.bf16.gmra.mrb[8].mxu1 %v1627_v47  ;;  %817 = vmatprep.mubr.bf16.mxu0 %v1629_v48 }
  0x39   : > { %914 = vmatprep.mubr.bf16.mxu1 %v1631_v49  ;;  %1528 = vmatpush3.bf16.msra.mxu0 %v1642_v50 }
  0x3a   : > { %1563 = vmatpush3.bf16.msra.mxu1 %v1642_v50  ;;  %1529 = vmatprep.subr.bf16.mxu0 %v1649_v51 }
  0x3b   : > { %1556 = vmatprep.subr.bf16.mxu1 %v1649_v51 }
  0x3d   : > { %1530 = vmatpush3.bf16.msra.mxu0 %v1649_v51 }
  0x3e   : > { %1564 = vmatpush3.bf16.msra.mxu1 %v1649_v51  ;;  %1531 = vmatprep.subr.bf16.mxu0 %v1656_v55 }
  0x3f   : > { %818 = vmatmul.mubr.bf16.gmra.mrb[12].mxu0 %v1633_v52  ;;  %1557 = vmatprep.subr.bf16.mxu1 %v1656_v55 }
  0x40   : > { %915 = vmatmul.mubr.bf16.gmra.mrb[12].mxu1 %v1634_v53  ;;  %825 = vmatprep.mubr.bf16.mxu0 %v1636_v54 }
  0x41   : > { %922 = vmatprep.mubr.bf16.mxu1 %v1638_v56  ;;  %1532 = vmatpush3.bf16.msra.mxu0 %v1656_v55 }
  0x42   : > { %1565 = vmatpush3.bf16.msra.mxu1 %v1656_v55  ;;  %1533 = vmatprep.subr.bf16.mxu0 %v1663_v57 }
  0x43   : > { %1558 = vmatprep.subr.bf16.mxu1 %v1663_v57 }
  0x45   : > { %1534 = vmatpush3.bf16.msra.mxu0 %v1663_v57 }
  0x46   : > { %1566 = vmatpush3.bf16.msra.mxu1 %v1663_v57 }
  0x47   : > { %826 = vmatmul.mubr.bf16.gmra.mrb[16].mxu0 %v1640_v58 }
  0x48   : > { %923 = vmatmul.mubr.bf16.gmra.mrb[16].mxu1 %v1641_v59  ;;  %833 = vmatprep.mubr.bf16.mxu0 %v1643_v60 }
  0x49   : > { %930 = vmatprep.mubr.bf16.mxu1 %v1645_v61 }
  0x4f   : > { %834 = vmatmul.mubr.bf16.gmra.mrb[20].mxu0 %v1647_v62 }
  0x50   : > { %931 = vmatmul.mubr.bf16.gmra.mrb[20].mxu1 %v1648_v63  ;;  %841 = vmatprep.mubr.bf16.mxu0 %v1650_v0 }
  0x51   : > { %938 = vmatprep.mubr.bf16.mxu1 %v1652_v1 }
  0x57   : > { %842 = vmatmul.mubr.bf16.gmra.mrb[24].mxu0 %v1654_v2 }
  0x58   : > { %939 = vmatmul.mubr.bf16.gmra.mrb[24].mxu1 %v1655_v3  ;;  %849 = vmatprep.mubr.bf16.mxu0 %v1657_v4 }
  0x59   : > { %946 = vmatprep.mubr.bf16.mxu1 %v1659_v5 }
  0x5f   : > { %850 = vmatmul.mubr.bf16.gmra.mrb[28].mxu0 %v1661_v6 }
  0x60   : > { %947 = vmatmul.mubr.bf16.gmra.mrb[28].mxu1 %v1662_v7  ;;  %1535 = vmatprep.mubr.bf16.mxu0 %v1664_v8 }
  0x61   : > { %1543 = vmatprep.mubr.bf16.mxu1 %v1665_v9 }
  0x67   : > { %1536 = vmatmul.mubr.bf16.vlgmr.msra.gmra.mrb[32].mxu0 %v1666_v10 }
  0x68   : > { %1544 = vmatmul.mubr.bf16.vlgmr.msra.gmra.mrb[32].mxu1 %v1667_v11  ;;  %1539 = vmatprep.mubr.bf16.mxu0 %v1668_v12 }
  0x69   : > { %1547 = vmatprep.mubr.bf16.mxu1 %v1669_v13 }
  0x6f   : > { %1540 = vmatmul.mubr.bf16.gmra.mrb[36].mxu0 %v1670_v14 }
  0x70   : > { %1548 = vmatmul.mubr.bf16.gmra.mrb[36].mxu1 %v1671_v15 }
  0xfa   : > { %v1391_v16 = vpop.f32.mrb[0].mxu0 }
  0xfb   : > { %v1455_v17 = vpop.f32.mrb[0].mxu1  ;;  %v1392_v19 = vpop.f32.mrb[1].mxu0 }
  0xfc   : > { %v1393_v20 = vadd.f32 %v1392_v19, %v1391_v16  ;;  %v1456_v21 = vpop.f32.mrb[1].mxu1  ;;  %v1394_v22 = vpop.f32.mrb[2].mxu0 }
  0xfd   : > { %v1457_v23 = vadd.f32 %v1456_v21, %v1455_v17  ;;  %v1458_v24 = vpop.f32.mrb[2].mxu1  ;;  %v1395_v25 = vpop.f32.mrb[3].mxu0 }
  0xfe   : > { %v796_v26 = vadd.f32 %v1393_v20, %v1881_v18  ;;  %v1396_v27 = vadd.f32 %v1395_v25, %v1394_v22  ;;  %v1459_v28 = vpop.f32.mrb[3].mxu1 }
  0xff   : > { %v1460_v29 = vadd.f32 %v1459_v28, %v1458_v24 }
 0x100   : > { %v799_v30 = vadd.f32 %v1396_v27, %v1881_v18  ;;  %v1885_v31 = vadd.f32 %v1457_v23, %v796_v26 }
 0x102   : > { %v1397_v32 = vpop.f32.mrb[4].mxu0  ;;  %v1887_v33 = vadd.f32 %v1460_v29, %v799_v30 }
 0x103   : > { %v1461_v34 = vpop.f32.mrb[4].mxu1  ;;  %v1398_v35 = vpop.f32.mrb[5].mxu0 }
 0x104   : > { %v1399_v36 = vadd.f32 %v1398_v35, %v1397_v32  ;;  %v1462_v37 = vpop.f32.mrb[5].mxu1  ;;  %v1400_v38 = vpop.f32.mrb[6].mxu0 }
 0x105   : > { %v1463_v39 = vadd.f32 %v1462_v37, %v1461_v34  ;;  %v1464_v40 = vpop.f32.mrb[6].mxu1  ;;  %v1401_v41 = vpop.f32.mrb[7].mxu0 }
 0x106   : > { %v804_v42 = vadd.f32 %v1399_v36, %v1881_v18  ;;  %v1402_v43 = vadd.f32 %v1401_v41, %v1400_v38  ;;  %v1465_v44 = vpop.f32.mrb[7].mxu1 }
 0x107   : > { %v1466_v45 = vadd.f32 %v1465_v44, %v1464_v40 }
 0x108   : > { %v807_v46 = vadd.f32 %v1402_v43, %v1881_v18  ;;  %v1891_v47 = vadd.f32 %v1463_v39, %v804_v42 }
 0x10a   : > { %v1403_v48 = vpop.f32.mrb[8].mxu0  ;;  %v1893_v49 = vadd.f32 %v1466_v45, %v807_v46 }
 0x10b   : > { %v1467_v50 = vpop.f32.mrb[8].mxu1  ;;  %v1404_v51 = vpop.f32.mrb[9].mxu0 }
 0x10c   : > { %v1405_v52 = vadd.f32 %v1404_v51, %v1403_v48  ;;  %v1468_v53 = vpop.f32.mrb[9].mxu1  ;;  %v1406_v54 = vpop.f32.mrb[10].mxu0 }
 0x10d   : > { %v1469_v55 = vadd.f32 %v1468_v53, %v1467_v50  ;;  %v1470_v56 = vpop.f32.mrb[10].mxu1  ;;  %v1407_v57 = vpop.f32.mrb[11].mxu0 }
 0x10e   : > { %v812_v58 = vadd.f32 %v1405_v52, %v1881_v18  ;;  %v1408_v59 = vadd.f32 %v1407_v57, %v1406_v54  ;;  %v1471_v60 = vpop.f32.mrb[11].mxu1 }
 0x10f   : > { %v1472_v61 = vadd.f32 %v1471_v60, %v1470_v56 }
 0x110   : > { %v815_v62 = vadd.f32 %v1408_v59, %v1881_v18  ;;  %v1897_v63 = vadd.f32 %v1469_v55, %v812_v58 }
 0x112   : > { %v1409_v0 = vpop.f32.mrb[12].mxu0  ;;  %v1899_v1 = vadd.f32 %v1472_v61, %v815_v62 }
 0x113   : > { %v1473_v2 = vpop.f32.mrb[12].mxu1  ;;  %v1410_v3 = vpop.f32.mrb[13].mxu0 }
 0x114   : > { %v1411_v4 = vadd.f32 %v1410_v3, %v1409_v0  ;;  %v1474_v5 = vpop.f32.mrb[13].mxu1  ;;  %v1412_v6 = vpop.f32.mrb[14].mxu0 }
 0x115   : > { %v1475_v7 = vadd.f32 %v1474_v5, %v1473_v2  ;;  %v1476_v8 = vpop.f32.mrb[14].mxu1  ;;  %v1413_v9 = vpop.f32.mrb[15].mxu0 }
 0x116   : > { %v820_v10 = vadd.f32 %v1411_v4, %v1881_v18  ;;  %v1414_v11 = vadd.f32 %v1413_v9, %v1412_v6  ;;  %v1477_v12 = vpop.f32.mrb[15].mxu1 }
 0x117   : > { %v1478_v13 = vadd.f32 %v1477_v12, %v1476_v8 }
 0x118   : > { %v823_v14 = vadd.f32 %v1414_v11, %v1881_v18  ;;  %v1903_v15 = vadd.f32 %v1475_v7, %v820_v10 }
 0x11a   : > { %v1415_v16 = vpop.f32.mrb[16].mxu0  ;;  %v1905_v17 = vadd.f32 %v1478_v13, %v823_v14 }
 0x11b   : > { %v1479_v19 = vpop.f32.mrb[16].mxu1  ;;  %v1416_v20 = vpop.f32.mrb[17].mxu0 }
 0x11c   : > { %v1417_v21 = vadd.f32 %v1416_v20, %v1415_v16  ;;  %v1480_v22 = vpop.f32.mrb[17].mxu1  ;;  %v1418_v23 = vpop.f32.mrb[18].mxu0 }
 0x11d   : > { %v1481_v24 = vadd.f32 %v1480_v22, %v1479_v19  ;;  %v1482_v25 = vpop.f32.mrb[18].mxu1  ;;  %v1419_v26 = vpop.f32.mrb[19].mxu0 }
 0x11e   : > { %v828_v27 = vadd.f32 %v1417_v21, %v1881_v18  ;;  %v1420_v28 = vadd.f32 %v1419_v26, %v1418_v23  ;;  %v1483_v29 = vpop.f32.mrb[19].mxu1 }
 0x11f   : > { %v1484_v30 = vadd.f32 %v1483_v29, %v1482_v25 }
 0x120   : > { %v831_v32 = vadd.f32 %v1420_v28, %v1881_v18  ;;  %v925_v34 = vadd.f32 %v1481_v24, %v828_v27 }
 0x122   : > { %v1421_v35 = vpop.f32.mrb[20].mxu0  ;;  %v1909_v36 = vadd.f32 %v1484_v30, %v831_v32 }
 0x123   : > { %v1485_v37 = vpop.f32.mrb[20].mxu1  ;;  %v1422_v38 = vpop.f32.mrb[21].mxu0 }
 0x124   : > { %v1423_v39 = vadd.f32 %v1422_v38, %v1421_v35  ;;  %v1486_v40 = vpop.f32.mrb[21].mxu1  ;;  %v1424_v41 = vpop.f32.mrb[22].mxu0 }
 0x125   : > { %v1487_v42 = vadd.f32 %v1486_v40, %v1485_v37  ;;  %v1488_v43 = vpop.f32.mrb[22].mxu1  ;;  %v1425_v44 = vpop.f32.mrb[23].mxu0 }
 0x126   : > { %v836_v45 = vadd.f32 %v1423_v39, %v1881_v18  ;;  %v1426_v46 = vadd.f32 %v1425_v44, %v1424_v41  ;;  %v1489_v48 = vpop.f32.mrb[23].mxu1 }
 0x127   : > { %v1490_v50 = vadd.f32 %v1489_v48, %v1488_v43 }
 0x128   : > { %v839_v51 = vadd.f32 %v1426_v46, %v1881_v18  ;;  %v933_v52 = vadd.f32 %v1487_v42, %v836_v45 }
 0x12a   : > { %v1427_v53 = vpop.f32.mrb[24].mxu0  ;;  %v936_v54 = vadd.f32 %v1490_v50, %v839_v51 }
 0x12b   : > { %v1491_v55 = vpop.f32.mrb[24].mxu1  ;;  %v1428_v56 = vpop.f32.mrb[25].mxu0 }
 0x12c   : > { %v1429_v57 = vadd.f32 %v1428_v56, %v1427_v53  ;;  %v1492_v58 = vpop.f32.mrb[25].mxu1  ;;  %v1430_v59 = vpop.f32.mrb[26].mxu0 }
 0x12d   : > { %v1493_v60 = vadd.f32 %v1492_v58, %v1491_v55  ;;  %v1494_v61 = vpop.f32.mrb[26].mxu1  ;;  %v1431_v62 = vpop.f32.mrb[27].mxu0 }
 0x12e   : > { %v844_v0 = vadd.f32 %v1429_v57, %v1881_v18  ;;  %v1432_v2 = vadd.f32 %v1431_v62, %v1430_v59  ;;  %v1495_v3 = vpop.f32.mrb[27].mxu1 }
 0x12f   : > { %v1496_v4 = vadd.f32 %v1495_v3, %v1494_v61 }
 0x130   : > { %v847_v5 = vadd.f32 %v1432_v2, %v1881_v18  ;;  %v941_v6 = vadd.f32 %v1493_v60, %v844_v0 }
 0x132   : > { %v1433_v7 = vpop.f32.mrb[28].mxu0  ;;  %v1915_v8 = vadd.f32 %v1496_v4, %v847_v5 }
 0x133   : > { %v1497_v9 = vpop.f32.mrb[28].mxu1  ;;  %v1434_v10 = vpop.f32.mrb[29].mxu0 }
 0x134   : > { %v1435_v11 = vadd.f32 %v1434_v10, %v1433_v7  ;;  %v1498_v12 = vpop.f32.mrb[29].mxu1  ;;  %v1436_v13 = vpop.f32.mrb[30].mxu0 }
 0x135   : > { %v1499_v14 = vadd.f32 %v1498_v12, %v1497_v9  ;;  %v1500_v16 = vpop.f32.mrb[30].mxu1  ;;  %v1437_v19 = vpop.f32.mrb[31].mxu0 }
 0x136   : > { %v852_v20 = vadd.f32 %v1435_v11, %v1881_v18  ;;  %v1438_v21 = vadd.f32 %v1437_v19, %v1436_v13  ;;  %v1501_v22 = vpop.f32.mrb[31].mxu1 }
 0x137   : > { %v1502_v23 = vadd.f32 %v1501_v22, %v1500_v16 }
 0x138   : > { %v855_v24 = vadd.f32 %v1438_v21, %v1881_v18  ;;  %v949_v25 = vadd.f32 %v1499_v14, %v852_v20 }
 0x13a   : > { %v1537_v26 = vpop.f32.mrb[32].mxu0  ;;  %v952_v27 = vadd.f32 %v1502_v23, %v855_v24 }
 0x13b   : > { %v998_v28 = vadd.f32 %v1537_v26, %v1891_v47  ;;  %v1545_v29 = vpop.f32.mrb[32].mxu1  ;;  %v989_v30 = vpop.f32.mrb[33].mxu0 }
 0x13c   : > { %v1030_v32 = vadd.f32 %v1545_v29, %v933_v52  ;;  %v990_v35 = vadd.f32 %v989_v30, %v1885_v31  ;;  %v1021_v37 = vpop.f32.mrb[33].mxu1  ;;  %v1538_v38 = vpop.f32.mrb[34].mxu0 }
 0x13d   : > { %v1022_v39 = vadd.f32 %v1021_v37, %v925_v34  ;;  %v1001_v40 = vadd.f32 %v1538_v38, %v1893_v49  ;;  %v1546_v41 = vpop.f32.mrb[34].mxu1  ;;  %v992_v42 = vpop.f32.mrb[35].mxu0  ;;  %v1054_v45 = vmax.f32 %v998_v28, 0.0 }
 0x13e   : > { %v1033_v43 = vadd.f32 %v1546_v41, %v936_v54  ;;  %v993_v18 = vadd.f32 %v992_v42, %v1887_v33  ;;  %v1024_v44 = vpop.f32.mrb[35].mxu1  ;;  %v1062_v48 = vmax.f32 %v1030_v32, 0.0  ;;  %v1052_v50 = vmax.f32 %v990_v35, 0.0 }
 0x13f   : > { %v1055_v46 = vmax.f32 %v1001_v40, 0.0  ;;  %v1025_v47 = vadd.f32 %v1024_v44, %v1909_v36  ;;  %v1060_v34 = vmax.f32 %v1022_v39, 0.0 }
 0x140   : > { %v1063_v31 = vmax.f32 %v1033_v43, 0.0  ;;  %v1053_v49 = vmax.f32 %v993_v18, 0.0 }
 0x141   : > { %v1336_v51 = vpack.c.bf16 %v1055_v46, %v1054_v45  ;;  %v1061_v33 = vmax.f32 %v1025_v47, 0.0 }
 0x142   : > { %v1356_v52 = vpack.c.bf16 %v1063_v31, %v1062_v48  ;;  %v1331_v53 = vpack.c.bf16 %v1053_v49, %v1052_v50  ;;  %v1541_v54 = vpop.f32.mrb[36].mxu0 }
 0x143   : > { %1368 = vst [vmem:[%s1928_s28 + $0x8] sm:$0xff] %v1336_v51   ;;  %v1351_v36 = vpack.c.bf16 %v1061_v33, %v1060_v34  ;;  %v1014_v55 = vadd.f32 %v1541_v54, %v1903_v15  ;;  %v1549_v56 = vpop.f32.mrb[36].mxu1  ;;  %v1005_v57 = vpop.f32.mrb[37].mxu0 }
 0x144   : > { %1372 = vst [vmem:[%s1928_s28 + $0x28] sm:$0xff] %v1356_v52   ;;  %1332 = vst [vmem:[%s1928_s28] sm:$0xff] %v1331_v53   ;;  %v1046_v58 = vadd.f32 %v1549_v56, %v949_v25  ;;  %v1006_v59 = vadd.f32 %v1005_v57, %v1897_v63  ;;  %v1037_v60 = vpop.f32.mrb[37].mxu1  ;;  %v1542_v61 = vpop.f32.mrb[38].mxu0 }
 0x145   : > { %1371 = vst [vmem:[%s1928_s28 + $0x20] sm:$0xff] %v1351_v36   ;;  %v1038_v62 = vadd.f32 %v1037_v60, %v941_v6  ;;  %v1017_v0 = vadd.f32 %v1542_v61, %v1905_v17  ;;  %v1550_v2 = vpop.f32.mrb[38].mxu1  ;;  %v1008_v3 = vpop.f32.mrb[39].mxu0  ;;  %v1058_v7 = vmax.f32 %v1014_v55, 0.0 }
 0x146   : > { %v1049_v4 = vadd.f32 %v1550_v2, %v952_v27  ;;  %v1009_v5 = vadd.f32 %v1008_v3, %v1899_v1  ;;  %v1040_v15 = vpop.f32.mrb[39].mxu1  ;;  %v1066_v10 = vmax.f32 %v1046_v58, 0.0  ;;  %v1056_v11 = vmax.f32 %v1006_v59, 0.0 }
 0x147   : > { %v1059_v9 = vmax.f32 %v1017_v0, 0.0  ;;  %v1041_v63 = vadd.f32 %v1040_v15, %v1915_v8  ;;  %v1064_v13 = vmax.f32 %v1038_v62, 0.0 }
 0x148   : > { %v1067_v12 = vmax.f32 %v1049_v4, 0.0  ;;  %v1057_v6 = vmax.f32 %v1009_v5, 0.0 }
 0x149   : > { %v1346_v17 = vpack.c.bf16 %v1059_v9, %v1058_v7  ;;  %v1065_v14 = vmax.f32 %v1041_v63, 0.0 }
 0x14a   : > { %v1366_v16 = vpack.c.bf16 %v1067_v12, %v1066_v10  ;;  %v1341_v19 = vpack.c.bf16 %v1057_v6, %v1056_v11 }
 0x14b   : > { %1370 = vst [vmem:[%s1928_s28 + $0x18] sm:$0xff] %v1346_v17   ;;  %v1361_v20 = vpack.c.bf16 %v1065_v14, %v1064_v13 }
 0x14c   : > { %1374 = vst [vmem:[%s1928_s28 + $0x38] sm:$0xff] %v1366_v16   ;;  %1369 = vst [vmem:[%s1928_s28 + $0x10] sm:$0xff] %v1341_v19  }
 0x14d   : > { %1373 = vst [vmem:[%s1928_s28 + $0x30] sm:$0xff] %v1361_v20  }
 0x14e PF: > { %s13_s12 = sadd.s32 1, %s1678_s12  }
 0x14f   : > { %p10_p4 = scmp.ge.s32.totalorder %s13_s12, 11  }
 0x151   :  { %12 = sbr.rel (!%p10_p4) target bundleno = 1 (0x1), region = 62 }

// kernel: classifier_forward.3
= control target key start
LH: loop header
LB: loop body
LE: loop exit
PB: predicated region body
PF: predicated region fallthrough
CT: control target
= control target key end

     0   :  { %vm5777_vm0 = vmmov 0   ;;  %s7377_s1 = inlined_call_operand.vmem [shape: bf16[128,128], index: 1, kind: input, shape index: {}]   ;;  %s7378_s0 = inlined_call_operand.vmem [shape: bf16[1024,128], index: 0, kind: input, shape index: {}]   ;;  %s7379_s3 = inlined_call_operand.vmem [shape: bf16[3200,128], index: 3, kind: input, shape index: {}]   ;;  %s7380_s2 = inlined_call_operand.vmem [shape: f32[1,128], index: 2, kind: input, shape index: {}]   ;;  %s7381_s5 = inlined_call_operand.vmem [shape: bf16[128,128], index: 5, kind: input, shape index: {}]   ;;  %s7382_s7 = inlined_call_operand.vmem [shape: bf16[128,128], index: 7, kind: input, shape index: {}]   ;;  %s7383_s4 = inlined_call_operand.vmem [shape: f32[1,128], index: 4, kind: input, shape index: {}]   ;;  %s7384_s6 = inlined_call_operand.vmem [shape: f32[1,128], index: 6, kind: input, shape index: {}]   ;;  %s7385_s8 = inlined_call_operand.vmem [shape: f32[1,128], index: 8, kind: input, shape index: {}]   ;;  %s7386_s9 = inlined_call_operand.vmem [shape: f32[8,128], index: 9, kind: output, shape index: {}]  }
   0x1   :  { %v5484_v0 = vld [vmem:[%s7377_s1] sm:$0xff]   ;;  %v5485_v1 = vld [vmem:[%s7377_s1 + $0x8] sm:$0xff]   ;;  %v5486_v2 = vld [vmem:[%s7377_s1 + $0x10] sm:$0xff]  }
   0x2   :  { %4798 = vmatprep.subr.bf16.mxu0 %v5484_v0  ;;  %v5487_v3 = vld [vmem:[%s7377_s1 + $0x18] sm:$0xff]   ;;  %v5492_v4 = vld [vmem:[%s7378_s0] sm:$0xff]   ;;  %v5489_v6 = vld [vmem:[%s7377_s1 + $0x28] sm:$0xff]  }
   0x3   :  { %4799 = vmatpush3.bf16.msra.mxu0 %v5484_v0  ;;  %4814 = vmatprep.mubr.bf16.mxu0 %v5492_v4  ;;  %v5488_v5 = vld [vmem:[%s7377_s1 + $0x20] sm:$0xff]   ;;  %v5490_v7 = vld [vmem:[%s7377_s1 + $0x30] sm:$0xff]   ;;  %v5491_v8 = vld [vmem:[%s7377_s1 + $0x38] sm:$0xff]  }
   0x4   :  { %4800 = vmatprep.subr.bf16.mxu0 %v5485_v1  ;;  %v5493_v9 = vld [vmem:[%s7378_s0 + $0x8] sm:$0xff]   ;;  %v5494_v10 = vld [vmem:[%s7378_s0 + $0x10] sm:$0xff]   ;;  %v5495_v11 = vld [vmem:[%s7378_s0 + $0x18] sm:$0xff]  }
   0x5   :  { %v5496_v12 = vld [vmem:[%s7378_s0 + $0x20] sm:$0xff]   ;;  %v5497_v13 = vld [vmem:[%s7378_s0 + $0x28] sm:$0xff]   ;;  %v5498_v14 = vld [vmem:[%s7378_s0 + $0x30] sm:$0xff]  }
   0x6   :  { %v5499_v15 = vld [vmem:[%s7378_s0 + $0x38] sm:$0xff]   ;;  %v5500_v16 = vld [vmem:[%s7378_s0 + $0x40] sm:$0xff]   ;;  %v5501_v17 = vld [vmem:[%s7378_s0 + $0x48] sm:$0xff]  }
   0x7   :  { %4801 = vmatpush3.bf16.msra.mxu0 %v5485_v1  ;;  %v5502_v18 = vld [vmem:[%s7378_s0 + $0x50] sm:$0xff]   ;;  %v5503_v19 = vld [vmem:[%s7378_s0 + $0x58] sm:$0xff]   ;;  %v5504_v20 = vld [vmem:[%s7378_s0 + $0x60] sm:$0xff]  }
   0x8   :  { %4802 = vmatprep.subr.bf16.mxu0 %v5486_v2  ;;  %v5505_v21 = vld [vmem:[%s7378_s0 + $0x68] sm:$0xff]   ;;  %v5506_v22 = vld [vmem:[%s7378_s0 + $0x70] sm:$0xff]   ;;  %v5507_v23 = vld [vmem:[%s7378_s0 + $0x78] sm:$0xff]  }
   0x9   :  { %v5508_v24 = vld [vmem:[%s7378_s0 + $0x80] sm:$0xff]   ;;  %v5509_v25 = vld [vmem:[%s7378_s0 + $0x88] sm:$0xff]   ;;  %v5510_v26 = vld [vmem:[%s7378_s0 + $0x90] sm:$0xff]  }
   0xa   :  { %v5511_v27 = vld [vmem:[%s7378_s0 + $0x98] sm:$0xff]   ;;  %v5512_v28 = vld [vmem:[%s7378_s0 + $0xa0] sm:$0xff]   ;;  %v5513_v29 = vld [vmem:[%s7378_s0 + $0xa8] sm:$0xff]  }
   0xb   :  { %4803 = vmatpush3.bf16.msra.mxu0 %v5486_v2  ;;  %v5514_v30 = vld [vmem:[%s7378_s0 + $0xb0] sm:$0xff]   ;;  %v5515_v31 = vld [vmem:[%s7378_s0 + $0xb8] sm:$0xff]   ;;  %v5516_v32 = vld [vmem:[%s7378_s0 + $0xc0] sm:$0xff]  }
   0xc   :  { %4804 = vmatprep.subr.bf16.mxu0 %v5487_v3  ;;  %v5517_v33 = vld [vmem:[%s7378_s0 + $0xc8] sm:$0xff]   ;;  %v5518_v34 = vld [vmem:[%s7378_s0 + $0xd0] sm:$0xff]   ;;  %v5519_v35 = vld [vmem:[%s7378_s0 + $0xd8] sm:$0xff]  }
   0xd   :  { %v5520_v36 = vld [vmem:[%s7378_s0 + $0xe0] sm:$0xff]   ;;  %v5521_v37 = vld [vmem:[%s7378_s0 + $0xe8] sm:$0xff]   ;;  %v5522_v38 = vld [vmem:[%s7378_s0 + $0xf0] sm:$0xff]  }
   0xe   :  { %v5523_v39 = vld [vmem:[%s7378_s0 + $0xf8] sm:$0xff]   ;;  %v5524_v40 = vld [vmem:[%s7378_s0 + $0x100] sm:$0xff]   ;;  %v5525_v41 = vld [vmem:[%s7378_s0 + $0x108] sm:$0xff]  }
   0xf   :  { %4805 = vmatpush3.bf16.msra.mxu0 %v5487_v3  ;;  %v5526_v42 = vld [vmem:[%s7378_s0 + $0x110] sm:$0xff]   ;;  %v5527_v43 = vld [vmem:[%s7378_s0 + $0x118] sm:$0xff]   ;;  %v5528_v44 = vld [vmem:[%s7378_s0 + $0x120] sm:$0xff]  }
  0x10   :  { %4806 = vmatprep.subr.bf16.mxu0 %v5488_v5  ;;  %v5529_v45 = vld [vmem:[%s7378_s0 + $0x128] sm:$0xff]   ;;  %v5530_v46 = vld [vmem:[%s7378_s0 + $0x130] sm:$0xff]   ;;  %v5531_v47 = vld [vmem:[%s7378_s0 + $0x138] sm:$0xff]  }
  0x11   :  { %v5532_v48 = vld [vmem:[%s7378_s0 + $0x140] sm:$0xff]   ;;  %v5533_v49 = vld [vmem:[%s7378_s0 + $0x148] sm:$0xff]   ;;  %v5534_v50 = vld [vmem:[%s7378_s0 + $0x150] sm:$0xff]  }
  0x12   :  { %v5535_v51 = vld [vmem:[%s7378_s0 + $0x158] sm:$0xff]   ;;  %v5536_v52 = vld [vmem:[%s7378_s0 + $0x160] sm:$0xff]   ;;  %v5537_v53 = vld [vmem:[%s7378_s0 + $0x168] sm:$0xff]  }
  0x13   :  { %4807 = vmatpush3.bf16.msra.mxu0 %v5488_v5  ;;  %v5538_v54 = vld [vmem:[%s7378_s0 + $0x170] sm:$0xff]   ;;  %v5539_v55 = vld [vmem:[%s7378_s0 + $0x178] sm:$0xff]   ;;  %v5540_v56 = vld [vmem:[%s7378_s0 + $0x180] sm:$0xff]  }
  0x14   :  { %4808 = vmatprep.subr.bf16.mxu0 %v5489_v6  ;;  %v5541_v57 = vld [vmem:[%s7378_s0 + $0x188] sm:$0xff]   ;;  %v5542_v58 = vld [vmem:[%s7378_s0 + $0x190] sm:$0xff]   ;;  %v5543_v59 = vld [vmem:[%s7378_s0 + $0x198] sm:$0xff]  }
  0x15   :  { %v5544_v60 = vld [vmem:[%s7378_s0 + $0x1a0] sm:$0xff]   ;;  %v5545_v61 = vld [vmem:[%s7378_s0 + $0x1a8] sm:$0xff]   ;;  %v5546_v62 = vld [vmem:[%s7378_s0 + $0x1b0] sm:$0xff]  }
  0x16   :  { %v5547_v1 = vld [vmem:[%s7378_s0 + $0x1b8] sm:$0xff]   ;;  %v5548_v3 = vld [vmem:[%s7378_s0 + $0x1c0] sm:$0xff]  }
  0x17   :  { %4809 = vmatpush3.bf16.msra.mxu0 %v5489_v6 }
  0x18   :  { %4810 = vmatprep.subr.bf16.mxu0 %v5490_v7 }
  0x1b   :  { %4811 = vmatpush3.bf16.msra.mxu0 %v5490_v7  ;;  %v5549_v7 = vld [vmem:[%s7378_s0 + $0x1c8] sm:$0xff]  }
  0x1c   :  { %4812 = vmatprep.subr.bf16.mxu0 %v5491_v8 }
  0x1f   :  { %4813 = vmatpush3.bf16.msra.mxu0 %v5491_v8 }
  0x22   :  { %4815 = vmatmul.mubr.bf16.vlgmr.msra.gmra.mrb[0].mxu0 %v5493_v9  ;;  %v5550_v9 = vld [vmem:[%s7378_s0 + $0x1d0] sm:$0xff]  }
  0x23   :  { %4818 = vmatprep.mubr.bf16.mxu0 %v5494_v10 }
  0x2a   :  { %4819 = vmatmul.mubr.bf16.gmra.mrb[4].mxu0 %v5495_v11 }
  0x2b   :  { %4822 = vmatprep.mubr.bf16.mxu0 %v5496_v12 }
  0x32   :  { %4823 = vmatmul.mubr.bf16.gmra.mrb[8].mxu0 %v5497_v13  ;;  %v5551_v13 = vld [vmem:[%s7378_s0 + $0x1d8] sm:$0xff]  }
  0x33   :  { %4826 = vmatprep.mubr.bf16.mxu0 %v5498_v14 }
  0x3a   :  { %4827 = vmatmul.mubr.bf16.gmra.mrb[12].mxu0 %v5499_v15  ;;  %v5552_v15 = vld [vmem:[%s7378_s0 + $0x1e0] sm:$0xff]  }
  0x3b   :  { %4830 = vmatprep.mubr.bf16.mxu0 %v5500_v16 }
  0x42   :  { %4831 = vmatmul.mubr.bf16.gmra.mrb[16].mxu0 %v5501_v17 }
  0x43   :  { %4834 = vmatprep.mubr.bf16.mxu0 %v5502_v18 }
  0x4a   :  { %4835 = vmatmul.mubr.bf16.gmra.mrb[20].mxu0 %v5503_v19  ;;  %v5553_v19 = vld [vmem:[%s7378_s0 + $0x1e8] sm:$0xff]  }
  0x4b   :  { %4838 = vmatprep.mubr.bf16.mxu0 %v5504_v20 }
  0x52   :  { %4839 = vmatmul.mubr.bf16.gmra.mrb[24].mxu0 %v5505_v21 }
  0x53   :  { %4842 = vmatprep.mubr.bf16.mxu0 %v5506_v22 }
  0x5a   :  { %4843 = vmatmul.mubr.bf16.gmra.mrb[28].mxu0 %v5507_v23 }
  0x5b   :  { %4846 = vmatprep.mubr.bf16.mxu0 %v5508_v24 }
  0x62   :  { %4847 = vmatmul.mubr.bf16.gmra.mrb[32].mxu0 %v5509_v25 }
  0x63   :  { %4850 = vmatprep.mubr.bf16.mxu0 %v5510_v26 }
  0x6a   :  { %4851 = vmatmul.mubr.bf16.gmra.mrb[36].mxu0 %v5511_v27 }
  0x6b   :  { %4854 = vmatprep.mubr.bf16.mxu0 %v5512_v28 }
  0x72   :  { %4855 = vmatmul.mubr.bf16.gmra.mrb[40].mxu0 %v5513_v29 }
  0x73   :  { %4858 = vmatprep.mubr.bf16.mxu0 %v5514_v30  ;;  %v7387_v30 = vmov 0.0  }
  0x74   :  { %4942 = vmatprep.subr.bf16.mxu1 %v7387_v30  ;;  %5102 = vmatprep.subr.bf16.mxu0 %v7387_v30 }
  0x75   :  { %4958 = vmatprep.mubr.msk.bf16.mxu1 %vm5777_vm0, %v7387_v30 }
  0x7a   :  { %4859 = vmatmul.mubr.bf16.gmra.mrb[44].mxu0 %v5515_v31  ;;  %v5554_v31 = vld [vmem:[%s7379_s3 + $0x40] sm:$0xff]  }
  0x7b   :  { %4862 = vmatprep.mubr.bf16.mxu0 %v5516_v32  ;;  %4943 = vmatpush3.bf16.msra.mxu1 %v5554_v31 }
  0x7c   :  { %4944 = vmatprep.subr.bf16.mxu1 %v7387_v30 }
  0x82   :  { %4863 = vmatmul.mubr.bf16.gmra.mrb[48].mxu0 %v5517_v33 }
  0x83   :  { %4866 = vmatprep.mubr.bf16.mxu0 %v5518_v34 }
  0x8a   :  { %4867 = vmatmul.mubr.bf16.gmra.mrb[52].mxu0 %v5519_v35  ;;  %v5555_v35 = vld [vmem:[%s7379_s3 + $0x200] sm:$0xff]  }
  0x8b   :  { %4870 = vmatprep.mubr.bf16.mxu0 %v5520_v36  ;;  %v5556_v36 = vld [vmem:[%s7379_s3 + $0x48] sm:$0xff]   ;;  %5103 = vmatpush3.bf16.msra.mxu0 %v5555_v35 }
  0x8c   :  { %4945 = vmatpush3.bf16.msra.mxu1 %v5556_v36  ;;  %5104 = vmatprep.subr.bf16.mxu0 %v7387_v30 }
  0x8d   :  { %4946 = vmatprep.subr.bf16.mxu1 %v7387_v30 }
  0x92   :  { %4871 = vmatmul.mubr.bf16.gmra.mrb[56].mxu0 %v5521_v37 }
  0x93   :  { %4874 = vmatprep.mubr.bf16.mxu0 %v5522_v38  ;;  %v5557_v38 = vld [vmem:[%s7379_s3 + $0x50] sm:$0xff]  }
  0x94   :  { %4947 = vmatpush3.bf16.msra.mxu1 %v5557_v38 }
  0x95   :  { %4948 = vmatprep.subr.bf16.mxu1 %v7387_v30 }
  0x9a   :  { %4875 = vmatmul.mubr.bf16.gmra.mrb[60].mxu0 %v5523_v39 }
  0x9b   :  { %4878 = vmatprep.mubr.bf16.mxu0 %v5524_v40 }
  0xa2   :  { %4879 = vmatmul.mubr.bf16.gmra.mrb[64].mxu0 %v5525_v41 }
  0xa3   :  { %4882 = vmatprep.mubr.bf16.mxu0 %v5526_v42  ;;  %v5558_v42 = vld [vmem:[%s7379_s3 + $0x58] sm:$0xff]  }
  0xa4   :  { %4949 = vmatpush3.bf16.msra.mxu1 %v5558_v42  ;;  %v5572_v42 = vld [vmem:[%s7379_s3 + $0x230] sm:$0xff]  }
  0xa5   :  { %4950 = vmatprep.subr.bf16.mxu1 %v7387_v30 }
  0xaa   :  { %4883 = vmatmul.mubr.bf16.gmra.mrb[68].mxu0 %v5527_v43 }
  0xab   :  { %4886 = vmatprep.mubr.bf16.mxu0 %v5528_v44  ;;  %v5559_v44 = vld [vmem:[%s7379_s3 + $0x60] sm:$0xff]  }
  0xac   :  { %4951 = vmatpush3.bf16.msra.mxu1 %v5559_v44 }
  0xad   :  { %4952 = vmatprep.subr.bf16.mxu1 %v7387_v30 }
  0xb2   :  { %4887 = vmatmul.mubr.bf16.gmra.mrb[72].mxu0 %v5529_v45 }
  0xb3   :  { %4890 = vmatprep.mubr.bf16.mxu0 %v5530_v46  ;;  %v5560_v46 = vld [vmem:[%s7379_s3 + $0x208] sm:$0xff]  }
  0xb4   :  { %5105 = vmatpush3.bf16.msra.mxu0 %v5560_v46 }
  0xb5   :  { %5106 = vmatprep.subr.bf16.mxu0 %v7387_v30 }
  0xba   :  { %4891 = vmatmul.mubr.bf16.gmra.mrb[76].mxu0 %v5531_v47 }
  0xbb   :  { %4894 = vmatprep.mubr.bf16.mxu0 %v5532_v48 }
  0xc2   :  { %4895 = vmatmul.mubr.bf16.gmra.mrb[80].mxu0 %v5533_v49 }
  0xc3   :  { %4898 = vmatprep.mubr.bf16.mxu0 %v5534_v50 }
  0xca   :  { %4899 = vmatmul.mubr.bf16.gmra.mrb[84].mxu0 %v5535_v51  ;;  %v5561_v51 = vld [vmem:[%s7379_s3 + $0x68] sm:$0xff]  }
  0xcb   :  { %4902 = vmatprep.mubr.bf16.mxu0 %v5536_v52  ;;  %4953 = vmatpush3.bf16.msra.mxu1 %v5561_v51  ;;  %v5574_v51 = vld [vmem:[%s7379_s3 + $0x238] sm:$0xff]  }
  0xcc   :  { %4954 = vmatprep.subr.bf16.mxu1 %v7387_v30 }
  0xd2   :  { %4903 = vmatmul.mubr.bf16.gmra.mrb[88].mxu0 %v5537_v53 }
  0xd3   :  { %4906 = vmatprep.mubr.bf16.mxu0 %v5538_v54 }
  0xda   :  { %4907 = vmatmul.mubr.bf16.gmra.mrb[92].mxu0 %v5539_v55  ;;  %v5562_v55 = vld [vmem:[%s7379_s3 + $0x210] sm:$0xff]  }
  0xdb   :  { %4910 = vmatprep.mubr.bf16.mxu0 %v5540_v56  ;;  %5107 = vmatpush3.bf16.msra.mxu0 %v5562_v55  ;;  %v5563_v56 = vld [vmem:[%s7379_s3 + $0x70] sm:$0xff]  }
  0xdc   :  { %5108 = vmatprep.subr.bf16.mxu0 %v7387_v30  ;;  %4955 = vmatpush3.bf16.msra.mxu1 %v5563_v56 }
  0xdd   :  { %4956 = vmatprep.subr.bf16.mxu1 %v7387_v30 }
  0xe2   :  { %4911 = vmatmul.mubr.bf16.gmra.mrb[96].mxu0 %v5541_v57 }
  0xe3   :  { %4914 = vmatprep.mubr.bf16.mxu0 %v5542_v58  ;;  %v5564_v58 = vld [vmem:[%s7379_s3 + $0x218] sm:$0xff]  }
  0xe4   :  { %5109 = vmatpush3.bf16.msra.mxu0 %v5564_v58 }
  0xe5   :  { %5110 = vmatprep.subr.bf16.mxu0 %v7387_v30 }
  0xea   :  { %4915 = vmatmul.mubr.bf16.gmra.mrb[100].mxu0 %v5543_v59 }
  0xeb   :  { %4918 = vmatprep.mubr.bf16.mxu0 %v5544_v60 }
  0xf2   :  { %4919 = vmatmul.mubr.bf16.gmra.mrb[104].mxu0 %v5545_v61 }
  0xf3   :  { %4922 = vmatprep.mubr.bf16.mxu0 %v5546_v62 }
  0xf5   :  { %v6017_v63 = vpop.f32.mrb[0].mxu0 }
  0xf6   :  { %v6019_v0 = vpop.f32.mrb[1].mxu0 }
  0xf7   :  { %v6024_v2 = vpop.f32.mrb[2].mxu0 }
  0xf8   :  { %v6029_v4 = vpop.f32.mrb[3].mxu0 }
  0xfa   :  { %4923 = vmatmul.mubr.bf16.gmra.mrb[108].mxu0 %v5547_v1  ;;  %v5565_v1 = vld [vmem:[%s7379_s3 + $0x78] sm:$0xff]  }
  0xfb   :  { %4926 = vmatprep.mubr.bf16.mxu0 %v5548_v3  ;;  %4957 = vmatpush3.bf16.msra.mxu1 %v5565_v1 }
  0xfc   :  { %4962 = vmatprep.subr.bf16.mxu1 %v7387_v30 }
  0xfd   :  { %v6031_v5 = vpop.f32.mrb[4].mxu0 }
  0xfe   :  { %v6033_v6 = vpop.f32.mrb[5].mxu0 }
  0xff   :  { %v6038_v8 = vpop.f32.mrb[6].mxu0 }
 0x100   :  { %v6043_v10 = vpop.f32.mrb[7].mxu0 }
 0x102   :  { %4927 = vmatmul.mubr.bf16.gmra.mrb[112].mxu0 %v5549_v7 }
 0x103   :  { %4930 = vmatprep.mubr.bf16.mxu0 %v5550_v9 }
 0x105   :  { %v6045_v11 = vpop.f32.mrb[8].mxu0 }
 0x106   :  { %v6047_v12 = vpop.f32.mrb[9].mxu0 }
 0x107   :  { %v6052_v14 = vpop.f32.mrb[10].mxu0 }
 0x108   :  { %v6057_v16 = vpop.f32.mrb[11].mxu0 }
 0x10a   :  { %4931 = vmatmul.mubr.bf16.gmra.mrb[116].mxu0 %v5551_v13  ;;  %v5566_v13 = vld [vmem:[%s7379_s3 + $0x220] sm:$0xff]  }
 0x10b   :  { %4934 = vmatprep.mubr.bf16.mxu0 %v5552_v15  ;;  %5111 = vmatpush3.bf16.msra.mxu0 %v5566_v13 }
 0x10c   :  { %5112 = vmatprep.subr.bf16.mxu0 %v7387_v30 }
 0x10d   :  { %v6059_v17 = vpop.f32.mrb[12].mxu0 }
 0x10e   :  { %v6061_v18 = vpop.f32.mrb[13].mxu0 }
 0x10f   :  { %v6066_v20 = vpop.f32.mrb[14].mxu0 }
 0x110   :  { %v6068_v21 = vpop.f32.mrb[15].mxu0 }
 0x112   :  { %4935 = vmatmul.mubr.bf16.gmra.mrb[120].mxu0 %v5553_v19 }
 0x115   :  { %v6070_v22 = vpop.f32.mrb[16].mxu0 }
 0x116   :  { %7409 = vst [vmem:[#allocation2_spill] sm:$0xff] %v6070_v22  ;;  %v6072_v23 = vpop.f32.mrb[17].mxu0 }
 0x117   :  { %7410 = vst [vmem:[#allocation3_spill] sm:$0xff] %v6072_v23  ;;  %v6074_v24 = vpop.f32.mrb[18].mxu0 }
 0x118   :  { %7411 = vst [vmem:[#allocation4_spill] sm:$0xff] %v6074_v24  ;;  %v6076_v25 = vpop.f32.mrb[19].mxu0 }
 0x119   :  { %7412 = vst [vmem:[#allocation5_spill] sm:$0xff] %v6076_v25 }
 0x11d   :  { %v6078_v26 = vpop.f32.mrb[20].mxu0 }
 0x11e   :  { %7413 = vst [vmem:[#allocation6_spill] sm:$0xff] %v6078_v26  ;;  %v6080_v27 = vpop.f32.mrb[21].mxu0 }
 0x11f   :  { %7414 = vst [vmem:[#allocation7_spill] sm:$0xff] %v6080_v27  ;;  %v6082_v28 = vpop.f32.mrb[22].mxu0 }
 0x120   :  { %7415 = vst [vmem:[#allocation8_spill] sm:$0xff] %v6082_v28  ;;  %v6084_v29 = vpop.f32.mrb[23].mxu0 }
 0x121   :  { %7416 = vst [vmem:[#allocation9_spill] sm:$0xff] %v6084_v29 }
 0x125   :  { %v4840_v32 = vpop.f32.mrb[24].mxu0 }
 0x126   :  { %v6091_v33 = vpop.f32.mrb[25].mxu0  ;;  %v5568_v32 = vld [vmem:[%s7379_s3 + $0x228] sm:$0xff]  }
 0x127   :  { %7417 = vst [vmem:[#allocation10_spill] sm:$0xff] %v6091_v33  ;;  %v4841_v34 = vpop.f32.mrb[26].mxu0  ;;  %5113 = vmatpush3.bf16.msra.mxu0 %v5568_v32 }
 0x128   :  { %v6100_v37 = vpop.f32.mrb[27].mxu0  ;;  %5114 = vmatprep.subr.bf16.mxu0 %v7387_v30 }
 0x129   :  { %7418 = vst [vmem:[#allocation11_spill] sm:$0xff] %v6100_v37 }
 0x12b   :  { %5115 = vmatpush3.bf16.msra.mxu0 %v5572_v42 }
 0x12c   :  { %5116 = vmatprep.subr.bf16.mxu0 %v7387_v30 }
 0x12d   :  { %v4844_v39 = vpop.f32.mrb[28].mxu0 }
 0x12e   :  { %v753_v40 = vpop.f32.mrb[29].mxu0 }
 0x12f   :  { %v4845_v41 = vpop.f32.mrb[30].mxu0  ;;  %v5570_v40 = vld [vmem:[%s7378_s0 + $0x1f0] sm:$0xff]   ;;  %5117 = vmatpush3.bf16.msra.mxu0 %v5574_v51 }
 0x130   :  { %v755_v43 = vpop.f32.mrb[31].mxu0  ;;  %v5571_v41 = vld [vmem:[%s7378_s0 + $0x1f8] sm:$0xff]   ;;  %4938 = vmatprep.mubr.bf16.mxu0 %v5570_v40  ;;  %5142 = vmatprep.subr.bf16.mxu0 %v7387_v30 }
 0x131   :  { %4939 = vmatmul.mubr.bf16.gmra.mrb[124].mxu0 %v5571_v41 }
 0x132   :  { %5118 = vmatprep.mubr.msk.bf16.mxu0 %vm5777_vm0, %v7387_v30 }
 0x135   :  { %v6115_v45 = vpop.f32.mrb[32].mxu0 }
 0x136   :  { %v6122_v48 = vpop.f32.mrb[33].mxu0 }
 0x137   :  { %v6127_v50 = vpop.f32.mrb[34].mxu0 }
 0x138   :  { %v6134_v53 = vpop.f32.mrb[35].mxu0 }
 0x13d   :  { %v6147_v57 = vpop.f32.mrb[36].mxu0 }
 0x13e   :  { %v6154_v60 = vpop.f32.mrb[37].mxu0 }
 0x13f   :  { %v6159_v62 = vpop.f32.mrb[38].mxu0 }
 0x140   :  { %v6166_v7 = vpop.f32.mrb[39].mxu0 }
 0x145   :  { %v6178_v15 = vpop.f32.mrb[40].mxu0 }
 0x146   :  { %v6182_v31 = vpop.f32.mrb[41].mxu0 }
 0x147   :  { %v6189_v35 = vpop.f32.mrb[42].mxu0 }
 0x148   :  { %v6193_v38 = vpop.f32.mrb[43].mxu0 }
 0x14d   :  { %v6207_v43 = vpop.f32.mrb[44].mxu0 }
 0x14e   :  { %v6213_v46 = vpop.f32.mrb[45].mxu0 }
 0x14f   :  { %v6221_v56 = vpop.f32.mrb[46].mxu0 }
 0x150   :  { %v6225_v1 = vpop.f32.mrb[47].mxu0 }
 0x155   :  { %v6230_v32 = vpop.f32.mrb[48].mxu0 }
 0x156   :  { %7419 = vst [vmem:[#allocation12_spill] sm:$0xff] %v6230_v32  ;;  %v6234_v41 = vpop.f32.mrb[49].mxu0 }
 0x157   :  { %7420 = vst [vmem:[#allocation13_spill] sm:$0xff] %v6234_v41  ;;  %v6238_v55 = vpop.f32.mrb[50].mxu0 }
 0x158   :  { %7421 = vst [vmem:[#allocation14_spill] sm:$0xff] %v6238_v55  ;;  %v6242_v44 = vpop.f32.mrb[51].mxu0 }
 0x159   :  { %7422 = vst [vmem:[#allocation15_spill] sm:$0xff] %v6242_v44 }
 0x15d   :  { %v6246_v13 = vpop.f32.mrb[52].mxu0 }
 0x15e   :  { %7423 = vst [vmem:[#allocation16_spill] sm:$0xff] %v6246_v13  ;;  %v6250_v39 = vpop.f32.mrb[53].mxu0 }
 0x15f   :  { %7424 = vst [vmem:[#allocation17_spill] sm:$0xff] %v6250_v39  ;;  %v6254_v36 = vpop.f32.mrb[54].mxu0 }
 0x160   :  { %7425 = vst [vmem:[#allocation18_spill] sm:$0xff] %v6254_v36  ;;  %v6258_v34 = vpop.f32.mrb[55].mxu0 }
 0x161   :  { %7426 = vst [vmem:[#allocation19_spill] sm:$0xff] %v6258_v34 }
 0x165   :  { %v4872_v19 = vpop.f32.mrb[56].mxu0 }
 0x166   :  { %v6262_v30 = vpop.f32.mrb[57].mxu0 }
 0x167   :  { %7427 = vst [vmem:[#allocation20_spill] sm:$0xff] %v6262_v30  ;;  %v4873_v9 = vpop.f32.mrb[58].mxu0 }
 0x168   :  { %v6266_v3 = vpop.f32.mrb[59].mxu0 }
 0x169   :  { %7428 = vst [vmem:[#allocation21_spill] sm:$0xff] %v6266_v3 }
 0x16d   :  { %v4876_v61 = vpop.f32.mrb[60].mxu0 }
 0x16e   :  { %v875_v59 = vpop.f32.mrb[61].mxu0 }
 0x16f   :  { %v4877_v58 = vpop.f32.mrb[62].mxu0 }
 0x170   :  { %v877_v54 = vpop.f32.mrb[63].mxu0 }
 0x175   :  { %v4880_v52 = vpop.f32.mrb[64].mxu0 }
 0x176   :  { %v887_v49 = vpop.f32.mrb[65].mxu0 }
 0x177   :  { %v4881_v47 = vpop.f32.mrb[66].mxu0 }
 0x178   :  { %v890_v51 = vpop.f32.mrb[67].mxu0 }
 0x17d   :  { %v4884_v19 = vpop.f32.mrb[68].mxu0 }
 0x17e   :  { %v903_v34 = vpop.f32.mrb[69].mxu0 }
 0x17f   :  { %v4885_v29 = vpop.f32.mrb[70].mxu0 }
 0x180   :  { %v6270_v36 = vpop.f32.mrb[71].mxu0 }
 0x185   :  { %v6272_v40 = vpop.f32.mrb[72].mxu0 }
 0x186   :  { %v6274_v9 = vpop.f32.mrb[73].mxu0 }
 0x187   :  { %v6276_v30 = vpop.f32.mrb[74].mxu0 }
 0x188   :  { %v6278_v42 = vpop.f32.mrb[75].mxu0 }
 0x18d   :  { %v6280_v59 = vpop.f32.mrb[76].mxu0 }
 0x18e   :  { %v6282_v54 = vpop.f32.mrb[77].mxu0 }
 0x18f   :  { %v6284_v61 = vpop.f32.mrb[78].mxu0 }
 0x190   :  { %v6286_v58 = vpop.f32.mrb[79].mxu0 }
 0x195   :  { %v6288_v3 = vpop.f32.mrb[80].mxu0 }
 0x196   :  { %v6290_v37 = vpop.f32.mrb[81].mxu0 }
 0x197   :  { %7429 = vst [vmem:[#allocation22_spill] sm:$0xff] %v6290_v37  ;;  %v6292_v33 = vpop.f32.mrb[82].mxu0  ;;  %v7440_v37 = vmax.f32 %v6024_v2, %v6127_v50 }
 0x198   :  { %7430 = vst [vmem:[#allocation23_spill] sm:$0xff] %v6292_v33  ;;  %v6294_v28 = vpop.f32.mrb[83].mxu0 }
 0x199   :  { %7431 = vst [vmem:[#allocation24_spill] sm:$0xff] %v6294_v28 }
 0x19d   :  { %v6296_v39 = vpop.f32.mrb[84].mxu0 }
 0x19e   :  { %7432 = vst [vmem:[#allocation25_spill] sm:$0xff] %v6296_v39  ;;  %v6298_v27 = vpop.f32.mrb[85].mxu0  ;;  %v6311_v39 = vld [vmem:[%s7380_s2] ss:$0 sm:$0xff] }
 0x19f   :  { %7433 = vst [vmem:[#allocation26_spill] sm:$0xff] %v6298_v27  ;;  %v6300_v13 = vpop.f32.mrb[86].mxu0 }
 0x1a0   :  { %7434 = vst [vmem:[#allocation27_spill] sm:$0xff] %v6300_v13  ;;  %v6302_v26 = vpop.f32.mrb[87].mxu0 }
 0x1a1   :  { %7435 = vst [vmem:[#allocation28_spill] sm:$0xff] %v6302_v26 }
 0x1a5   :  { %v4904_v44 = vpop.f32.mrb[88].mxu0 }
 0x1a6   :  { %v6304_v25 = vpop.f32.mrb[89].mxu0  ;;  %v7438_v44 = vmax.f32 %v6017_v63, %v6115_v45 }
 0x1a7   :  { %7436 = vst [vmem:[#allocation29_spill] sm:$0xff] %v6304_v25  ;;  %v4905_v55 = vpop.f32.mrb[90].mxu0 }
 0x1a8   :  { %v6306_v24 = vpop.f32.mrb[91].mxu0 }
 0x1a9   :  { %7437 = vst [vmem:[#allocation30_spill] sm:$0xff] %v6306_v24 }
 0x1ad   :  { %v4908_v41 = vpop.f32.mrb[92].mxu0 }
 0x1ae   :  { %v997_v23 = vpop.f32.mrb[93].mxu0 }
 0x1af   :  { %v4909_v32 = vpop.f32.mrb[94].mxu0  ;;  %v7439_v23 = vmax.f32 %v6019_v0, %v6122_v48 }
 0x1b0   :  { %v999_v33 = vpop.f32.mrb[95].mxu0 }
 0x1b5   :  { %v4912_v22 = vpop.f32.mrb[96].mxu0 }
 0x1b6   :  { %v1158_v27 = vmax.f32 %v4880_v52, %v4912_v22  ;;  %v1009_v13 = vpop.f32.mrb[97].mxu0  ;;  %v7441_v52 = vmax.f32 %v6029_v4, %v6134_v53 }
 0x1b7   :  { %v1156_v28 = vmax.f32 %v887_v49, %v1009_v13  ;;  %v4913_v26 = vpop.f32.mrb[98].mxu0 }
 0x1b8   :  { %v1184_v55 = vmax.f32 %v7438_v44, %v1158_v27  ;;  %v1159_v25 = vmax.f32 %v4881_v47, %v4913_v26  ;;  %v1012_v24 = vpop.f32.mrb[99].mxu0  ;;  %v7443_v44 = vmax.f32 %v6033_v6, %v6154_v60  ;;  %v7445_v6 = vmax.f32 %v6043_v10, %v6166_v7 }
 0x1b9   :  { %v1182_v33 = vmax.f32 %v7439_v23, %v1156_v28  ;;  %v1157_v32 = vmax.f32 %v890_v51, %v1012_v24  ;;  %v7446_v7 = vmov 0.0  }
 0x1ba   :  { %v1217_v41 = vadd.f32 %v6311_v39, %v1184_v55  ;;  %v1185_v22 = vmax.f32 %v7440_v37, %v1159_v25  ;;  %v7442_v37 = vmax.f32 %v6031_v5, %v6147_v57  ;;  %v5567_v5 = vld [vmem:[%s7379_s3] sm:$0xff]  }
 0x1bb   :  { %v1215_v49 = vadd.f32 %v6311_v39, %v1182_v33  ;;  %v1183_v63 = vmax.f32 %v7441_v52, %v1157_v32 }
 0x1bc   :  { %v1218_v26 = vadd.f32 %v6311_v39, %v1185_v22  ;;  %v1243_v0 = vmax.f32 %v1217_v41, 0.0 }
 0x1bd   :  { %v1216_v27 = vadd.f32 %v6311_v39, %v1183_v63  ;;  %v4916_v45 = vpop.f32.mrb[100].mxu0  ;;  %v1241_v28 = vmax.f32 %v1215_v49, 0.0 }
 0x1be   :  { %v1244_v24 = vmax.f32 %v1218_v26, 0.0  ;;  %v1162_v47 = vmax.f32 %v4884_v19, %v4916_v45  ;;  %v1025_v48 = vpop.f32.mrb[101].mxu0 }
 0x1bf   :  { %v1242_v13 = vmax.f32 %v1216_v27, 0.0  ;;  %v1160_v51 = vmax.f32 %v903_v34, %v1025_v48  ;;  %v4917_v2 = vpop.f32.mrb[102].mxu0  ;;  %v7444_v34 = vmax.f32 %v6038_v8, %v6159_v62  ;;  %v5569_v8 = vld [vmem:[%s7379_s3 + $0x8] sm:$0xff]  }
 0x1c0   :  { %v6329_v25 = vpack.c.bf16 %v1244_v24, %v1243_v0  ;;  %v1188_v4 = vmax.f32 %v7442_v37, %v1162_v47  ;;  %v1163_v50 = vmax.f32 %v4885_v29, %v4917_v2  ;;  %v1028_v53 = vpop.f32.mrb[103].mxu0  ;;  %v7449_v37 = vmax.f32 %v6052_v14, %v6189_v35  ;;  %v5575_v14 = vld [vmem:[%s7379_s3 + $0x18] sm:$0xff]  }
 0x1c1   :  { %v1186_v55 = vmax.f32 %v7443_v44, %v1160_v51  ;;  %v1161_v23 = vmax.f32 %v6270_v36, %v1028_v53  ;;  %v6338_v33 = vpack.c.bf16 %v1242_v13, %v1241_v28  ;;  %v7447_v28 = vmax.f32 %v6045_v11, %v6178_v15  ;;  %v5573_v11 = vld [vmem:[%s7379_s3 + $0x10] sm:$0xff]  }
 0x1c2   :  { %v1221_v19 = vadd.f32 %v6311_v39, %v1188_v4  ;;  %v1189_v32 = vmax.f32 %v7444_v34, %v1163_v50  ;;  %v7448_v13 = vmax.f32 %v6047_v12, %v6182_v31  ;;  %v7450_v15 = vmax.f32 %v6057_v16, %v6193_v38 }
 0x1c3   :  { %v1219_v29 = vadd.f32 %v6311_v39, %v1186_v55  ;;  %v1187_v57 = vmax.f32 %v7445_v6, %v1161_v23  ;;  %v1313_v60 = vrot.slane %v6338_v33, 4 }
 0x1c4   :  { %v1222_v36 = vadd.f32 %v6311_v39, %v1189_v32  ;;  %v1247_v62 = vmax.f32 %v1221_v19, 0.0  ;;  %v7451_v32 = vmax.f32 %v6059_v17, %v6207_v43  ;;  %v7453_v17 = vmax.f32 %v6066_v20, %v6221_v56  ;;  %v5578_v20 = vld [vmem:[%s7379_s3 + $0x288] sm:$0xff]  }
 0x1c5   :  { %v1220_v41 = vadd.f32 %v6311_v39, %v1187_v57  ;;  %v4920_v22 = vpop.f32.mrb[104].mxu0  ;;  %4959 = vmatmul.mubr.bf16.vlgmr.msra.gmra.mrb[0].mxu1 %v1313_v60  ;;  %v1245_v49 = vmax.f32 %v1219_v29, 0.0 }
 0x1c6   :  { %v1248_v52 = vmax.f32 %v1222_v36, 0.0  ;;  %v1166_v63 = vmax.f32 %v6272_v40, %v4920_v22  ;;  %4963 = vmatpush3.bf16.msra.mxu1 %v5567_v5  ;;  %v1041_v10 = vpop.f32.mrb[105].mxu0  ;;  %4978 = vmatprep.mubr.msk.bf16.mxu1 %vm5777_vm0, %v7446_v7 }
 0x1c7   :  { %v1246_v26 = vmax.f32 %v1220_v41, 0.0  ;;  %v1164_v27 = vmax.f32 %v6274_v9, %v1041_v10  ;;  %v4921_v45 = vpop.f32.mrb[106].mxu0  ;;  %4964 = vmatprep.subr.bf16.mxu1 %v7446_v7 }
 0x1c8   :  { %v6362_v0 = vpack.c.bf16 %v1248_v52, %v1247_v62  ;;  %v1192_v24 = vmax.f32 %v7447_v28, %v1166_v63  ;;  %v1167_v47 = vmax.f32 %v6276_v30, %v4921_v45  ;;  %v1044_v40 = vpop.f32.mrb[107].mxu0 }
 0x1c9   :  { %v6368_v48 = vpack.c.bf16 %v1246_v26, %v1245_v49  ;;  %v1190_v51 = vmax.f32 %v7448_v13, %v1164_v27  ;;  %v1165_v9 = vmax.f32 %v6278_v42, %v1044_v40  ;;  %v7455_v26 = vld [vmem:[#allocation22_spill] sm:$0xff] }
 0x1ca   :  { %v1225_v2 = vadd.f32 %v6311_v39, %v1192_v24  ;;  %v1193_v4 = vmax.f32 %v7449_v37, %v1167_v47  ;;  %4965 = vmatpush3.bf16.msra.mxu1 %v5569_v8  ;;  %v7454_v8 = vmax.f32 %v6068_v21, %v6225_v1  ;;  %v5579_v21 = vld [vmem:[%s7379_s3 + $0x28] sm:$0xff]   ;;  %v7456_v24 = vld [vmem:[#allocation2_spill] sm:$0xff]  ;;  %v7457_v47 = vld [vmem:[#allocation12_spill] sm:$0xff] }
 0x1cb   :  { %v1223_v30 = vadd.f32 %v6311_v39, %v1190_v51  ;;  %v1191_v12 = vmax.f32 %v7450_v15, %v1165_v9  ;;  %4966 = vmatprep.subr.bf16.mxu1 %v7446_v7  ;;  %v7458_v40 = vmax.f32 %v7456_v24, %v7457_v47  ;;  %v7459_v51 = vld [vmem:[#allocation23_spill] sm:$0xff]  ;;  %v7479_v24 = vld [vmem:[#allocation28_spill] sm:$0xff] }
 0x1cc   :  { %v1226_v31 = vadd.f32 %v6311_v39, %v1193_v4  ;;  %v1251_v35 = vmax.f32 %v1225_v2, 0.0  ;;  %v7460_v4 = vld [vmem:[#allocation3_spill] sm:$0xff] }
 0x1cd   :  { %v1224_v42 = vadd.f32 %v6311_v39, %v1191_v12  ;;  %v4924_v50 = vpop.f32.mrb[108].mxu0  ;;  %v1249_v53 = vmax.f32 %v1223_v30, 0.0  ;;  %v7463_v12 = vld [vmem:[#allocation24_spill] sm:$0xff] }
 0x1ce   :  { %v1252_v44 = vmax.f32 %v1226_v31, 0.0  ;;  %v1170_v55 = vmax.f32 %v6280_v59, %v4924_v50  ;;  %4967 = vmatpush3.bf16.msra.mxu1 %v5573_v11  ;;  %v1057_v23 = vpop.f32.mrb[109].mxu0  ;;  %v5576_v59 = vld [vmem:[%s7379_s3 + $0x280] sm:$0xff]   ;;  %v7461_v11 = vld [vmem:[#allocation13_spill] sm:$0xff]  ;;  %v7464_v50 = vld [vmem:[#allocation4_spill] sm:$0xff] }
 0x1cf   :  { %v1250_v16 = vmax.f32 %v1224_v42, 0.0  ;;  %v1168_v38 = vmax.f32 %v6282_v54, %v1057_v23  ;;  %v4925_v19 = vpop.f32.mrb[110].mxu0  ;;  %4968 = vmatprep.subr.bf16.mxu1 %v7446_v7  ;;  %v7452_v54 = vmax.f32 %v6061_v18, %v6213_v46  ;;  %v7462_v30 = vmax.f32 %v7460_v4, %v7461_v11  ;;  %v7467_v23 = vld [vmem:[#allocation5_spill] sm:$0xff] }
 0x1d0   :  { %v6394_v34 = vpack.c.bf16 %v1252_v44, %v1251_v35  ;;  %v1196_v5 = vmax.f32 %v7451_v32, %v1170_v55  ;;  %v1171_v29 = vmax.f32 %v6284_v61, %v4925_v19  ;;  %v1060_v6 = vpop.f32.mrb[111].mxu0  ;;  %v5577_v61 = vld [vmem:[%s7379_s3 + $0x20] sm:$0xff]   ;;  %v5581_v44 = vld [vmem:[%s7379_s3 + $0x30] sm:$0xff]   ;;  %v7483_v11 = vld [vmem:[#allocation9_spill] sm:$0xff] }
 0x1d1   :  { %v6403_v57 = vpack.c.bf16 %v1250_v16, %v1249_v53  ;;  %v1194_v60 = vmax.f32 %v7452_v54, %v1168_v38  ;;  %v1169_v36 = vmax.f32 %v6286_v58, %v1060_v6  ;;  %v7468_v16 = vld [vmem:[#allocation15_spill] sm:$0xff] }
 0x1d2   :  { %v1229_v41 = vadd.f32 %v6311_v39, %v1196_v5  ;;  %v1197_v43 = vmax.f32 %v7453_v17, %v1171_v29  ;;  %4969 = vmatpush3.bf16.msra.mxu1 %v5575_v14  ;;  %v7465_v14 = vld [vmem:[#allocation14_spill] sm:$0xff]  ;;  %v7469_v38 = vmax.f32 %v7467_v23, %v7468_v16  ;;  %v5582_v5 = vld [vmem:[%s7379_s3 + $0x298] sm:$0xff]  }
 0x1d3   :  { %v1227_v22 = vadd.f32 %v6311_v39, %v1194_v60  ;;  %v1195_v18 = vmax.f32 %v7454_v8, %v1169_v36  ;;  %5119 = vmatmul.mubr.bf16.vlgmr.msra.gmra.mrb[128].mxu0 %v6403_v57  ;;  %4970 = vmatprep.subr.bf16.mxu1 %v7446_v7  ;;  %v7466_v35 = vmax.f32 %v7464_v50, %v7465_v14  ;;  %v7470_v60 = vld [vmem:[#allocation25_spill] sm:$0xff] }
 0x1d4   :  { %v1230_v46 = vadd.f32 %v6311_v39, %v1197_v43  ;;  %5143 = vmatpush3.bf16.msra.mxu0 %v5576_v59  ;;  %5158 = vmatprep.mubr.msk.bf16.mxu0 %vm5777_vm0, %v7446_v7  ;;  %v1255_v1 = vmax.f32 %v1229_v41, 0.0  ;;  %v5583_v17 = vld [vmem:[%s7379_s3 + $0x38] sm:$0xff]  }
 0x1d5   :  { %v1228_v56 = vadd.f32 %v6311_v39, %v1195_v18  ;;  %v4928_v58 = vpop.f32.mrb[112].mxu0  ;;  %5144 = vmatprep.subr.bf16.mxu0 %v7446_v7  ;;  %v1253_v62 = vmax.f32 %v1227_v22, 0.0  ;;  %v7471_v22 = vld [vmem:[#allocation26_spill] sm:$0xff] }
 0x1d6   :  { %v1256_v49 = vmax.f32 %v1230_v46, 0.0  ;;  %v1174_v52 = vmax.f32 %v6288_v3, %v4928_v58  ;;  %4971 = vmatpush3.bf16.msra.mxu1 %v5577_v61  ;;  %v1073_v63 = vpop.f32.mrb[113].mxu0  ;;  %v5580_v3 = vld [vmem:[%s7379_s3 + $0x290] sm:$0xff]  }
 0x1d7   :  { %v1254_v10 = vmax.f32 %v1228_v56, 0.0  ;;  %v1172_v27 = vmax.f32 %v7455_v26, %v1073_v63  ;;  %v4929_v45 = vpop.f32.mrb[114].mxu0  ;;  %4972 = vmatprep.subr.bf16.mxu1 %v7446_v7  ;;  %v7473_v56 = vld [vmem:[#allocation16_spill] sm:$0xff]  ;;  %v7477_v26 = vld [vmem:[#allocation17_spill] sm:$0xff] }
 0x1d8   :  { %v6436_v28 = vpack.c.bf16 %v1256_v49, %v1255_v1  ;;  %v1200_v13 = vmax.f32 %v7458_v40, %v1174_v52  ;;  %v1175_v9 = vmax.f32 %v7459_v51, %v4929_v45  ;;  %5145 = vmatpush3.bf16.msra.mxu0 %v5578_v20  ;;  %v1076_v2 = vpop.f32.mrb[115].mxu0  ;;  %v7472_v20 = vld [vmem:[#allocation6_spill] sm:$0xff]  ;;  %v7475_v1 = vld [vmem:[#allocation27_spill] sm:$0xff] }
 0x1d9   :  { %v6445_v37 = vpack.c.bf16 %v1254_v10, %v1253_v62  ;;  %v1198_v15 = vmax.f32 %v7462_v30, %v1172_v27  ;;  %v1173_v31 = vmax.f32 %v7463_v12, %v1076_v2  ;;  %5146 = vmatprep.subr.bf16.mxu0 %v7446_v7  ;;  %v7474_v58 = vmax.f32 %v7472_v20, %v7473_v56  ;;  %v5584_v52 = vld [vmem:[%s7379_s3 + $0x2a0] sm:$0xff]   ;;  %v7476_v10 = vld [vmem:[#allocation7_spill] sm:$0xff]  ;;  %v5590_v56 = vld [vmem:[%s7379_s3 + $0x2b8] sm:$0xff]  }
 0x1da   :  { %v1233_v42 = vadd.f32 %v6311_v39, %v1200_v13  ;;  %v1201_v53 = vmax.f32 %v7466_v35, %v1175_v9  ;;  %4973 = vmatpush3.bf16.msra.mxu1 %v5579_v21  ;;  %v7478_v27 = vmax.f32 %v7476_v10, %v7477_v26  ;;  %v7480_v13 = vld [vmem:[#allocation8_spill] sm:$0xff]  ;;  %v7481_v51 = vld [vmem:[#allocation18_spill] sm:$0xff]  ;;  %v7484_v30 = vld [vmem:[#allocation19_spill] sm:$0xff] }
 0x1db   :  { %v1231_v55 = vadd.f32 %v6311_v39, %v1198_v15  ;;  %v1199_v19 = vmax.f32 %v7469_v38, %v1173_v31  ;;  %4974 = vmatprep.subr.bf16.mxu1 %v7446_v7  ;;  %v7482_v9 = vmax.f32 %v7480_v13, %v7481_v51  ;;  %v7485_v15 = vmax.f32 %v7483_v11, %v7484_v30  ;;  %v7486_v38 = vld [vmem:[#allocation29_spill] sm:$0xff]  ;;  %v5594_v10 = vld [vmem:[%s7379_s3 + $0x308] sm:$0xff]   ;;  %v5601_v13 = vld [vmem:[%s7379_s3 + $0xc0] sm:$0xff]  }
 0x1dc   :  { %v1234_v32 = vadd.f32 %v6311_v39, %v1201_v53  ;;  %5147 = vmatpush3.bf16.msra.mxu0 %v5580_v3  ;;  %v1259_v59 = vmax.f32 %v1233_v42, 0.0  ;;  %v5585_v3 = vld [vmem:[%s7379_s3 + $0x80] sm:$0xff]   ;;  %v5586_v42 = vld [vmem:[%s7379_s3 + $0x2a8] sm:$0xff]   ;;  %v5607_v11 = vld [vmem:[%s7379_s3 + $0xd8] sm:$0xff]  }
 0x1dd   :  { %v1232_v29 = vadd.f32 %v6311_v39, %v1199_v19  ;;  %v4932_v6 = vpop.f32.mrb[116].mxu0  ;;  %5148 = vmatprep.subr.bf16.mxu0 %v7446_v7  ;;  %v1257_v43 = vmax.f32 %v1231_v55, 0.0  ;;  %v5587_v55 = vld [vmem:[%s7379_s3 + $0x88] sm:$0xff]   ;;  %v5608_v30 = vld [vmem:[%s7379_s3 + $0x380] sm:$0xff]  }
 0x1de   :  { %v1260_v54 = vmax.f32 %v1234_v32, 0.0  ;;  %v1178_v36 = vmax.f32 %v7470_v60, %v4932_v6  ;;  %4975 = vmatpush3.bf16.msra.mxu1 %v5581_v44  ;;  %v1089_v41 = vpop.f32.mrb[117].mxu0  ;;  %v5595_v26 = vld [vmem:[%s7379_s3 + $0xa8] sm:$0xff]  }
 0x1df   :  { %v1258_v61 = vmax.f32 %v1232_v29, 0.0  ;;  %v1176_v8 = vmax.f32 %v7471_v22, %v1089_v41  ;;  %v4933_v18 = vpop.f32.mrb[118].mxu0  ;;  %4976 = vmatprep.subr.bf16.mxu1 %v7446_v7  ;;  %v5588_v29 = vld [vmem:[%s7379_s3 + $0x2b0] sm:$0xff]   ;;  %v7490_v41 = vld [vmem:[#allocation30_spill] sm:$0xff]  ;;  %v7491_v22 = vld [vmem:[#allocation11_spill] sm:$0xff] }
 0x1e0   :  { %v6476_v46 = vpack.c.bf16 %v1260_v54, %v1259_v59  ;;  %v1204_v21 = vmax.f32 %v7474_v58, %v1178_v36  ;;  %v1179_v62 = vmax.f32 %v7475_v1, %v4933_v18  ;;  %5149 = vmatpush3.bf16.msra.mxu0 %v5582_v5  ;;  %v1092_v49 = vpop.f32.mrb[119].mxu0  ;;  %v7487_v59 = vld [vmem:[#allocation10_spill] sm:$0xff]  ;;  %v7488_v54 = vld [vmem:[#allocation20_spill] sm:$0xff]  ;;  %v5602_v51 = vld [vmem:[%s7379_s3 + $0x328] sm:$0xff]  }
 0x1e1   :  { %v6485_v63 = vpack.c.bf16 %v1258_v61, %v1257_v43  ;;  %v1202_v45 = vmax.f32 %v7478_v27, %v1176_v8  ;;  %v1177_v47 = vmax.f32 %v7479_v24, %v1092_v49  ;;  %5150 = vmatprep.subr.bf16.mxu0 %v7446_v7  ;;  %v7489_v60 = vmax.f32 %v7487_v59, %v7488_v54  ;;  %v5589_v43 = vld [vmem:[%s7379_s3 + $0x90] sm:$0xff]   ;;  %v7492_v8 = vld [vmem:[#allocation21_spill] sm:$0xff]  ;;  %v5592_v49 = vld [vmem:[%s7379_s3 + $0x300] sm:$0xff]  }
 0x1e2   :  { %v1237_v40 = vadd.f32 %v6311_v39, %v1204_v21  ;;  %v1205_v2 = vmax.f32 %v7482_v9, %v1179_v62  ;;  %4977 = vmatpush3.bf16.msra.mxu1 %v5583_v17  ;;  %v7493_v18 = vmax.f32 %v7491_v22, %v7492_v8  ;;  %v5591_v21 = vld [vmem:[%s7379_s3 + $0x98] sm:$0xff]   ;;  %v5596_v27 = vld [vmem:[%s7379_s3 + $0x310] sm:$0xff]   ;;  %v5603_v9 = vld [vmem:[%s7379_s3 + $0xc8] sm:$0xff]  }
 0x1e3   :  { %v1235_v4 = vadd.f32 %v6311_v39, %v1202_v45  ;;  %v1203_v12 = vmax.f32 %v7485_v15, %v1177_v47  ;;  %4982 = vmatprep.subr.bf16.mxu1 %v7446_v7  ;;  %v5597_v45 = vld [vmem:[%s7379_s3 + $0xb0] sm:$0xff]   ;;  %v5598_v24 = vld [vmem:[%s7379_s3 + $0x318] sm:$0xff]   ;;  %v5609_v15 = vld [vmem:[%s7379_s3 + $0xe0] sm:$0xff]  }
 0x1e4   :  { %v1238_v31 = vadd.f32 %v6311_v39, %v1205_v2  ;;  %5151 = vmatpush3.bf16.msra.mxu0 %v5584_v52  ;;  %v1263_v35 = vmax.f32 %v1237_v40, 0.0  ;;  %v5599_v47 = vld [vmem:[%s7379_s3 + $0xb8] sm:$0xff]   ;;  %v5600_v40 = vld [vmem:[%s7379_s3 + $0x320] sm:$0xff]   ;;  %v5604_v2 = vld [vmem:[%s7379_s3 + $0x330] sm:$0xff]  }
 0x1e5   :  { %v1236_v50 = vadd.f32 %v6311_v39, %v1203_v12  ;;  %4979 = vmatmul.mubr.bf16.vlgmr.msra.gmra.mrb[4].mxu1 %v6338_v33  ;;  %v4936_v14 = vpop.f32.mrb[120].mxu0  ;;  %5152 = vmatprep.subr.bf16.mxu0 %v7446_v7  ;;  %v1261_v23 = vmax.f32 %v1235_v4, 0.0  ;;  %v5606_v4 = vld [vmem:[%s7379_s3 + $0x338] sm:$0xff]   ;;  %v5610_v12 = vld [vmem:[%s7379_s3 + $0x388] sm:$0xff]  }
 0x1e6   :  { %v1264_v53 = vmax.f32 %v1238_v31, 0.0  ;;  %4983 = vmatpush3.bf16.msra.mxu1 %v5585_v3  ;;  %v1105_v44 = vpop.f32.mrb[121].mxu0  ;;  %4998 = vmatprep.mubr.msk.bf16.mxu1 %vm5777_vm0, %v7446_v7  ;;  %v5605_v3 = vld [vmem:[%s7379_s3 + $0xd0] sm:$0xff]   ;;  %v5611_v31 = vld [vmem:[%s7379_s3 + $0xe8] sm:$0xff]   ;;  %v5614_v14 = vld [vmem:[%s7379_s3 + $0x398] sm:$0xff]  }
 0x1e7   :  { %v1262_v16 = vmax.f32 %v1236_v50, 0.0  ;;  %v1180_v19 = vmax.f32 %v7486_v38, %v1105_v44  ;;  %v4937_v32 = vpop.f32.mrb[122].mxu0  ;;  %4984 = vmatprep.subr.bf16.mxu1 %v7446_v7  ;;  %v5613_v50 = vld [vmem:[%s7379_s3 + $0xf0] sm:$0xff]   ;;  %v5616_v44 = vld [vmem:[%s7379_s3 + $0x3a0] sm:$0xff]   ;;  %v5622_v59 = vld [vmem:[%s7379_s3 + $0x3b8] sm:$0xff]  }
 0x1e8   :  { %v6518_v33 = vpack.c.bf16 %v1264_v53, %v1263_v35  ;;  %5153 = vmatpush3.bf16.msra.mxu0 %v5586_v42  ;;  %v1108_v5 = vpop.f32.mrb[123].mxu0  ;;  %v5612_v42 = vld [vmem:[%s7379_s3 + $0x390] sm:$0xff]   ;;  %v5615_v35 = vld [vmem:[%s7379_s3 + $0xf8] sm:$0xff]   ;;  %v5618_v32 = vld [vmem:[%s7379_s3 + $0x3a8] sm:$0xff]  }
 0x1e9   :  { %v6523_v6 = vpack.c.bf16 %v1262_v16, %v1261_v23  ;;  %v1206_v36 = vmax.f32 %v7489_v60, %v1180_v19  ;;  %v1181_v17 = vmax.f32 %v7490_v41, %v1108_v5  ;;  %5154 = vmatprep.subr.bf16.mxu0 %v7446_v7  ;;  %v5617_v16 = vld [vmem:[%s7379_s3 + $0x100] sm:$0xff]   ;;  %v1613_v19 = vrot.slane %v6329_v25, 4  ;;  %v5619_v5 = vld [vmem:[%s7379_s3 + $0x108] sm:$0xff]   ;;  %v5623_v54 = vld [vmem:[%s7379_s3 + $0x118] sm:$0xff]  }
 0x1ea   :  { %4985 = vmatpush3.bf16.msra.mxu1 %v5587_v55  ;;  %v5624_v60 = vld [vmem:[%s7379_s3 + $0x400] sm:$0xff]   ;;  %v5626_v41 = vld [vmem:[%s7379_s3 + $0x408] sm:$0xff]   ;;  %v5630_v22 = vld [vmem:[%s7379_s3 + $0x418] sm:$0xff]  }
 0x1eb   :  { %v1239_v61 = vadd.f32 %v6311_v39, %v1206_v36  ;;  %v1207_v20 = vmax.f32 %v7493_v18, %v1181_v17  ;;  %4986 = vmatprep.subr.bf16.mxu1 %v7446_v7  ;;  %v5625_v36 = vld [vmem:[%s7379_s3 + $0x120] sm:$0xff]   ;;  %v5627_v17 = vld [vmem:[%s7379_s3 + $0x128] sm:$0xff]   ;;  %v5631_v8 = vld [vmem:[%s7379_s3 + $0x138] sm:$0xff]  }
 0x1ec   :  { %5155 = vmatpush3.bf16.msra.mxu0 %v5588_v29  ;;  %v5621_v29 = vld [vmem:[%s7379_s3 + $0x110] sm:$0xff]   ;;  %v5632_v18 = vld [vmem:[%s7379_s3 + $0x420] sm:$0xff]  }
 0x1ed   :  { %v1240_v58 = vadd.f32 %v6311_v39, %v1207_v20  ;;  %5156 = vmatprep.subr.bf16.mxu0 %v7446_v7  ;;  %v1265_v1 = vmax.f32 %v1239_v61, 0.0  ;;  %v5593_v39 = vld [vmem:[%s7379_s3 + $0xa0] sm:$0xff]   ;;  %v5629_v61 = vld [vmem:[%s7379_s3 + $0x130] sm:$0xff]  }
 0x1ee   :  { %4987 = vmatpush3.bf16.msra.mxu1 %v5589_v43  ;;  %v5628_v43 = vld [vmem:[%s7379_s3 + $0x410] sm:$0xff]   ;;  %v5633_v20 = vld [vmem:[%s7379_s3 + $0x140] sm:$0xff]  }
 0x1ef   :  { %v1266_v62 = vmax.f32 %v1240_v58, 0.0  ;;  %4988 = vmatprep.subr.bf16.mxu1 %v7446_v7  ;;  %v5635_v58 = vld [vmem:[%s7379_s3 + $0x148] sm:$0xff]  }
 0x1f0   :  { %5157 = vmatpush3.bf16.msra.mxu0 %v5590_v56  ;;  %v5634_v56 = vld [vmem:[%s7379_s3 + $0x428] sm:$0xff]  }
 0x1f1   :  { %v6550_v52 = vpack.c.bf16 %v1266_v62, %v1265_v1  ;;  %5182 = vmatprep.subr.bf16.mxu0 %v7446_v7  ;;  %v5637_v1 = vld [vmem:[%s7379_s3 + $0x150] sm:$0xff]   ;;  %v5638_v62 = vld [vmem:[%s7379_s3 + $0x438] sm:$0xff]  }
 0x1f2   :  { %4989 = vmatpush3.bf16.msra.mxu1 %v5591_v21  ;;  %v5636_v21 = vld [vmem:[%s7379_s3 + $0x430] sm:$0xff]  }
 0x1f3   :  { %5159 = vmatmul.mubr.bf16.vlgmr.msra.gmra.mrb[132].mxu0 %v6394_v34  ;;  %4990 = vmatprep.subr.bf16.mxu1 %v7446_v7 }
 0x1f4   :  { %5183 = vmatpush3.bf16.msra.mxu0 %v5592_v49  ;;  %5198 = vmatprep.mubr.msk.bf16.mxu0 %vm5777_vm0, %v7446_v7  ;;  %v5639_v49 = vld [vmem:[%s7379_s3 + $0x158] sm:$0xff]  }
 0x1f5   :  { %5184 = vmatprep.subr.bf16.mxu0 %v7446_v7 }
 0x1f6   :  { %4991 = vmatpush3.bf16.msra.mxu1 %v5593_v39  ;;  %v5640_v39 = vld [vmem:[%s7379_s3 + $0x480] sm:$0xff]  }
 0x1f7   :  { %4992 = vmatprep.subr.bf16.mxu1 %v7446_v7 }
 0x1f8   :  { %5185 = vmatpush3.bf16.msra.mxu0 %v5594_v10  ;;  %v5641_v10 = vld [vmem:[%s7379_s3 + $0x160] sm:$0xff]  }
 0x1f9   :  { %5186 = vmatprep.subr.bf16.mxu0 %v7446_v7 }
 0x1fa   :  { %4993 = vmatpush3.bf16.msra.mxu1 %v5595_v26  ;;  %v5642_v26 = vld [vmem:[%s7379_s3 + $0x488] sm:$0xff]  }
 0x1fb   :  { %4994 = vmatprep.subr.bf16.mxu1 %v7446_v7 }
 0x1fc   :  { %5187 = vmatpush3.bf16.msra.mxu0 %v5596_v27  ;;  %v5643_v27 = vld [vmem:[%s7379_s3 + $0x168] sm:$0xff]  }
 0x1fd   :  { %5188 = vmatprep.subr.bf16.mxu0 %v7446_v7 }
 0x1fe   :  { %4995 = vmatpush3.bf16.msra.mxu1 %v5597_v45  ;;  %v5644_v45 = vld [vmem:[%s7379_s3 + $0x490] sm:$0xff]  }
 0x1ff   :  { %4996 = vmatprep.subr.bf16.mxu1 %v7446_v7 }
 0x200   :  { %5189 = vmatpush3.bf16.msra.mxu0 %v5598_v24  ;;  %v5645_v24 = vld [vmem:[%s7379_s3 + $0x170] sm:$0xff]  }
 0x201   :  { %5190 = vmatprep.subr.bf16.mxu0 %v7446_v7 }
 0x202   :  { %4997 = vmatpush3.bf16.msra.mxu1 %v5599_v47  ;;  %v5646_v47 = vld [vmem:[%s7379_s3 + $0x498] sm:$0xff]  }
 0x203   :  { %5002 = vmatprep.subr.bf16.mxu1 %v7446_v7 }
 0x204   :  { %5191 = vmatpush3.bf16.msra.mxu0 %v5600_v40  ;;  %v4940_v53 = vpop.f32.mrb[124].mxu0  ;;  %v5647_v40 = vld [vmem:[%s7379_s3 + $0x178] sm:$0xff]  }
 0x205   :  { %4999 = vmatmul.mubr.bf16.vlgmr.msra.gmra.mrb[8].mxu1 %v6329_v25  ;;  %5192 = vmatprep.subr.bf16.mxu0 %v7446_v7  ;;  %v1119_v55 = vpop.f32.mrb[125].mxu0  ;;  %v5620_v25 = vld [vmem:[%s7379_s3 + $0x3b0] sm:$0xff]   ;;  %v5663_v53 = vld [vmem:[%s7379_s3 + $0x1b8] sm:$0xff]  }
 0x206   :  { %5003 = vmatpush3.bf16.msra.mxu1 %v5601_v13  ;;  %5018 = vmatprep.mubr.msk.bf16.mxu1 %vm5777_vm0, %v7446_v7  ;;  %v4941_v23 = vpop.f32.mrb[126].mxu0  ;;  %v5648_v13 = vld [vmem:[%s7379_s3 + $0x4a0] sm:$0xff]  }
 0x207   :  { %5004 = vmatprep.subr.bf16.mxu1 %v7446_v7  ;;  %v1121_v38 = vpop.f32.mrb[127].mxu0  ;;  %v5665_v55 = vld [vmem:[%s7379_s3 + $0x1c0] sm:$0xff]   ;;  %v5666_v23 = vld [vmem:[%s7379_s3 + $0x528] sm:$0xff]  }
 0x208   :  { %5193 = vmatpush3.bf16.msra.mxu0 %v5602_v51  ;;  %v5649_v51 = vld [vmem:[%s7379_s3 + $0x180] sm:$0xff]   ;;  %v5668_v38 = vld [vmem:[%s7379_s3 + $0x530] sm:$0xff]  }
 0x209   :  { %5194 = vmatprep.subr.bf16.mxu0 %v7446_v7 }
 0x20a   :  { %5005 = vmatpush3.bf16.msra.mxu1 %v5603_v9  ;;  %v1826_v9 = vrot.slane %v6368_v48, 4 }
 0x20b   :  { %5006 = vmatprep.subr.bf16.mxu1 %v7446_v7 }
 0x20c   :  { %5195 = vmatpush3.bf16.msra.mxu0 %v5604_v2  ;;  %v5650_v2 = vld [vmem:[%s7379_s3 + $0x4a8] sm:$0xff]  }
 0x20d   :  { %5196 = vmatprep.subr.bf16.mxu0 %v7446_v7 }
 0x20e   :  { %5007 = vmatpush3.bf16.msra.mxu1 %v5605_v3  ;;  %v5651_v3 = vld [vmem:[%s7379_s3 + $0x188] sm:$0xff]  }
 0x20f   :  { %5008 = vmatprep.subr.bf16.mxu1 %v7446_v7 }
 0x210   :  { %5197 = vmatpush3.bf16.msra.mxu0 %v5606_v4  ;;  %v5653_v4 = vld [vmem:[%s7379_s3 + $0x190] sm:$0xff]  }
 0x211   :  { %5222 = vmatprep.subr.bf16.mxu0 %v7446_v7 }
 0x212   :  { %5009 = vmatpush3.bf16.msra.mxu1 %v5607_v11  ;;  %v5654_v11 = vld [vmem:[%s7379_s3 + $0x4b8] sm:$0xff]  }
 0x213   :  { %5199 = vmatmul.mubr.bf16.vlgmr.msra.gmra.mrb[136].mxu0 %v6445_v37  ;;  %5010 = vmatprep.subr.bf16.mxu1 %v7446_v7 }
 0x214   :  { %5223 = vmatpush3.bf16.msra.mxu0 %v5608_v30  ;;  %5238 = vmatprep.mubr.msk.bf16.mxu0 %vm5777_vm0, %v7446_v7  ;;  %v5655_v30 = vld [vmem:[%s7379_s3 + $0x198] sm:$0xff]  }
 0x215   :  { %5224 = vmatprep.subr.bf16.mxu0 %v7446_v7 }
 0x216   :  { %5011 = vmatpush3.bf16.msra.mxu1 %v5609_v15  ;;  %v5656_v15 = vld [vmem:[%s7379_s3 + $0x500] sm:$0xff]  }
 0x217   :  { %5012 = vmatprep.subr.bf16.mxu1 %v7446_v7 }
 0x218   :  { %5225 = vmatpush3.bf16.msra.mxu0 %v5610_v12  ;;  %v5657_v12 = vld [vmem:[%s7379_s3 + $0x1a0] sm:$0xff]  }
 0x219   :  { %5226 = vmatprep.subr.bf16.mxu0 %v7446_v7 }
 0x21a   :  { %5013 = vmatpush3.bf16.msra.mxu1 %v5611_v31  ;;  %v5658_v31 = vld [vmem:[%s7379_s3 + $0x508] sm:$0xff]  }
 0x21b   :  { %5014 = vmatprep.subr.bf16.mxu1 %v7446_v7 }
 0x21c   :  { %5227 = vmatpush3.bf16.msra.mxu0 %v5612_v42  ;;  %v5659_v42 = vld [vmem:[%s7379_s3 + $0x1a8] sm:$0xff]  }
 0x21d   :  { %5228 = vmatprep.subr.bf16.mxu0 %v7446_v7 }
 0x21e   :  { %5015 = vmatpush3.bf16.msra.mxu1 %v5613_v50  ;;  %v5660_v50 = vld [vmem:[%s7379_s3 + $0x510] sm:$0xff]  }
 0x21f   :  { %5016 = vmatprep.subr.bf16.mxu1 %v7446_v7 }
 0x220   :  { %5229 = vmatpush3.bf16.msra.mxu0 %v5614_v14  ;;  %v5661_v14 = vld [vmem:[%s7379_s3 + $0x1b0] sm:$0xff]  }
 0x221   :  { %5230 = vmatprep.subr.bf16.mxu0 %v7446_v7 }
 0x222   :  { %5017 = vmatpush3.bf16.msra.mxu1 %v5615_v35  ;;  %v5662_v35 = vld [vmem:[%s7379_s3 + $0x518] sm:$0xff]  }
 0x223   :  { %5022 = vmatprep.subr.bf16.mxu1 %v7446_v7 }
 0x224   :  { %5231 = vmatpush3.bf16.msra.mxu0 %v5616_v44  ;;  %v5664_v44 = vld [vmem:[%s7379_s3 + $0x520] sm:$0xff]  }
 0x225   :  { %5019 = vmatmul.mubr.bf16.vlgmr.msra.gmra.mrb[12].mxu1 %v1613_v19  ;;  %5232 = vmatprep.subr.bf16.mxu0 %v7446_v7  ;;  %v5669_v19 = vld [vmem:[%s7379_s3 + $0x1d0] sm:$0xff]  }
 0x226   :  { %5023 = vmatpush3.bf16.msra.mxu1 %v5617_v16  ;;  %5038 = vmatprep.mubr.msk.bf16.mxu1 %vm5777_vm0, %v7446_v7  ;;  %v5667_v16 = vld [vmem:[%s7379_s3 + $0x1c8] sm:$0xff]  }
 0x227   :  { %5024 = vmatprep.subr.bf16.mxu1 %v7446_v7 }
 0x228   :  { %5233 = vmatpush3.bf16.msra.mxu0 %v5618_v32  ;;  %v5670_v32 = vld [vmem:[%s7379_s3 + $0x538] sm:$0xff]  }
 0x229   :  { %5234 = vmatprep.subr.bf16.mxu0 %v7446_v7 }
 0x22a   :  { %5025 = vmatpush3.bf16.msra.mxu1 %v5619_v5  ;;  %v5671_v5 = vld [vmem:[%s7379_s3 + $0x1d8] sm:$0xff]  }
 0x22b   :  { %5026 = vmatprep.subr.bf16.mxu1 %v7446_v7 }
 0x22c   :  { %5235 = vmatpush3.bf16.msra.mxu0 %v5620_v25  ;;  %v5672_v25 = vld [vmem:[%s7379_s3 + $0x580] sm:$0xff]  }
 0x22d   :  { %5236 = vmatprep.subr.bf16.mxu0 %v7446_v7 }
 0x22e   :  { %5027 = vmatpush3.bf16.msra.mxu1 %v5621_v29  ;;  %v5673_v29 = vld [vmem:[%s7379_s3 + $0x1e0] sm:$0xff]  }
 0x22f   :  { %5028 = vmatprep.subr.bf16.mxu1 %v7446_v7 }
 0x230   :  { %5237 = vmatpush3.bf16.msra.mxu0 %v5622_v59  ;;  %v5674_v59 = vld [vmem:[%s7379_s3 + $0x588] sm:$0xff]  }
 0x231   :  { %5262 = vmatprep.subr.bf16.mxu0 %v7446_v7 }
 0x232   :  { %5029 = vmatpush3.bf16.msra.mxu1 %v5623_v54  ;;  %v5675_v54 = vld [vmem:[%s7379_s3 + $0x1e8] sm:$0xff]  }
 0x233   :  { %5239 = vmatmul.mubr.bf16.vlgmr.msra.gmra.mrb[140].mxu0 %v6436_v28  ;;  %5030 = vmatprep.subr.bf16.mxu1 %v7446_v7 }
 0x234   :  { %5263 = vmatpush3.bf16.msra.mxu0 %v5624_v60  ;;  %5278 = vmatprep.mubr.msk.bf16.mxu0 %vm5777_vm0, %v7446_v7 }
 0x235   :  { %5264 = vmatprep.subr.bf16.mxu0 %v7446_v7 }
 0x236   :  { %5031 = vmatpush3.bf16.msra.mxu1 %v5625_v36  ;;  %v5676_v36 = vld [vmem:[%s7379_s3 + $0x590] sm:$0xff]  }
 0x237   :  { %5032 = vmatprep.subr.bf16.mxu1 %v7446_v7 }
 0x238   :  { %5265 = vmatpush3.bf16.msra.mxu0 %v5626_v41 }
 0x239   :  { %5266 = vmatprep.subr.bf16.mxu0 %v7446_v7 }
 0x23a   :  { %5033 = vmatpush3.bf16.msra.mxu1 %v5627_v17 }
 0x23b   :  { %5034 = vmatprep.subr.bf16.mxu1 %v7446_v7 }
 0x23c   :  { %5267 = vmatpush3.bf16.msra.mxu0 %v5628_v43  ;;  %v5677_v43 = vld [vmem:[%s7379_s3 + $0x1f0] sm:$0xff]  }
 0x23d   :  { %5268 = vmatprep.subr.bf16.mxu0 %v7446_v7 }
 0x23e   :  { %5035 = vmatpush3.bf16.msra.mxu1 %v5629_v61 }
 0x23f   :  { %5036 = vmatprep.subr.bf16.mxu1 %v7446_v7 }
 0x240   :  { %5269 = vmatpush3.bf16.msra.mxu0 %v5630_v22  ;;  %v5678_v22 = vld [vmem:[%s7379_s3 + $0x598] sm:$0xff]  }
 0x241   :  { %5270 = vmatprep.subr.bf16.mxu0 %v7446_v7 }
 0x242   :  { %5037 = vmatpush3.bf16.msra.mxu1 %v5631_v8  ;;  %v5679_v8 = vld [vmem:[%s7379_s3 + $0x1f8] sm:$0xff]  }
 0x243   :  { %5042 = vmatprep.subr.bf16.mxu1 %v7446_v7 }
 0x244   :  { %5271 = vmatpush3.bf16.msra.mxu0 %v5632_v18  ;;  %v5680_v18 = vld [vmem:[%s7379_s3 + $0x5a0] sm:$0xff]  }
 0x245   :  { %5039 = vmatmul.mubr.bf16.vlgmr.msra.gmra.mrb[16].mxu1 %v6368_v48  ;;  %5272 = vmatprep.subr.bf16.mxu0 %v7446_v7  ;;  %v5652_v48 = vld [vmem:[%s7379_s3 + $0x4b0] sm:$0xff]  }
 0x246   :  { %5043 = vmatpush3.bf16.msra.mxu1 %v5633_v20  ;;  %5058 = vmatprep.mubr.msk.bf16.mxu1 %vm5777_vm0, %v7446_v7  ;;  %v5681_v20 = vld [vmem:[%s7379_s3 + $0x240] sm:$0xff]  }
 0x247   :  { %5044 = vmatprep.subr.bf16.mxu1 %v7446_v7 }
 0x248   :  { %5273 = vmatpush3.bf16.msra.mxu0 %v5634_v56  ;;  %v2039_v56 = vrot.slane %v6362_v0, 4 }
 0x249   :  { %5274 = vmatprep.subr.bf16.mxu0 %v7446_v7 }
 0x24a   :  { %5045 = vmatpush3.bf16.msra.mxu1 %v5635_v58  ;;  %v5682_v58 = vld [vmem:[%s7379_s3 + $0x5a8] sm:$0xff]  }
 0x24b   :  { %5046 = vmatprep.subr.bf16.mxu1 %v7446_v7 }
 0x24c   :  { %5275 = vmatpush3.bf16.msra.mxu0 %v5636_v21 }
 0x24d   :  { %5276 = vmatprep.subr.bf16.mxu0 %v7446_v7 }
 0x24e   :  { %5047 = vmatpush3.bf16.msra.mxu1 %v5637_v1  ;;  %v5683_v1 = vld [vmem:[%s7379_s3 + $0x248] sm:$0xff]  }
 0x24f   :  { %5048 = vmatprep.subr.bf16.mxu1 %v7446_v7 }
 0x250   :  { %5277 = vmatpush3.bf16.msra.mxu0 %v5638_v62 }
 0x251   :  { %5302 = vmatprep.subr.bf16.mxu0 %v7446_v7 }
 0x252   :  { %5049 = vmatpush3.bf16.msra.mxu1 %v5639_v49  ;;  %v5684_v49 = vld [vmem:[%s7379_s3 + $0x5b0] sm:$0xff]  }
 0x253   :  { %5279 = vmatmul.mubr.bf16.vlgmr.msra.gmra.mrb[144].mxu0 %v6485_v63  ;;  %5050 = vmatprep.subr.bf16.mxu1 %v7446_v7 }
 0x254   :  { %5303 = vmatpush3.bf16.msra.mxu0 %v5640_v39  ;;  %5318 = vmatprep.mubr.msk.bf16.mxu0 %vm5777_vm0, %v7446_v7 }
 0x255   :  { %5304 = vmatprep.subr.bf16.mxu0 %v7446_v7 }
 0x256   :  { %5051 = vmatpush3.bf16.msra.mxu1 %v5641_v10  ;;  %v5685_v10 = vld [vmem:[%s7379_s3 + $0x250] sm:$0xff]  }
 0x257   :  { %5052 = vmatprep.subr.bf16.mxu1 %v7446_v7 }
 0x258   :  { %5305 = vmatpush3.bf16.msra.mxu0 %v5642_v26  ;;  %v5686_v26 = vld [vmem:[%s7379_s3 + $0x5b8] sm:$0xff]  }
 0x259   :  { %5306 = vmatprep.subr.bf16.mxu0 %v7446_v7 }
 0x25a   :  { %5053 = vmatpush3.bf16.msra.mxu1 %v5643_v27  ;;  %v5687_v27 = vld [vmem:[%s7379_s3 + $0x258] sm:$0xff]  }
 0x25b   :  { %5054 = vmatprep.subr.bf16.mxu1 %v7446_v7 }
 0x25c   :  { %5307 = vmatpush3.bf16.msra.mxu0 %v5644_v45  ;;  %v5688_v45 = vld [vmem:[%s7379_s3 + $0x600] sm:$0xff]  }
 0x25d   :  { %5308 = vmatprep.subr.bf16.mxu0 %v7446_v7 }
 0x25e   :  { %5055 = vmatpush3.bf16.msra.mxu1 %v5645_v24  ;;  %v5689_v24 = vld [vmem:[%s7379_s3 + $0x260] sm:$0xff]  }
 0x25f   :  { %5056 = vmatprep.subr.bf16.mxu1 %v7446_v7 }
 0x260   :  { %5309 = vmatpush3.bf16.msra.mxu0 %v5646_v47  ;;  %v5690_v47 = vld [vmem:[%s7379_s3 + $0x608] sm:$0xff]  }
 0x261   :  { %5310 = vmatprep.subr.bf16.mxu0 %v7446_v7 }
 0x262   :  { %5057 = vmatpush3.bf16.msra.mxu1 %v5647_v40  ;;  %v5691_v40 = vld [vmem:[%s7379_s3 + $0x268] sm:$0xff]  }
 0x263   :  { %5062 = vmatprep.subr.bf16.mxu1 %v7446_v7 }
 0x264   :  { %5311 = vmatpush3.bf16.msra.mxu0 %v5648_v13 }
 0x265   :  { %5059 = vmatmul.mubr.bf16.vlgmr.msra.gmra.mrb[20].mxu1 %v1826_v9  ;;  %5312 = vmatprep.subr.bf16.mxu0 %v7446_v7 }
 0x266   :  { %5063 = vmatpush3.bf16.msra.mxu1 %v5649_v51  ;;  %5078 = vmatprep.mubr.msk.bf16.mxu1 %vm5777_vm0, %v7446_v7  ;;  %v5692_v51 = vld [vmem:[%s7379_s3 + $0x610] sm:$0xff]  }
 0x267   :  { %5064 = vmatprep.subr.bf16.mxu1 %v7446_v7 }
 0x268   :  { %5313 = vmatpush3.bf16.msra.mxu0 %v5650_v2 }
 0x269   :  { %5314 = vmatprep.subr.bf16.mxu0 %v7446_v7 }
 0x26a   :  { %5065 = vmatpush3.bf16.msra.mxu1 %v5651_v3 }
 0x26b   :  { %5066 = vmatprep.subr.bf16.mxu1 %v7446_v7 }
 0x26c   :  { %5315 = vmatpush3.bf16.msra.mxu0 %v5652_v48  ;;  %v5693_v48 = vld [vmem:[%s7379_s3 + $0x270] sm:$0xff]  }
 0x26d   :  { %5316 = vmatprep.subr.bf16.mxu0 %v7446_v7 }
 0x26e   :  { %5067 = vmatpush3.bf16.msra.mxu1 %v5653_v4 }
 0x26f   :  { %5068 = vmatprep.subr.bf16.mxu1 %v7446_v7 }
 0x270   :  { %5317 = vmatpush3.bf16.msra.mxu0 %v5654_v11  ;;  %v5694_v11 = vld [vmem:[%s7379_s3 + $0x618] sm:$0xff]  }
 0x271   :  { %5342 = vmatprep.subr.bf16.mxu0 %v7446_v7 }
 0x272   :  { %5069 = vmatpush3.bf16.msra.mxu1 %v5655_v30  ;;  %v5695_v30 = vld [vmem:[%s7379_s3 + $0x278] sm:$0xff]  }
 0x273   :  { %5319 = vmatmul.mubr.bf16.vlgmr.msra.gmra.mrb[148].mxu0 %v6476_v46  ;;  %5070 = vmatprep.subr.bf16.mxu1 %v7446_v7 }
 0x274   :  { %5343 = vmatpush3.bf16.msra.mxu0 %v5656_v15  ;;  %5358 = vmatprep.mubr.msk.bf16.mxu0 %vm5777_vm0, %v7446_v7  ;;  %v5696_v15 = vld [vmem:[%s7379_s3 + $0x620] sm:$0xff]  }
 0x275   :  { %5344 = vmatprep.subr.bf16.mxu0 %v7446_v7 }
 0x276   :  { %5071 = vmatpush3.bf16.msra.mxu1 %v5657_v12  ;;  %v5697_v12 = vld [vmem:[%s7379_s3 + $0x2c0] sm:$0xff]  }
 0x277   :  { %5072 = vmatprep.subr.bf16.mxu1 %v7446_v7 }
 0x278   :  { %5345 = vmatpush3.bf16.msra.mxu0 %v5658_v31  ;;  %v2252_v31 = vrot.slane %v6403_v57, 4 }
 0x279   :  { %5346 = vmatprep.subr.bf16.mxu0 %v7446_v7 }
 0x27a   :  { %5073 = vmatpush3.bf16.msra.mxu1 %v5659_v42  ;;  %v5698_v42 = vld [vmem:[%s7379_s3 + $0x628] sm:$0xff]  }
 0x27b   :  { %5074 = vmatprep.subr.bf16.mxu1 %v7446_v7 }
 0x27c   :  { %5347 = vmatpush3.bf16.msra.mxu0 %v5660_v50 }
 0x27d   :  { %5348 = vmatprep.subr.bf16.mxu0 %v7446_v7 }
 0x27e   :  { %5075 = vmatpush3.bf16.msra.mxu1 %v5661_v14  ;;  %v5699_v14 = vld [vmem:[%s7379_s3 + $0x2c8] sm:$0xff]  }
 0x27f   :  { %5076 = vmatprep.subr.bf16.mxu1 %v7446_v7 }
 0x280   :  { %5349 = vmatpush3.bf16.msra.mxu0 %v5662_v35 }
 0x281   :  { %5350 = vmatprep.subr.bf16.mxu0 %v7446_v7 }
 0x282   :  { %5077 = vmatpush3.bf16.msra.mxu1 %v5663_v53  ;;  %v5700_v53 = vld [vmem:[%s7379_s3 + $0x630] sm:$0xff]  }
 0x283   :  { %5082 = vmatprep.subr.bf16.mxu1 %v7446_v7 }
 0x284   :  { %5351 = vmatpush3.bf16.msra.mxu0 %v5664_v44 }
 0x285   :  { %5079 = vmatmul.mubr.bf16.vlgmr.msra.gmra.mrb[24].mxu1 %v6362_v0  ;;  %5352 = vmatprep.subr.bf16.mxu0 %v7446_v7 }
 0x286   :  { %5083 = vmatpush3.bf16.msra.mxu1 %v5665_v55  ;;  %5098 = vmatprep.mubr.msk.bf16.mxu1 %vm5777_vm0, %v7446_v7  ;;  %v5701_v55 = vld [vmem:[%s7379_s3 + $0x2d0] sm:$0xff]  }
 0x287   :  { %5084 = vmatprep.subr.bf16.mxu1 %v7446_v7 }
 0x288   :  { %5353 = vmatpush3.bf16.msra.mxu0 %v5666_v23  ;;  %v5702_v23 = vld [vmem:[%s7379_s3 + $0x638] sm:$0xff]  }
 0x289   :  { %5354 = vmatprep.subr.bf16.mxu0 %v7446_v7 }
 0x28a   :  { %5085 = vmatpush3.bf16.msra.mxu1 %v5667_v16  ;;  %v5703_v16 = vld [vmem:[%s7379_s3 + $0x2d8] sm:$0xff]  }
 0x28b   :  { %5086 = vmatprep.subr.bf16.mxu1 %v7446_v7 }
 0x28c   :  { %5355 = vmatpush3.bf16.msra.mxu0 %v5668_v38  ;;  %v5704_v38 = vld [vmem:[%s7379_s3 + $0x2e0] sm:$0xff]  }
 0x28d   :  { %5356 = vmatprep.subr.bf16.mxu0 %v7446_v7 }
 0x28e   :  { %5087 = vmatpush3.bf16.msra.mxu1 %v5669_v19  ;;  %v5705_v19 = vld [vmem:[%s7379_s3 + $0x2e8] sm:$0xff]  }
 0x28f   :  { %5088 = vmatprep.subr.bf16.mxu1 %v7446_v7 }
 0x290   :  { %5357 = vmatpush3.bf16.msra.mxu0 %v5670_v32 }
 0x291   :  { %5382 = vmatprep.subr.bf16.mxu0 %v7446_v7 }
 0x292   :  { %5089 = vmatpush3.bf16.msra.mxu1 %v5671_v5 }
 0x293   :  { %5359 = vmatmul.mubr.bf16.vlgmr.msra.gmra.mrb[152].mxu0 %v6523_v6  ;;  %5090 = vmatprep.subr.bf16.mxu1 %v7446_v7 }
 0x294   :  { %5383 = vmatpush3.bf16.msra.mxu0 %v5672_v25  ;;  %5398 = vmatprep.mubr.msk.bf16.mxu0 %vm5777_vm0, %v7446_v7 }
 0x295   :  { %5384 = vmatprep.subr.bf16.mxu0 %v7446_v7 }
 0x296   :  { %5091 = vmatpush3.bf16.msra.mxu1 %v5673_v29 }
 0x297   :  { %5092 = vmatprep.subr.bf16.mxu1 %v7446_v7 }
 0x298   :  { %5385 = vmatpush3.bf16.msra.mxu0 %v5674_v59  ;;  %v6918_v60 = vpop.f32.mrb[0].mxu1 }
 0x299   :  { %v4960_v41 = vpop.f32.mrb[1].mxu1  ;;  %5386 = vmatprep.subr.bf16.mxu0 %v7446_v7 }
 0x29a   :  { %5093 = vmatpush3.bf16.msra.mxu1 %v5675_v54  ;;  %v1400_v17 = vpop.f32.mrb[2].mxu1  ;;  %v5707_v54 = vld [vmem:[%s7379_s3 + $0x2f8] sm:$0xff]  }
 0x29b   :  { %v4961_v61 = vpop.f32.mrb[3].mxu1  ;;  %5094 = vmatprep.subr.bf16.mxu1 %v7446_v7  ;;  %v5709_v17 = vld [vmem:[%s7379_s3 + $0x348] sm:$0xff]  }
 0x29c   :  { %5387 = vmatpush3.bf16.msra.mxu0 %v5676_v36  ;;  %v2465_v36 = vrot.slane %v6394_v34, 4  ;;  %v5710_v34 = vld [vmem:[%s7379_s3 + $0x350] sm:$0xff]  }
 0x29d   :  { %5388 = vmatprep.subr.bf16.mxu0 %v7446_v7 }
 0x29e   :  { %5095 = vmatpush3.bf16.msra.mxu1 %v5677_v43 }
 0x29f   :  { %5096 = vmatprep.subr.bf16.mxu1 %v7446_v7 }
 0x2a0   :  { %5389 = vmatpush3.bf16.msra.mxu0 %v5678_v22 }
 0x2a1   :  { %5390 = vmatprep.subr.bf16.mxu0 %v7446_v7 }
 0x2a2   :  { %5097 = vmatpush3.bf16.msra.mxu1 %v5679_v8  ;;  %v5711_v8 = vld [vmem:[%s7379_s3 + $0x358] sm:$0xff]  }
 0x2a3   :  { %5122 = vmatprep.subr.bf16.mxu1 %v7446_v7 }
 0x2a4   :  { %5391 = vmatpush3.bf16.msra.mxu0 %v5680_v18  ;;  %v5712_v18 = vld [vmem:[%s7379_s3 + $0x360] sm:$0xff]  }
 0x2a5   :  { %5099 = vmatmul.mubr.bf16.vlgmr.msra.gmra.mrb[28].mxu1 %v2039_v56  ;;  %5392 = vmatprep.subr.bf16.mxu0 %v7446_v7 }
 0x2a6   :  { %5123 = vmatpush3.bf16.msra.mxu1 %v5681_v20  ;;  %v6949_v21 = vpop.f32.mrb[128].mxu0  ;;  %5138 = vmatprep.mubr.msk.bf16.mxu1 %vm5777_vm0, %v7446_v7  ;;  %v5713_v20 = vld [vmem:[%s7379_s3 + $0x368] sm:$0xff]  }
 0x2a7   :  { %v5120_v0 = vpop.f32.mrb[129].mxu0  ;;  %5124 = vmatprep.subr.bf16.mxu1 %v7446_v7 }
 0x2a8   :  { %5393 = vmatpush3.bf16.msra.mxu0 %v5682_v58  ;;  %v2231_v62 = vpop.f32.mrb[130].mxu0 }
 0x2a9   :  { %v5121_v39 = vpop.f32.mrb[131].mxu0  ;;  %5394 = vmatprep.subr.bf16.mxu0 %v7446_v7  ;;  %v5714_v62 = vld [vmem:[%s7379_s3 + $0x370] sm:$0xff]  }
 0x2aa   :  { %5125 = vmatpush3.bf16.msra.mxu1 %v5683_v1  ;;  %v5715_v39 = vld [vmem:[%s7379_s3 + $0x378] sm:$0xff]  }
 0x2ab   :  { %5126 = vmatprep.subr.bf16.mxu1 %v7446_v7 }
 0x2ac   :  { %5395 = vmatpush3.bf16.msra.mxu0 %v5684_v49 }
 0x2ad   :  { %5396 = vmatprep.subr.bf16.mxu0 %v7446_v7 }
 0x2ae   :  { %5127 = vmatpush3.bf16.msra.mxu1 %v5685_v10  ;;  %v5716_v10 = vld [vmem:[%s7379_s3 + $0x3c0] sm:$0xff]  }
 0x2af   :  { %5128 = vmatprep.subr.bf16.mxu1 %v7446_v7 }
 0x2b0   :  { %5397 = vmatpush3.bf16.msra.mxu0 %v5686_v26  ;;  %v2678_v26 = vrot.slane %v6445_v37, 4  ;;  %v5718_v37 = vld [vmem:[%s7379_s3 + $0x3d0] sm:$0xff]  }
 0x2b1   :  { %5422 = vmatprep.subr.bf16.mxu0 %v7446_v7 }
 0x2b2   :  { %5129 = vmatpush3.bf16.msra.mxu1 %v5687_v27 }
 0x2b3   :  { %5399 = vmatmul.mubr.bf16.vlgmr.msra.gmra.mrb[156].mxu0 %v6518_v33  ;;  %5130 = vmatprep.subr.bf16.mxu1 %v7446_v7 }
 0x2b4   :  { %5423 = vmatpush3.bf16.msra.mxu0 %v5688_v45  ;;  %5438 = vmatprep.mubr.msk.bf16.mxu0 %vm5777_vm0, %v7446_v7  ;;  %v5717_v45 = vld [vmem:[%s7379_s3 + $0x3c8] sm:$0xff]  }
 0x2b5   :  { %5424 = vmatprep.subr.bf16.mxu0 %v7446_v7 }
 0x2b6   :  { %5131 = vmatpush3.bf16.msra.mxu1 %v5689_v24 }
 0x2b7   :  { %5132 = vmatprep.subr.bf16.mxu1 %v7446_v7 }
 0x2b8   :  { %v1485_v13 = vpop.f32.mrb[4].mxu1  ;;  %5425 = vmatpush3.bf16.msra.mxu0 %v5690_v47 }
 0x2b9   :  { %v1486_v9 = vadd.f32 %v1485_v13, %v6918_v60  ;;  %v4980_v2 = vpop.f32.mrb[5].mxu1  ;;  %5426 = vmatprep.subr.bf16.mxu0 %v7446_v7  ;;  %v5708_v60 = vld [vmem:[%s7379_s3 + $0x340] sm:$0xff]   ;;  %v5719_v13 = vld [vmem:[%s7379_s3 + $0x3d8] sm:$0xff]  }
 0x2ba   :  { %v1488_v3 = vpop.f32.mrb[6].mxu1  ;;  %5133 = vmatpush3.bf16.msra.mxu1 %v5691_v40 }
 0x2bb   :  { %v4981_v4 = vpop.f32.mrb[7].mxu1  ;;  %5134 = vmatprep.subr.bf16.mxu1 %v7446_v7 }
 0x2bc   :  { %5427 = vmatpush3.bf16.msra.mxu0 %v5692_v51  ;;  %v5720_v51 = vld [vmem:[%s7379_s3 + $0x3e0] sm:$0xff]  }
 0x2bd   :  { %5428 = vmatprep.subr.bf16.mxu0 %v7446_v7 }
 0x2be   :  { %5135 = vmatpush3.bf16.msra.mxu1 %v5693_v48 }
 0x2bf   :  { %5136 = vmatprep.subr.bf16.mxu1 %v7446_v7 }
 0x2c0   :  { %5429 = vmatpush3.bf16.msra.mxu0 %v5694_v11  ;;  %v5722_v11 = vld [vmem:[%s7379_s3 + $0x3f0] sm:$0xff]  }
 0x2c1   :  { %5430 = vmatprep.subr.bf16.mxu0 %v7446_v7 }
 0x2c2   :  { %5137 = vmatpush3.bf16.msra.mxu1 %v5695_v30 }
 0x2c3   :  { %5162 = vmatprep.subr.bf16.mxu1 %v7446_v7 }
 0x2c4   :  { %5431 = vmatpush3.bf16.msra.mxu0 %v5696_v15  ;;  %v5723_v15 = vld [vmem:[%s7379_s3 + $0x3f8] sm:$0xff]  }
 0x2c5   :  { %5139 = vmatmul.mubr.bf16.vlgmr.msra.gmra.mrb[32].mxu1 %v2252_v31  ;;  %5432 = vmatprep.subr.bf16.mxu0 %v7446_v7  ;;  %v2891_v31 = vrot.slane %v6436_v28, 4  ;;  %v5726_v28 = vld [vmem:[%s7379_s3 + $0x450] sm:$0xff]  }
 0x2c6   :  { %v7022_v50 = vpop.f32.mrb[132].mxu0  ;;  %5163 = vmatpush3.bf16.msra.mxu1 %v5697_v12  ;;  %5178 = vmatprep.mubr.msk.bf16.mxu1 %vm5777_vm0, %v7446_v7  ;;  %v5724_v12 = vld [vmem:[%s7379_s3 + $0x440] sm:$0xff]  }
 0x2c7   :  { %v5160_v57 = vpop.f32.mrb[133].mxu0  ;;  %5164 = vmatprep.subr.bf16.mxu1 %v7446_v7 }
 0x2c8   :  { %v2444_v35 = vpop.f32.mrb[134].mxu0  ;;  %5433 = vmatpush3.bf16.msra.mxu0 %v5698_v42 }
 0x2c9   :  { %v5161_v44 = vpop.f32.mrb[135].mxu0  ;;  %5434 = vmatprep.subr.bf16.mxu0 %v7446_v7 }
 0x2ca   :  { %5165 = vmatpush3.bf16.msra.mxu1 %v5699_v14  ;;  %v5725_v14 = vld [vmem:[%s7379_s3 + $0x448] sm:$0xff]   ;;  %v5727_v44 = vld [vmem:[%s7379_s3 + $0x458] sm:$0xff]  }
 0x2cb   :  { %5166 = vmatprep.subr.bf16.mxu1 %v7446_v7 }
 0x2cc   :  { %5435 = vmatpush3.bf16.msra.mxu0 %v5700_v53 }
 0x2cd   :  { %5436 = vmatprep.subr.bf16.mxu0 %v7446_v7 }
 0x2ce   :  { %5167 = vmatpush3.bf16.msra.mxu1 %v5701_v55  ;;  %v5728_v55 = vld [vmem:[%s7379_s3 + $0x460] sm:$0xff]  }
 0x2cf   :  { %5168 = vmatprep.subr.bf16.mxu1 %v7446_v7 }
 0x2d0   :  { %5437 = vmatpush3.bf16.msra.mxu0 %v5702_v23  ;;  %v5729_v23 = vld [vmem:[%s7379_s3 + $0x468] sm:$0xff]  }
 0x2d1   :  { %5462 = vmatprep.subr.bf16.mxu0 %v7446_v7 }
 0x2d2   :  { %5169 = vmatpush3.bf16.msra.mxu1 %v5703_v16 }
 0x2d3   :  { %5439 = vmatmul.mubr.bf16.vlgmr.msra.gmra.mrb[160].mxu0 %v6550_v52  ;;  %5170 = vmatprep.subr.bf16.mxu1 %v7446_v7  ;;  %v5706_v52 = vld [vmem:[%s7379_s3 + $0x2f0] sm:$0xff]  }
 0x2d4   :  { %5478 = vmatprep.mubr.msk.bf16.mxu0 %vm5777_vm0, %v7446_v7 }
 0x2d6   :  { %5171 = vmatpush3.bf16.msra.mxu1 %v5704_v38 }
 0x2d7   :  { %5172 = vmatprep.subr.bf16.mxu1 %v7446_v7 }
 0x2d8   :  { %v1589_v32 = vpop.f32.mrb[8].mxu1 }
 0x2d9   :  { %v1595_v5 = vadd.f32 %v1589_v32, %v1486_v9  ;;  %v5000_v25 = vpop.f32.mrb[9].mxu1  ;;  %v5721_v9 = vld [vmem:[%s7379_s3 + $0x3e8] sm:$0xff]  }
 0x2da   :  { %v1592_v29 = vpop.f32.mrb[10].mxu1  ;;  %5173 = vmatpush3.bf16.msra.mxu1 %v5705_v19 }
 0x2db   :  { %v5001_v59 = vpop.f32.mrb[11].mxu1  ;;  %5174 = vmatprep.subr.bf16.mxu1 %v7446_v7  ;;  %v5731_v29 = vld [vmem:[%s7379_s3 + $0x478] sm:$0xff]  }
 0x2dc   :  { %v3104_v59 = vrot.slane %v6485_v63, 4  ;;  %v5734_v63 = vld [vmem:[%s7379_s3 + $0x4d0] sm:$0xff]  }
 0x2de   :  { %5175 = vmatpush3.bf16.msra.mxu1 %v5706_v52  ;;  %v5732_v52 = vld [vmem:[%s7379_s3 + $0x4c0] sm:$0xff]  }
 0x2df   :  { %5176 = vmatprep.subr.bf16.mxu1 %v7446_v7 }
 0x2e2   :  { %5177 = vmatpush3.bf16.msra.mxu1 %v5707_v54 }
 0x2e3   :  { %5202 = vmatprep.subr.bf16.mxu1 %v7446_v7 }
 0x2e5   :  { %5179 = vmatmul.mubr.bf16.vlgmr.msra.gmra.mrb[36].mxu1 %v2465_v36 }
 0x2e6   :  { %v7071_v41 = vpop.f32.mrb[136].mxu0  ;;  %5203 = vmatpush3.bf16.msra.mxu1 %v5708_v60  ;;  %5218 = vmatprep.mubr.msk.bf16.mxu1 %vm5777_vm0, %v7446_v7  ;;  %v5733_v60 = vld [vmem:[%s7379_s3 + $0x4c8] sm:$0xff]  }
 0x2e7   :  { %v5200_v43 = vpop.f32.mrb[137].mxu0  ;;  %5204 = vmatprep.subr.bf16.mxu1 %v7446_v7 }
 0x2e8   :  { %v2657_v61 = vpop.f32.mrb[138].mxu0 }
 0x2e9   :  { %v5201_v22 = vpop.f32.mrb[139].mxu0  ;;  %v5735_v61 = vld [vmem:[%s7379_s3 + $0x4d8] sm:$0xff]  }
 0x2ea   :  { %5205 = vmatpush3.bf16.msra.mxu1 %v5709_v17  ;;  %v5736_v22 = vld [vmem:[%s7379_s3 + $0x4e0] sm:$0xff]  }
 0x2eb   :  { %5206 = vmatprep.subr.bf16.mxu1 %v7446_v7 }
 0x2ee   :  { %5207 = vmatpush3.bf16.msra.mxu1 %v5710_v34  ;;  %v5737_v34 = vld [vmem:[%s7379_s3 + $0x4e8] sm:$0xff]  }
 0x2ef   :  { %5208 = vmatprep.subr.bf16.mxu1 %v7446_v7 }
 0x2f2   :  { %5209 = vmatpush3.bf16.msra.mxu1 %v5711_v8 }
 0x2f3   :  { %5210 = vmatprep.subr.bf16.mxu1 %v7446_v7 }
 0x2f6   :  { %5211 = vmatpush3.bf16.msra.mxu1 %v5712_v18 }
 0x2f7   :  { %5212 = vmatprep.subr.bf16.mxu1 %v7446_v7 }
 0x2f8   :  { %v1697_v56 = vpop.f32.mrb[12].mxu1 }
 0x2f9   :  { %v1703_v58 = vadd.f32 %v1697_v56, %v1595_v5  ;;  %v5020_v1 = vpop.f32.mrb[13].mxu1  ;;  %v5730_v5 = vld [vmem:[%s7379_s3 + $0x470] sm:$0xff]  }
 0x2fa   :  { %v1700_v0 = vpop.f32.mrb[14].mxu1  ;;  %5213 = vmatpush3.bf16.msra.mxu1 %v5713_v20 }
 0x2fb   :  { %v5021_v49 = vpop.f32.mrb[15].mxu1  ;;  %5214 = vmatprep.subr.bf16.mxu1 %v7446_v7  ;;  %v5739_v0 = vld [vmem:[%s7379_s3 + $0x4f8] sm:$0xff]  }
 0x2fc   :  { %v3317_v49 = vrot.slane %v6476_v46, 4  ;;  %v5742_v46 = vld [vmem:[%s7379_s3 + $0x550] sm:$0xff]  }
 0x2fe   :  { %5215 = vmatpush3.bf16.msra.mxu1 %v5714_v62  ;;  %v5740_v62 = vld [vmem:[%s7379_s3 + $0x540] sm:$0xff]  }
 0x2ff   :  { %5216 = vmatprep.subr.bf16.mxu1 %v7446_v7 }
 0x302   :  { %5217 = vmatpush3.bf16.msra.mxu1 %v5715_v39 }
 0x303   :  { %5242 = vmatprep.subr.bf16.mxu1 %v7446_v7 }
 0x305   :  { %5219 = vmatmul.mubr.bf16.vlgmr.msra.gmra.mrb[40].mxu1 %v2678_v26 }
 0x306   :  { %v7108_v27 = vpop.f32.mrb[140].mxu0  ;;  %5243 = vmatpush3.bf16.msra.mxu1 %v5716_v10  ;;  %5258 = vmatprep.mubr.msk.bf16.mxu1 %vm5777_vm0, %v7446_v7  ;;  %v5741_v10 = vld [vmem:[%s7379_s3 + $0x548] sm:$0xff]  }
 0x307   :  { %v5240_v24 = vpop.f32.mrb[141].mxu0  ;;  %5244 = vmatprep.subr.bf16.mxu1 %v7446_v7 }
 0x308   :  { %v2870_v47 = vpop.f32.mrb[142].mxu0 }
 0x309   :  { %v5241_v40 = vpop.f32.mrb[143].mxu0  ;;  %v5743_v47 = vld [vmem:[%s7379_s3 + $0x558] sm:$0xff]  }
 0x30a   :  { %5245 = vmatpush3.bf16.msra.mxu1 %v5717_v45  ;;  %v5744_v40 = vld [vmem:[%s7379_s3 + $0x560] sm:$0xff]  }
 0x30b   :  { %5246 = vmatprep.subr.bf16.mxu1 %v7446_v7 }
 0x30e   :  { %5247 = vmatpush3.bf16.msra.mxu1 %v5718_v37  ;;  %v5745_v37 = vld [vmem:[%s7379_s3 + $0x568] sm:$0xff]  }
 0x30f   :  { %5248 = vmatprep.subr.bf16.mxu1 %v7446_v7 }
 0x312   :  { %5249 = vmatpush3.bf16.msra.mxu1 %v5719_v13 }
 0x313   :  { %5250 = vmatprep.subr.bf16.mxu1 %v7446_v7 }
 0x316   :  { %5251 = vmatpush3.bf16.msra.mxu1 %v5720_v51 }
 0x317   :  { %5252 = vmatprep.subr.bf16.mxu1 %v7446_v7 }
 0x318   :  { %v1802_v2 = vpop.f32.mrb[16].mxu1 }
 0x319   :  { %v1808_v3 = vadd.f32 %v1802_v2, %v1703_v58  ;;  %v5040_v48 = vpop.f32.mrb[17].mxu1  ;;  %v5738_v58 = vld [vmem:[%s7379_s3 + $0x4f0] sm:$0xff]  }
 0x31a   :  { %v1805_v4 = vpop.f32.mrb[18].mxu1  ;;  %5253 = vmatpush3.bf16.msra.mxu1 %v5721_v9 }
 0x31b   :  { %v5041_v30 = vpop.f32.mrb[19].mxu1  ;;  %5254 = vmatprep.subr.bf16.mxu1 %v7446_v7 }
 0x31c   :  { %v5748_v30 = vld [vmem:[%s7379_s3 + $0x5c0] sm:$0xff]  }
 0x31e   :  { %5255 = vmatpush3.bf16.msra.mxu1 %v5722_v11  ;;  %v5747_v11 = vld [vmem:[%s7379_s3 + $0x578] sm:$0xff]  }
 0x31f   :  { %5256 = vmatprep.subr.bf16.mxu1 %v7446_v7 }
 0x322   :  { %5257 = vmatpush3.bf16.msra.mxu1 %v5723_v15  ;;  %v3530_v15 = vrot.slane %v6523_v6, 4  ;;  %v5750_v6 = vld [vmem:[%s7379_s3 + $0x5d0] sm:$0xff]  }
 0x323   :  { %5282 = vmatprep.subr.bf16.mxu1 %v7446_v7 }
 0x325   :  { %5259 = vmatmul.mubr.bf16.vlgmr.msra.gmra.mrb[44].mxu1 %v2891_v31 }
 0x326   :  { %v7145_v42 = vpop.f32.mrb[144].mxu0  ;;  %5283 = vmatpush3.bf16.msra.mxu1 %v5724_v12  ;;  %5298 = vmatprep.mubr.msk.bf16.mxu1 %vm5777_vm0, %v7446_v7 }
 0x327   :  { %v5280_v57 = vpop.f32.mrb[145].mxu0  ;;  %5284 = vmatprep.subr.bf16.mxu1 %v7446_v7 }
 0x328   :  { %v3083_v35 = vpop.f32.mrb[146].mxu0 }
 0x329   :  { %v5281_v53 = vpop.f32.mrb[147].mxu0  ;;  %v5751_v35 = vld [vmem:[%s7379_s3 + $0x5d8] sm:$0xff]  }
 0x32a   :  { %5285 = vmatpush3.bf16.msra.mxu1 %v5725_v14  ;;  %v5752_v53 = vld [vmem:[%s7379_s3 + $0x5e0] sm:$0xff]  }
 0x32b   :  { %5286 = vmatprep.subr.bf16.mxu1 %v7446_v7 }
 0x32e   :  { %5287 = vmatpush3.bf16.msra.mxu1 %v5726_v28  ;;  %v5753_v28 = vld [vmem:[%s7379_s3 + $0x5e8] sm:$0xff]  }
 0x32f   :  { %5288 = vmatprep.subr.bf16.mxu1 %v7446_v7 }
 0x332   :  { %5289 = vmatpush3.bf16.msra.mxu1 %v5727_v44 }
 0x333   :  { %5290 = vmatprep.subr.bf16.mxu1 %v7446_v7 }
 0x336   :  { %5291 = vmatpush3.bf16.msra.mxu1 %v5728_v55 }
 0x337   :  { %5292 = vmatprep.subr.bf16.mxu1 %v7446_v7 }
 0x338   :  { %v1910_v16 = vpop.f32.mrb[20].mxu1 }
 0x339   :  { %v1916_v38 = vadd.f32 %v1910_v16, %v1808_v3  ;;  %v5060_v19 = vpop.f32.mrb[21].mxu1  ;;  %v5746_v3 = vld [vmem:[%s7379_s3 + $0x570] sm:$0xff]  }
 0x33a   :  { %v1913_v32 = vpop.f32.mrb[22].mxu1  ;;  %5293 = vmatpush3.bf16.msra.mxu1 %v5729_v23 }
 0x33b   :  { %v5061_v25 = vpop.f32.mrb[23].mxu1  ;;  %5294 = vmatprep.subr.bf16.mxu1 %v7446_v7 }
 0x33c   :  { %v3743_v25 = vrot.slane %v6518_v33, 4 }
 0x33e   :  { %5295 = vmatpush3.bf16.msra.mxu1 %v5730_v5  ;;  %v5755_v5 = vld [vmem:[%s7379_s3 + $0x5f8] sm:$0xff]  }
 0x33f   :  { %5296 = vmatprep.subr.bf16.mxu1 %v7446_v7 }
 0x342   :  { %5297 = vmatpush3.bf16.msra.mxu1 %v5731_v29 }
 0x343   :  { %5322 = vmatprep.subr.bf16.mxu1 %v7446_v7 }
 0x345   :  { %5299 = vmatmul.mubr.bf16.vlgmr.msra.gmra.mrb[48].mxu1 %v3104_v59 }
 0x346   :  { %v7182_v54 = vpop.f32.mrb[148].mxu0  ;;  %5323 = vmatpush3.bf16.msra.mxu1 %v5732_v52  ;;  %5338 = vmatprep.mubr.msk.bf16.mxu1 %vm5777_vm0, %v7446_v7 }
 0x347   :  { %v5320_v36 = vpop.f32.mrb[149].mxu0  ;;  %5324 = vmatprep.subr.bf16.mxu1 %v7446_v7 }
 0x348   :  { %v3296_v17 = vpop.f32.mrb[150].mxu0 }
 0x349   :  { %v5321_v43 = vpop.f32.mrb[151].mxu0 }
 0x34a   :  { %5325 = vmatpush3.bf16.msra.mxu1 %v5733_v60 }
 0x34b   :  { %5326 = vmatprep.subr.bf16.mxu1 %v7446_v7 }
 0x34e   :  { %5327 = vmatpush3.bf16.msra.mxu1 %v5734_v63 }
 0x34f   :  { %5328 = vmatprep.subr.bf16.mxu1 %v7446_v7 }
 0x352   :  { %5329 = vmatpush3.bf16.msra.mxu1 %v5735_v61 }
 0x353   :  { %5330 = vmatprep.subr.bf16.mxu1 %v7446_v7 }
 0x356   :  { %5331 = vmatpush3.bf16.msra.mxu1 %v5736_v22 }
 0x357   :  { %5332 = vmatprep.subr.bf16.mxu1 %v7446_v7 }
 0x358   :  { %v2015_v8 = vpop.f32.mrb[24].mxu1 }
 0x359   :  { %v2021_v18 = vadd.f32 %v2015_v8, %v1916_v38  ;;  %v5080_v20 = vpop.f32.mrb[25].mxu1  ;;  %v5754_v38 = vld [vmem:[%s7379_s3 + $0x5f0] sm:$0xff]  }
 0x35a   :  { %v2018_v56 = vpop.f32.mrb[26].mxu1  ;;  %5333 = vmatpush3.bf16.msra.mxu1 %v5737_v34 }
 0x35b   :  { %v5081_v1 = vpop.f32.mrb[27].mxu1  ;;  %5334 = vmatprep.subr.bf16.mxu1 %v7446_v7  ;;  %v5756_v56 = vld [vmem:[%s7381_s5] sm:$0xff]  }
 0x35c   :  { %v5760_v1 = vld [vmem:[%s7381_s5 + $0x20] sm:$0xff]  }
 0x35e   :  { %5335 = vmatpush3.bf16.msra.mxu1 %v5738_v58  ;;  %v5757_v58 = vld [vmem:[%s7381_s5 + $0x8] sm:$0xff]  }
 0x35f   :  { %5336 = vmatprep.subr.bf16.mxu1 %v7446_v7 }
 0x362   :  { %5337 = vmatpush3.bf16.msra.mxu1 %v5739_v0  ;;  %v5761_v0 = vld [vmem:[%s7381_s5 + $0x28] sm:$0xff]  }
 0x363   :  { %5362 = vmatprep.subr.bf16.mxu1 %v7446_v7 }
 0x365   :  { %5339 = vmatmul.mubr.bf16.vlgmr.msra.gmra.mrb[52].mxu1 %v3317_v49 }
 0x366   :  { %v7219_v39 = vpop.f32.mrb[152].mxu0  ;;  %5363 = vmatpush3.bf16.msra.mxu1 %v5740_v62  ;;  %5378 = vmatprep.mubr.msk.bf16.mxu1 %vm5777_vm0, %v7446_v7 }
 0x367   :  { %v5360_v26 = vpop.f32.mrb[153].mxu0  ;;  %5364 = vmatprep.subr.bf16.mxu1 %v7446_v7 }
 0x368   :  { %v3509_v45 = vpop.f32.mrb[154].mxu0 }
 0x369   :  { %v5361_v24 = vpop.f32.mrb[155].mxu0  ;;  %v5762_v45 = vld [vmem:[%s7381_s5 + $0x30] sm:$0xff]  }
 0x36a   :  { %5365 = vmatpush3.bf16.msra.mxu1 %v5741_v10 }
 0x36b   :  { %5366 = vmatprep.subr.bf16.mxu1 %v7446_v7 }
 0x36e   :  { %5367 = vmatpush3.bf16.msra.mxu1 %v5742_v46 }
 0x36f   :  { %5368 = vmatprep.subr.bf16.mxu1 %v7446_v7 }
 0x372   :  { %5369 = vmatpush3.bf16.msra.mxu1 %v5743_v47  ;;  %v5763_v47 = vld [vmem:[%s7381_s5 + $0x38] sm:$0xff]  }
 0x373   :  { %5370 = vmatprep.subr.bf16.mxu1 %v7446_v7 }
 0x376   :  { %5371 = vmatpush3.bf16.msra.mxu1 %v5744_v40  ;;  %v5764_v40 = vld [vmem:[%s7382_s7] sm:$0xff]  }
 0x377   :  { %5372 = vmatprep.subr.bf16.mxu1 %v7446_v7  ;;  %5463 = vmatpush3.bf16.msra.mxu0 %v5764_v40 }
 0x378   :  { %v2123_v13 = vpop.f32.mrb[28].mxu1  ;;  %5464 = vmatprep.subr.bf16.mxu0 %v7446_v7 }
 0x379   :  { %v2129_v51 = vadd.f32 %v2123_v13, %v2021_v18  ;;  %v5100_v9 = vpop.f32.mrb[29].mxu1  ;;  %v5767_v13 = vld [vmem:[%s7382_s7 + $0x18] sm:$0xff]  }
 0x37a   :  { %v2126_v2 = vpop.f32.mrb[30].mxu1  ;;  %5373 = vmatpush3.bf16.msra.mxu1 %v5745_v37  ;;  %v5765_v37 = vld [vmem:[%s7382_s7 + $0x8] sm:$0xff]  }
 0x37b   :  { %v5101_v48 = vpop.f32.mrb[31].mxu1  ;;  %5374 = vmatprep.subr.bf16.mxu1 %v7446_v7  ;;  %v2234_v4 = vadd.f32 %v6949_v21, %v2129_v51  ;;  %v5749_v21 = vld [vmem:[%s7379_s3 + $0x5c8] sm:$0xff]   ;;  %5465 = vmatpush3.bf16.msra.mxu0 %v5765_v37  ;;  %v5768_v51 = vld [vmem:[%s7382_s7 + $0x20] sm:$0xff]  }
 0x37c   :  { %5466 = vmatprep.subr.bf16.mxu0 %v7446_v7  ;;  %v5769_v9 = vld [vmem:[%s7382_s7 + $0x28] sm:$0xff]  }
 0x37e   :  { %5375 = vmatpush3.bf16.msra.mxu1 %v5746_v3 }
 0x37f   :  { %5376 = vmatprep.subr.bf16.mxu1 %v7446_v7 }
 0x382   :  { %5377 = vmatpush3.bf16.msra.mxu1 %v5747_v11 }
 0x383   :  { %5402 = vmatprep.subr.bf16.mxu1 %v7446_v7 }
 0x385   :  { %5379 = vmatmul.mubr.bf16.vlgmr.msra.gmra.mrb[56].mxu1 %v3530_v15 }
 0x386   :  { %v7257_v12 = vpop.f32.mrb[156].mxu0  ;;  %5403 = vmatpush3.bf16.msra.mxu1 %v5748_v30  ;;  %5418 = vmatprep.mubr.msk.bf16.mxu1 %vm5777_vm0, %v7446_v7 }
 0x387   :  { %v5400_v31 = vpop.f32.mrb[157].mxu0  ;;  %5404 = vmatprep.subr.bf16.mxu1 %v7446_v7 }
 0x388   :  { %v3722_v14 = vpop.f32.mrb[158].mxu0 }
 0x389   :  { %v5401_v57 = vpop.f32.mrb[159].mxu0 }
 0x38a   :  { %5405 = vmatpush3.bf16.msra.mxu1 %v5749_v21 }
 0x38b   :  { %5406 = vmatprep.subr.bf16.mxu1 %v7446_v7 }
 0x38e   :  { %5407 = vmatpush3.bf16.msra.mxu1 %v5750_v6 }
 0x38f   :  { %5408 = vmatprep.subr.bf16.mxu1 %v7446_v7 }
 0x392   :  { %5409 = vmatpush3.bf16.msra.mxu1 %v5751_v35 }
 0x393   :  { %5410 = vmatprep.subr.bf16.mxu1 %v7446_v7 }
 0x396   :  { %5411 = vmatpush3.bf16.msra.mxu1 %v5752_v53 }
 0x397   :  { %5412 = vmatprep.subr.bf16.mxu1 %v7446_v7 }
 0x398   :  { %v2336_v44 = vpop.f32.mrb[32].mxu1 }
 0x399   :  { %v2342_v55 = vadd.f32 %v2336_v44, %v2234_v4  ;;  %v5140_v23 = vpop.f32.mrb[33].mxu1 }
 0x39a   :  { %v2339_v16 = vpop.f32.mrb[34].mxu1  ;;  %5413 = vmatpush3.bf16.msra.mxu1 %v5753_v28 }
 0x39b   :  { %v5141_v19 = vpop.f32.mrb[35].mxu1  ;;  %5414 = vmatprep.subr.bf16.mxu1 %v7446_v7  ;;  %v2447_v32 = vadd.f32 %v7022_v50, %v2342_v55 }
 0x39e   :  { %5415 = vmatpush3.bf16.msra.mxu1 %v5754_v38 }
 0x39f   :  { %5416 = vmatprep.subr.bf16.mxu1 %v7446_v7 }
 0x3a2   :  { %5417 = vmatpush3.bf16.msra.mxu1 %v5755_v5 }
 0x3a3   :  { %5442 = vmatprep.subr.bf16.mxu1 %v7446_v7 }
 0x3a5   :  { %5419 = vmatmul.mubr.bf16.vlgmr.msra.gmra.mrb[60].mxu1 %v3743_v25 }
 0x3a6   :  { %v7292_v29 = vpop.f32.mrb[160].mxu0  ;;  %5458 = vmatprep.mubr.msk.bf16.mxu1 %vm5777_vm0, %v7446_v7  ;;  %5443 = vmatpush3.bf16.msra.mxu1 %v5756_v56 }
 0x3a7   :  { %v5440_v52 = vpop.f32.mrb[161].mxu0  ;;  %5444 = vmatprep.subr.bf16.mxu1 %v7446_v7 }
 0x3a8   :  { %v3935_v50 = vpop.f32.mrb[162].mxu0 }
 0x3a9   :  { %v5441_v59 = vpop.f32.mrb[163].mxu0 }
 0x3aa   :  { %5445 = vmatpush3.bf16.msra.mxu1 %v5757_v58  ;;  %v5770_v59 = vld [vmem:[%s7382_s7 + $0x30] sm:$0xff]  }
 0x3ab   :  { %5446 = vmatprep.subr.bf16.mxu1 %v7446_v7 }
 0x3b8   :  { %v2549_v60 = vpop.f32.mrb[36].mxu1 }
 0x3b9   :  { %v2555_v36 = vadd.f32 %v2549_v60, %v2447_v32  ;;  %v5180_v17 = vpop.f32.mrb[37].mxu1 }
 0x3ba   :  { %v2552_v43 = vpop.f32.mrb[38].mxu1 }
 0x3bb   :  { %v5181_v63 = vpop.f32.mrb[39].mxu1  ;;  %v2660_v61 = vadd.f32 %v7071_v41, %v2555_v36  ;;  %v5758_v41 = vld [vmem:[%s7381_s5 + $0x10] sm:$0xff]  }
 0x3bc   :  { %5447 = vmatpush3.bf16.msra.mxu1 %v5758_v41 }
 0x3bd   :  { %5448 = vmatprep.subr.bf16.mxu1 %v7446_v7 }
 0x3d8   :  { %v2762_v22 = vpop.f32.mrb[40].mxu1 }
 0x3d9   :  { %v2768_v33 = vadd.f32 %v2762_v22, %v2660_v61  ;;  %v5220_v34 = vpop.f32.mrb[41].mxu1 }
 0x3da   :  { %v2765_v8 = vpop.f32.mrb[42].mxu1 }
 0x3db   :  { %v5221_v18 = vpop.f32.mrb[43].mxu1  ;;  %v2873_v20 = vadd.f32 %v7108_v27, %v2768_v33  ;;  %v5759_v27 = vld [vmem:[%s7381_s5 + $0x18] sm:$0xff]   ;;  %v4173_v33 = vlaneseq }
 0x3dc   :  { %5449 = vmatpush3.bf16.msra.mxu1 %v5759_v27 }
 0x3dd   :  { %5450 = vmatprep.subr.bf16.mxu1 %v7446_v7  ;;  %v4174_v34 = vand.u32 127, %v4173_v33 }
 0x3df   :  { %vm4175_vm1 = vcmp.lt.s32.totalorder %v4174_v34, 3 }
 0x3e0   :  { %5451 = vmatpush3.bf16.msra.mxu1 %v5760_v1 }
 0x3e1   :  { %5452 = vmatprep.subr.bf16.mxu1 %v7446_v7 }
 0x3e4   :  { %5453 = vmatpush3.bf16.msra.mxu1 %v5761_v0 }
 0x3e5   :  { %5454 = vmatprep.subr.bf16.mxu1 %v7446_v7 }
 0x3e8   :  { %5455 = vmatpush3.bf16.msra.mxu1 %v5762_v45 }
 0x3e9   :  { %5456 = vmatprep.subr.bf16.mxu1 %v7446_v7 }
 0x3ec   :  { %5457 = vmatpush3.bf16.msra.mxu1 %v5763_v47 }
 0x3f8   :  { %v2975_v62 = vpop.f32.mrb[44].mxu1 }
 0x3f9   :  { %v2981_v49 = vadd.f32 %v2975_v62, %v2873_v20  ;;  %v5260_v10 = vpop.f32.mrb[45].mxu1 }
 0x3fa   :  { %v2978_v26 = vpop.f32.mrb[46].mxu1 }
 0x3fb   :  { %v5261_v24 = vpop.f32.mrb[47].mxu1  ;;  %v3086_v46 = vadd.f32 %v7145_v42, %v2981_v49  ;;  %v5766_v42 = vld [vmem:[%s7382_s7 + $0x10] sm:$0xff]  }
 0x3fc   :  { %5467 = vmatpush3.bf16.msra.mxu0 %v5766_v42 }
 0x3fd   :  { %5468 = vmatprep.subr.bf16.mxu0 %v7446_v7 }
 0x400   :  { %5469 = vmatpush3.bf16.msra.mxu0 %v5767_v13 }
 0x401   :  { %5470 = vmatprep.subr.bf16.mxu0 %v7446_v7 }
 0x404   :  { %5471 = vmatpush3.bf16.msra.mxu0 %v5768_v51 }
 0x405   :  { %5472 = vmatprep.subr.bf16.mxu0 %v7446_v7 }
 0x408   :  { %5473 = vmatpush3.bf16.msra.mxu0 %v5769_v9 }
 0x409   :  { %5474 = vmatprep.subr.bf16.mxu0 %v7446_v7 }
 0x40c   :  { %5475 = vmatpush3.bf16.msra.mxu0 %v5770_v59 }
 0x40d   :  { %5476 = vmatprep.subr.bf16.mxu0 %v7446_v7  ;;  %v4474_v7 = vld [vmem:[%s7385_s8] ss:$0 sm:$0xff] }
 0x418   :  { %v3188_v2 = vpop.f32.mrb[48].mxu1 }
 0x419   :  { %v3194_v3 = vadd.f32 %v3188_v2, %v3086_v46  ;;  %v5300_v48 = vpop.f32.mrb[49].mxu1 }
 0x41a   :  { %v3191_v4 = vpop.f32.mrb[50].mxu1 }
 0x41b   :  { %v5301_v11 = vpop.f32.mrb[51].mxu1  ;;  %v3299_v30 = vadd.f32 %v7182_v54, %v3194_v3  ;;  %v4464_v54 = vld [vmem:[%s7383_s4] ss:$0 sm:$0xff] }
 0x438   :  { %v3401_v15 = vpop.f32.mrb[52].mxu1 }
 0x439   :  { %v3407_v21 = vadd.f32 %v3401_v15, %v3299_v30  ;;  %v5340_v31 = vpop.f32.mrb[53].mxu1 }
 0x43a   :  { %v3404_v14 = vpop.f32.mrb[54].mxu1 }
 0x43b   :  { %v5341_v57 = vpop.f32.mrb[55].mxu1  ;;  %v3512_v6 = vadd.f32 %v7219_v39, %v3407_v21 }
 0x458   :  { %v3614_v35 = vpop.f32.mrb[56].mxu1 }
 0x459   :  { %v3620_v53 = vadd.f32 %v3614_v35, %v3512_v6  ;;  %v5380_v28 = vpop.f32.mrb[57].mxu1 }
 0x45a   :  { %v3617_v44 = vpop.f32.mrb[58].mxu1 }
 0x45b   :  { %v5381_v55 = vpop.f32.mrb[59].mxu1  ;;  %v3725_v23 = vadd.f32 %v7257_v12, %v3620_v53  ;;  %v5771_v12 = vld [vmem:[%s7382_s7 + $0x38] sm:$0xff]  }
 0x45c   :  { %5477 = vmatpush3.bf16.msra.mxu0 %v5771_v12 }
 0x478   :  { %v3827_v16 = vpop.f32.mrb[60].mxu1 }
 0x479   :  { %v3833_v38 = vadd.f32 %v3827_v16, %v3725_v23  ;;  %v5420_v19 = vpop.f32.mrb[61].mxu1 }
 0x47a   :  { %v3830_v32 = vpop.f32.mrb[62].mxu1 }
 0x47b   :  { %v3938_v5 = vadd.f32 %v7292_v29, %v3833_v38  ;;  %v5421_v25 = vpop.f32.mrb[63].mxu1  ;;  %v4465_v29 = vld [vmem:[%s7384_s6] ss:$0 sm:$0xff] }
 0x47d   :  { %v3946_v52 = vadd.f32 %v4464_v54, %v3938_v5 }
 0x47f   :  { %v3947_v39 = vmax.f32 %v3946_v52, 0.0 }
 0x481   :  { %v3948_v50 = vpack.c.bf16 %v3947_v39, %v3947_v39 }
 0x483   :  { %5459 = vmatmul.mubr.bf16.vlgmr.msra.gmra.mrb[64].mxu1 %v3948_v50 }
 0x556   :  { %v4054_v60 = vpop.f32.mrb[64].mxu1 }
 0x557   :  { %v4055_v36 = vadd.f32 %v4465_v29, %v4054_v60  ;;  %v5460_v17 = vpop.f32.mrb[65].mxu1 }
 0x558   :  { %v4057_v43 = vpop.f32.mrb[66].mxu1 }
 0x559   :  { %v4060_v63 = vmax.f32 %v4055_v36, 0.0  ;;  %v5461_v61 = vpop.f32.mrb[67].mxu1 }
 0x55b   :  { %v4061_v22 = vpack.c.bf16 %v4060_v63, %v4060_v63 }
 0x55d   :  { %5479 = vmatmul.mubr.bf16.vlgmr.msra.gmra.mrb[164].mxu0 %v4061_v22 }
 0x630   :  { %v4167_v8 = vpop.f32.mrb[164].mxu0 }
 0x631   :  { %v4168_v18 = vadd.f32 %v4474_v7, %v4167_v8  ;;  %v5480_v20 = vpop.f32.mrb[165].mxu0 }
 0x632   :  { %v4170_v56 = vpop.f32.mrb[166].mxu0 }
 0x633   :  { %v5481_v58 = vpop.f32.mrb[167].mxu0  ;;  %v4176_v41 = vsel %vm4175_vm1, %v4168_v18, -inf }
 0x634   :  { %4177 = vmax.xlane.f32.xlu0 %v4176_v41 }
 0x6c1   :  { %v4178_v27 = vpop.xlane.xlu0 %4177 }
 0x6c2   :  { %v4179_v1 = vsub.f32 %v4176_v41, %v4178_v27 }
 0x6c4   :  { %v4180_v0 = vmul.f32 1.442695, %v4179_v1 }
 0x6c6   :  { %5772 = vpow2.f32 %v4180_v0 }
 0x6d0   :  { %v5773_v62 = vpop.eup %5772 }
 0x6d1   :  { %4182 = vadd.xlane.f32.xlu0 %v5773_v62 }
 0x75e   :  { %v4183_v49 = vpop.xlane.xlu0 %4182 }
 0x75f   :  { %5774 = vrcp.f32 %v4183_v49 }
 0x769   :  { %v5775_v10 = vpop.eup %5774 }
 0x76a   :  { %v4185_v26 = vmul.f32 %v5775_v10, %v5773_v62 }
 0x76c   :  { %4186 = vst [vmem:[%s7386_s9] sm:$0xff] %v4185_v26 }

</bundles_post_ra>
